<compile_context>
chip_gen: v6e
topology: v6e:2x2x1
jax: 0.10.0
libtpu: 0.0.40
codegen_flags: <defaults>
</compile_context>

<pallas_src>
import functools

import jax
import jax.numpy as jnp
from jax import lax
from jax.experimental import pallas as pl
from jax.experimental.pallas import tpu as pltpu

_TILE_BYTES = 2 << 20          # per-block budget for the tiled fallback paths
_FUSED_BN_MAX_BYTES = 2 << 20  # single-block fused-stats BN path threshold
_FUSED_BN_MAX_BATCH = 8        # static unroll bound for the in-kernel batch loop


# --------------------------------------------------------------------------
# Kernel 1: fused Linear + Swish (bf16 MXU matmul, f32 accumulate, Swish epilogue).
# --------------------------------------------------------------------------
def _linear_swish_kernel(z_ref, w_ref, b_ref, o_ref):
    acc = jnp.dot(z_ref[...], w_ref[...], preferred_element_type=jnp.float32)
    acc = acc + b_ref[...]
    o_ref[...] = (acc * jax.nn.sigmoid(acc)).astype(o_ref.dtype)


def linear_swish(z, w, b, *, max_w_block_bytes=6 << 20):
    """y = swish(z @ w + b). z:(B,K), w:(K,N), b:(N,). Output keeps z.dtype."""
    B, K = z.shape
    K2, N = w.shape
    assert K == K2 and b.shape == (N,)
    out_dtype = z.dtype
    # bf16 operands: MXU-native on all generations, halves the dominant weight
    # read (the op is weight-bandwidth bound at these sizes).  Accumulation and
    # the Swish epilogue stay in f32.
    zc = z.astype(jnp.bfloat16)
    wc = w.astype(jnp.bfloat16)        # no-op convert if params already bf16
    b2 = b.astype(jnp.float32).reshape(1, N)

    if K * N * wc.dtype.itemsize <= max_w_block_bytes:
        tn = N                         # whole weight resident -> grid = (1,)
    else:
        tn = min(N, max(128, (max_w_block_bytes // (K * wc.dtype.itemsize))
                        // 128 * 128))
    grid = (pl.cdiv(N, tn),)
    return pl.pallas_call(
        _linear_swish_kernel,
        out_shape=jax.ShapeDtypeStruct((B, N), out_dtype),
        grid_spec=pltpu.PrefetchScalarGridSpec(
            num_scalar_prefetch=0,
            grid=grid,
            in_specs=[
                pl.BlockSpec((B, K), lambda j: (0, 0)),     # tiny lhs, resident
                pl.BlockSpec((K, tn), lambda j: (0, j)),
                pl.BlockSpec((1, tn), lambda j: (0, j)),
            ],
            out_specs=pl.BlockSpec((B, tn), lambda j: (0, j)),
        ),
        compiler_params=pltpu.CompilerParams(
            dimension_semantics=("parallel",)),
    )(zc, wc, b2)


# --------------------------------------------------------------------------
# Kernel 2a: fully fused BatchNorm (batch statistics) + Swish, single block.
# The whole (N, C, H*W) activation sits in VMEM; per-channel mean/var are lane
# reductions accumulated over the small static batch dim, then affine + Swish.
# --------------------------------------------------------------------------
def _bn_stats_swish_kernel(x_ref, g_ref, b_ref, o_ref, *, eps):
    n, _, hw = x_ref.shape
    inv_cnt = 1.0 / float(n * hw)
    # Pass 1: per-channel mean (2-D lane reductions only).
    s = jnp.sum(x_ref[0].astype(jnp.float32), axis=1, keepdims=True)
    for i in range(1, n):
        s = s + jnp.sum(x_ref[i].astype(jnp.float32), axis=1, keepdims=True)
    mean = s * inv_cnt                                         # (C, 1)
    # Pass 2: per-channel biased variance (matches train-mode BatchNorm).
    d = x_ref[0].astype(jnp.float32) - mean
    v = jnp.sum(d * d, axis=1, keepdims=True)
    for i in range(1, n):
        di = x_ref[i].astype(jnp.float32) - mean
        v = v + jnp.sum(di * di, axis=1, keepdims=True)
    var = v * inv_cnt                                          # (C, 1)
    scale = g_ref[...] * lax.rsqrt(var + eps)                  # (C, 1)
    shift = b_ref[...] - mean * scale                          # (C, 1)
    # Pass 3: affine + Swish, written back per batch slice.
    for i in range(n):
        y = x_ref[i].astype(jnp.float32) * scale + shift       # (C, HW)
        o_ref[i] = (y * jax.nn.sigmoid(y)).astype(o_ref.dtype)


# --------------------------------------------------------------------------
# Kernel 2b: tiled affine + Swish fallback (stats computed by XLA) for slabs
# too large for the single-block fused path.
# --------------------------------------------------------------------------
def _affine_swish_kernel(x_ref, s_ref, b_ref, o_ref):
    x = x_ref[...].astype(jnp.float32)   # f32 internal math (bf16-safe on v5e)
    y = x * s_ref[...] + b_ref[...]
    o_ref[...] = (y * jax.nn.sigmoid(y)).astype(o_ref.dtype)


def _row_tile(rows, row_bytes):
    """Largest row tile whose block stays under _TILE_BYTES (mult. of 8, <= rows)."""
    if rows * row_bytes <= _TILE_BYTES:
        return rows                      # single block: small-array fast path
    rt = max(8, (_TILE_BYTES // max(row_bytes, 1)) // 8 * 8)
    return min(rt, rows)


def batchnorm_swish(x, gamma, beta, *, eps=1e-5):
    """Train-mode BatchNorm2d (batch statistics, matching a freshly constructed
    PyTorch module) fused with Swish. x is NCHW."""
    N, C, H, W = x.shape
    HW = H * W
    g = gamma.astype(jnp.float32)
    b = beta.astype(jnp.float32)
    slab_bytes = x.size * x.dtype.itemsize

    if slab_bytes <= _FUSED_BN_MAX_BYTES and N <= _FUSED_BN_MAX_BATCH:
        # Fully fused fast path: stats + affine + Swish in one Pallas call,
        # one HBM read and one HBM write of x, no XLA reduce/tile ops.
        x3 = x.reshape(N, C, HW)                       # free reshape
        out3 = pl.pallas_call(
            functools.partial(_bn_stats_swish_kernel, eps=eps),
            out_shape=jax.ShapeDtypeStruct((N, C, HW), x.dtype),
            grid_spec=pltpu.PrefetchScalarGridSpec(
                num_scalar_prefetch=0,
                grid=(1,),
                in_specs=[
                    pl.BlockSpec((N, C, HW), lambda i: (0, 0, 0)),
                    pl.BlockSpec((C, 1), lambda i: (0, 0)),
                    pl.BlockSpec((C, 1), lambda i: (0, 0)),
                ],
                out_specs=pl.BlockSpec((N, C, HW), lambda i: (0, 0, 0)),
            ),
            compiler_params=pltpu.CompilerParams(
                dimension_semantics=("arbitrary",)),
        )(x3, g.reshape(C, 1), b.reshape(C, 1))
        return out3.reshape(N, C, H, W)

    # Fallback for larger batches/slabs: XLA batch stats, folded per-row
    # scale/shift, tiled Pallas affine + Swish.
    mean = jnp.mean(x, axis=(0, 2, 3))
    var = jnp.var(x, axis=(0, 2, 3))
    scale = g * lax.rsqrt(var + eps)
    shift = b - mean * scale

    rows = N * C
    x2d = x.reshape(rows, HW)                      # row r = (n, c); no padding
    s2d = jnp.tile(scale, N).reshape(rows, 1)
    b2d = jnp.tile(shift, N).reshape(rows, 1)

    rt = _row_tile(rows, HW * x.dtype.itemsize)
    grid = (pl.cdiv(rows, rt),)
    out2d = pl.pallas_call(
        _affine_swish_kernel,
        out_shape=jax.ShapeDtypeStruct((rows, HW), x.dtype),
        grid_spec=pltpu.PrefetchScalarGridSpec(
            num_scalar_prefetch=0,
            grid=grid,
            in_specs=[
                pl.BlockSpec((rt, HW), lambda i: (i, 0)),
                pl.BlockSpec((rt, 1), lambda i: (i, 0)),
                pl.BlockSpec((rt, 1), lambda i: (i, 0)),
            ],
            out_specs=pl.BlockSpec((rt, HW), lambda i: (i, 0)),
        ),
        compiler_params=pltpu.CompilerParams(
            dimension_semantics=("parallel",)),
    )(x2d, s2d, b2d)
    return out2d.reshape(N, C, H, W)


# --------------------------------------------------------------------------
# Kernel 3: final elementwise Sigmoid on a lane-dense slab (single block at
# these sizes), HBM buffer reused via input_output_aliases.
# --------------------------------------------------------------------------
def _sigmoid_kernel(x_ref, o_ref):
    x = x_ref[...].astype(jnp.float32)
    o_ref[...] = jax.nn.sigmoid(x).astype(o_ref.dtype)


def sigmoid_pallas(x):
    shape, n = x.shape, x.size
    lane = next((l for l in (1024, 512, 256, 128) if n % l == 0), None)
    if lane is None:
        # TODO(synk): ragged element count; fall back to XLA instead of padding.
        return jax.nn.sigmoid(x)
    rows = n // lane
    rt = _row_tile(rows, lane * x.dtype.itemsize)
    grid = (pl.cdiv(rows, rt),)
    out = pl.pallas_call(
        _sigmoid_kernel,
        out_shape=jax.ShapeDtypeStruct((rows, lane), x.dtype),
        grid_spec=pltpu.PrefetchScalarGridSpec(
            num_scalar_prefetch=0,
            grid=grid,
            in_specs=[pl.BlockSpec((rt, lane), lambda i: (i, 0))],
            out_specs=pl.BlockSpec((rt, lane), lambda i: (i, 0)),
        ),
        input_output_aliases={0: 0},     # reuse the input's HBM buffer
        compiler_params=pltpu.CompilerParams(
            dimension_semantics=("parallel",)),
    )(x.reshape(rows, lane))
    return out.reshape(shape)


# --------------------------------------------------------------------------
# ConvTranspose2d (PyTorch semantics) via XLA's dilated convolution.
# Weight flip/transpose is hoisted into one-time parameter preparation.
# --------------------------------------------------------------------------
def _convt_weight_to_oihw(w):
    """PyTorch ConvTranspose2d weight (C_in, C_out, kH, kW) -> flipped OIHW."""
    return jnp.flip(w, axis=(2, 3)).transpose(1, 0, 2, 3)


def conv_transpose2d_oihw(x, w_oihw, stride, padding):
    """x: (N, C_in, H, W); w_oihw: pre-flipped (C_out, C_in, kH, kW)."""
    # TODO(synk): the transposed convolution itself has no clean Pallas mapping
    # here; it stays in XLA while its BN/Swish/Sigmoid epilogue runs in Pallas.
    kh, kw = w_oihw.shape[2], w_oihw.shape[3]
    pad = ((kh - 1 - padding,) * 2, (kw - 1 - padding,) * 2)
    return lax.conv_general_dilated(
        x, w_oihw, window_strides=(1, 1), padding=pad,
        lhs_dilation=(stride, stride),
        dimension_numbers=("NCHW", "OIHW", "NCHW"))


# --------------------------------------------------------------------------
# Parameters and full ImageDecoderConv forward.
# --------------------------------------------------------------------------
def init_decoder_params(key, n_latents):
    ks = jax.random.split(key, 12)

    def w_init(k, shape, fan_in):
        return jax.random.normal(k, shape, jnp.float32) / jnp.sqrt(fan_in)

    return {
        "lin_w": w_init(ks[0], (n_latents, 256 * 5 * 5), n_latents),
        "lin_b": 0.01 * jax.random.normal(ks[1], (256 * 5 * 5,), jnp.float32),
        # PyTorch ConvTranspose2d weight layout: (C_in, C_out, kH, kW).
        "ct1_w": w_init(ks[2], (256, 128, 4, 4), 256 * 16),
        "ct2_w": w_init(ks[3], (128, 64, 4, 4), 128 * 16),
        "ct3_w": w_init(ks[4], (64, 32, 4, 4), 64 * 16),
        "ct4_w": w_init(ks[5], (32, 3, 4, 4), 32 * 16),
        "bn1_g": 1.0 + 0.1 * jax.random.normal(ks[6], (128,), jnp.float32),
        "bn1_b": 0.1 * jax.random.normal(ks[7], (128,), jnp.float32),
        "bn2_g": 1.0 + 0.1 * jax.random.normal(ks[8], (64,), jnp.float32),
        "bn2_b": 0.1 * jax.random.normal(ks[9], (64,), jnp.float32),
        "bn3_g": 1.0 + 0.1 * jax.random.normal(ks[10], (32,), jnp.float32),
        "bn3_b": 0.1 * jax.random.normal(ks[11], (32,), jnp.float32),
    }


def prepare_decoder_params(params):
    """One-time parameter preparation hoisted out of the per-call forward:
    flip+transpose ConvTranspose weights to OIHW and store the Linear weight
    in bf16 (MXU-native operand; halves the dominant weight read)."""
    p = dict(params)
    p["lin_w"] = params["lin_w"].astype(jnp.bfloat16)
    for k in ("ct1_w", "ct2_w", "ct3_w", "ct4_w"):
        p[k] = _convt_weight_to_oihw(params[k])
    return p


def image_decoder_conv_forward(params, z):
    """Pallas-accelerated ImageDecoderConv.forward(z). `params` is prepared."""
    h = linear_swish(z, params["lin_w"], params["lin_b"])           # Pallas (MXU+Swish)
    h = h.reshape(-1, 256, 5, 5)
    h = conv_transpose2d_oihw(h, params["ct1_w"], 1, 0)             # (B,128,8,8)
    h = batchnorm_swish(h, params["bn1_g"], params["bn1_b"])        # Pallas (stats+affine+Swish)
    h = conv_transpose2d_oihw(h, params["ct2_w"], 2, 1)             # (B,64,16,16)
    h = batchnorm_swish(h, params["bn2_g"], params["bn2_b"])        # Pallas
    h = conv_transpose2d_oihw(h, params["ct3_w"], 2, 1)             # (B,32,32,32)
    h = batchnorm_swish(h, params["bn3_g"], params["bn3_b"])        # Pallas
    h = conv_transpose2d_oihw(h, params["ct4_w"], 2, 1)             # (B,3,64,64)
    return sigmoid_pallas(h)                                        # Pallas


def _reference_forward(params, z):
    """Pure jnp/lax reference (f32 everywhere) with PyTorch-layout parameters."""
    def swish(x):
        return x * jax.nn.sigmoid(x)

    def bn(x, g, b, eps=1e-5):
        mean = jnp.mean(x, axis=(0, 2, 3), keepdims=True)
        var = jnp.var(x, axis=(0, 2, 3), keepdims=True)
        return (x - mean) * lax.rsqrt(var + eps) * g.reshape(1, -1, 1, 1) \
            + b.reshape(1, -1, 1, 1)

    def convt(x, w, stride, padding):
        return conv_transpose2d_oihw(x, _convt_weight_to_oihw(w), stride, padding)

    h = swish(z @ params["lin_w"] + params["lin_b"])
    h = h.reshape(-1, 256, 5, 5)
    h = swish(bn(convt(h, params["ct1_w"], 1, 0), params["bn1_g"], params["bn1_b"]))
    h = swish(bn(convt(h, params["ct2_w"], 2, 1), params["bn2_g"], params["bn2_b"]))
    h = swish(bn(convt(h, params["ct3_w"], 2, 1), params["bn3_g"], params["bn3_b"]))
    h = convt(h, params["ct4_w"], 2, 1)
    return jax.nn.sigmoid(h)


if __name__ == "__main__":
    key = jax.random.PRNGKey(0)
    k_params, k_z = jax.random.split(key)

    batch, n_latents = 2, 32
    params = init_decoder_params(k_params, n_latents)
    prepared = prepare_decoder_params(params)   # hoisted weight transforms / bf16 cast
    z = jax.random.normal(k_z, (batch, n_latents), jnp.float32)

    fwd = jax.jit(image_decoder_conv_forward)
    out = jax.block_until_ready(fwd(prepared, z))

    ref = jax.block_until_ready(jax.jit(_reference_forward)(params, z))
    assert out.shape == (batch, 3, 64, 64) and out.dtype == z.dtype
    # Tolerance covers (a) the explicit bf16 operand policy for the Linear layer
    # (adopted per perf review; ~0.2% relative operand rounding propagated through
    # four conv/BN stages, then clamped by the final sigmoid's <=0.25 gain) and
    # (b) MXU default-precision rounding differences between Mosaic and XLA.
    # Structural bugs (index maps, BN stats/folding, conv-transpose semantics)
    # produce errors orders of magnitude larger.
    max_err = float(jnp.max(jnp.abs(out - ref)))
    assert max_err < 2.5e-2, f"max abs error {max_err}"
    print("KERNEL_OK")
</pallas_src>

<mosaic_0001>
module attributes {stable_mosaic.version = 11 : i64} {
  func.func @_linear_swish_kernel(%arg0: i32, %arg1: memref<2x32xbf16, #tpu.memory_space<vmem>>, %arg2: memref<32x6400xbf16, #tpu.memory_space<vmem>>, %arg3: memref<1x6400xf32, #tpu.memory_space<vmem>>, %arg4: memref<2x6400xf32, #tpu.memory_space<vmem>>) attributes {dimension_semantics = [#tpu.dimension_semantics<parallel>], iteration_bounds = array<i64: 1>, scalar_prefetch = 0 : i64, scratch_operands = 0 : i64, tpu.core_type = #tpu.core_type<tc>, window_params = [{pipeline_mode = #tpu.pipeline_mode<synchronous>, transform_indices = @transform_0, window_bounds = array<i64: 2, 32>}, {transform_indices = @transform_1, window_bounds = array<i64: 32, 6400>}, {transform_indices = @transform_2, window_bounds = array<i64: 1, 6400>}, {transform_indices = @transform_3, window_bounds = array<i64: 2, 6400>}]} {
    %c0 = arith.constant 0 : index
    %c0_0 = arith.constant 0 : index
    %0 = vector.load %arg1[%c0, %c0_0] : memref<2x32xbf16, #tpu.memory_space<vmem>>, vector<2x32xbf16>
    %c0_1 = arith.constant 0 : index
    %c0_2 = arith.constant 0 : index
    %1 = vector.load %arg2[%c0_1, %c0_2] : memref<32x6400xbf16, #tpu.memory_space<vmem>>, vector<32x6400xbf16>
    %cst = arith.constant dense<0.000000e+00> : vector<2x6400xf32>
    %2 = tpu.matmul %0, %1, %cst {dimension_numbers = #tpu.dot_dimension_numbers<[1], [0], [0], [1], [0, 0, 1, 1], [], []>} : vector<2x32xbf16>, vector<32x6400xbf16>, vector<2x6400xf32> -> vector<2x6400xf32>
    %c0_3 = arith.constant 0 : index
    %c0_4 = arith.constant 0 : index
    %3 = vector.load %arg3[%c0_3, %c0_4] : memref<1x6400xf32, #tpu.memory_space<vmem>>, vector<1x6400xf32>
    %4 = vector.broadcast %3 : vector<1x6400xf32> to vector<2x6400xf32>
    %5 = arith.addf %2, %4 : vector<2x6400xf32>
    %6 = arith.negf %5 : vector<2x6400xf32>
    %7 = math.exp %6 : vector<2x6400xf32>
    %cst_5 = arith.constant 1.000000e+00 : f32
    %8 = vector.broadcast %cst_5 : f32 to vector<2x6400xf32>
    %9 = arith.addf %8, %7 : vector<2x6400xf32>
    %10 = arith.divf %8, %9 : vector<2x6400xf32>
    %11 = arith.mulf %5, %10 : vector<2x6400xf32>
    %c0_6 = arith.constant 0 : index
    %c0_7 = arith.constant 0 : index
    %12 = vector.load %arg4[%c0_6, %c0_7] : memref<2x6400xf32, #tpu.memory_space<vmem>>, vector<2x6400xf32>
    tpu.vector_store %arg4[%c0_6, %c0_7], %11 {strides = array<i32>} : memref<2x6400xf32, #tpu.memory_space<vmem>>, vector<2x6400xf32>,
    return
  }
  func.func @transform_0(%arg0: i32) -> (i32, i32) {
    %c0_i32 = arith.constant 0 : i32
    %c0_i32_0 = arith.constant 0 : i32
    %c0_i32_1 = arith.constant 0 : i32
    return %c0_i32, %c0_i32_0 : i32, i32
  }
  func.func @transform_1(%arg0: i32) -> (i32, i32) {
    %c0_i32 = arith.constant 0 : i32
    %c0_i32_0 = arith.constant 0 : i32
    return %c0_i32, %arg0 : i32, i32
  }
  func.func @transform_2(%arg0: i32) -> (i32, i32) {
    %c0_i32 = arith.constant 0 : i32
    %c0_i32_0 = arith.constant 0 : i32
    return %c0_i32, %arg0 : i32, i32
  }
  func.func @transform_3(%arg0: i32) -> (i32, i32) {
    %c0_i32 = arith.constant 0 : i32
    %c0_i32_0 = arith.constant 0 : i32
    return %c0_i32, %arg0 : i32, i32
  }
}

module attributes {stable_mosaic.version = 11 : i64} {
  func.func @_bn_stats_swish_kernel(%arg0: i32, %arg1: memref<2x128x64xf32, #tpu.memory_space<vmem>>, %arg2: memref<128x1xf32, #tpu.memory_space<vmem>>, %arg3: memref<128x1xf32, #tpu.memory_space<vmem>>, %arg4: memref<2x128x64xf32, #tpu.memory_space<vmem>>) attributes {dimension_semantics = [#tpu.dimension_semantics<arbitrary>], iteration_bounds = array<i64: 1>, scalar_prefetch = 0 : i64, scratch_operands = 0 : i64, tpu.core_type = #tpu.core_type<tc>, window_params = [{pipeline_mode = #tpu.pipeline_mode<synchronous>, transform_indices = @transform_0, window_bounds = array<i64: 2, 128, 64>}, {pipeline_mode = #tpu.pipeline_mode<synchronous>, transform_indices = @transform_1, window_bounds = array<i64: 128, 1>}, {pipeline_mode = #tpu.pipeline_mode<synchronous>, transform_indices = @transform_2, window_bounds = array<i64: 128, 1>}, {pipeline_mode = #tpu.pipeline_mode<synchronous>, transform_indices = @transform_3, window_bounds = array<i64: 2, 128, 64>}]} {
    %c0 = arith.constant 0 : index
    %c0_0 = arith.constant 0 : index
    %c0_1 = arith.constant 0 : index
    %0 = vector.load %arg1[%c0, %c0_0, %c0_1] : memref<2x128x64xf32, #tpu.memory_space<vmem>>, vector<1x128x64xf32>
    %1 = vector.shape_cast %0 : vector<1x128x64xf32> to vector<128x64xf32>
    %cst = arith.constant dense<0.000000e+00> : vector<128xf32>
    %2 = vector.multi_reduction <add>, %1, %cst [1] : vector<128x64xf32> to vector<128xf32>
    %3 = vector.shape_cast %2 : vector<128xf32> to vector<128x1xf32>
    %c1 = arith.constant 1 : index
    %c0_2 = arith.constant 0 : index
    %c0_3 = arith.constant 0 : index
    %4 = vector.load %arg1[%c1, %c0_2, %c0_3] : memref<2x128x64xf32, #tpu.memory_space<vmem>>, vector<1x128x64xf32>
    %5 = vector.shape_cast %4 : vector<1x128x64xf32> to vector<128x64xf32>
    %cst_4 = arith.constant dense<0.000000e+00> : vector<128xf32>
    %6 = vector.multi_reduction <add>, %5, %cst_4 [1] : vector<128x64xf32> to vector<128xf32>
    %7 = vector.shape_cast %6 : vector<128xf32> to vector<128x1xf32>
    %8 = arith.addf %3, %7 : vector<128x1xf32>
    %cst_5 = arith.constant 7.812500e-03 : f32
    %9 = vector.broadcast %cst_5 : f32 to vector<128x1xf32>
    %10 = arith.mulf %8, %9 : vector<128x1xf32>
    %c0_6 = arith.constant 0 : index
    %c0_7 = arith.constant 0 : index
    %c0_8 = arith.constant 0 : index
    %11 = vector.load %arg1[%c0_6, %c0_7, %c0_8] : memref<2x128x64xf32, #tpu.memory_space<vmem>>, vector<1x128x64xf32>
    %12 = vector.shape_cast %11 : vector<1x128x64xf32> to vector<128x64xf32>
    %13 = vector.broadcast %10 : vector<128x1xf32> to vector<128x64xf32>
    %14 = arith.subf %12, %13 : vector<128x64xf32>
    %15 = arith.mulf %14, %14 : vector<128x64xf32>
    %cst_9 = arith.constant dense<0.000000e+00> : vector<128xf32>
    %16 = vector.multi_reduction <add>, %15, %cst_9 [1] : vector<128x64xf32> to vector<128xf32>
    %17 = vector.shape_cast %16 : vector<128xf32> to vector<128x1xf32>
    %c1_10 = arith.constant 1 : index
    %c0_11 = arith.constant 0 : index
    %c0_12 = arith.constant 0 : index
    %18 = vector.load %arg1[%c1_10, %c0_11, %c0_12] : memref<2x128x64xf32, #tpu.memory_space<vmem>>, vector<1x128x64xf32>
    %19 = vector.shape_cast %18 : vector<1x128x64xf32> to vector<128x64xf32>
    %20 = vector.broadcast %10 : vector<128x1xf32> to vector<128x64xf32>
    %21 = arith.subf %19, %20 : vector<128x64xf32>
    %22 = arith.mulf %21, %21 : vector<128x64xf32>
    %cst_13 = arith.constant dense<0.000000e+00> : vector<128xf32>
    %23 = vector.multi_reduction <add>, %22, %cst_13 [1] : vector<128x64xf32> to vector<128xf32>
    %24 = vector.shape_cast %23 : vector<128xf32> to vector<128x1xf32>
    %25 = arith.addf %17, %24 : vector<128x1xf32>
    %cst_14 = arith.constant 7.812500e-03 : f32
    %26 = vector.broadcast %cst_14 : f32 to vector<128x1xf32>
    %27 = arith.mulf %25, %26 : vector<128x1xf32>
    %c0_15 = arith.constant 0 : index
    %c0_16 = arith.constant 0 : index
    %28 = vector.load %arg2[%c0_15, %c0_16] : memref<128x1xf32, #tpu.memory_space<vmem>>, vector<128x1xf32>
    %cst_17 = arith.constant 9.99999974E-6 : f32
    %29 = vector.broadcast %cst_17 : f32 to vector<128x1xf32>
    %30 = arith.addf %27, %29 : vector<128x1xf32>
    %31 = math.rsqrt %30 : vector<128x1xf32>
    %32 = arith.mulf %28, %31 : vector<128x1xf32>
    %c0_18 = arith.constant 0 : index
    %c0_19 = arith.constant 0 : index
    %33 = vector.load %arg3[%c0_18, %c0_19] : memref<128x1xf32, #tpu.memory_space<vmem>>, vector<128x1xf32>
    %34 = arith.mulf %10, %32 : vector<128x1xf32>
    %35 = arith.subf %33, %34 : vector<128x1xf32>
    %c0_20 = arith.constant 0 : index
    %c0_21 = arith.constant 0 : index
    %c0_22 = arith.constant 0 : index
    %36 = vector.load %arg1[%c0_20, %c0_21, %c0_22] : memref<2x128x64xf32, #tpu.memory_space<vmem>>, vector<1x128x64xf32>
    %37 = vector.shape_cast %36 : vector<1x128x64xf32> to vector<128x64xf32>
    %38 = vector.broadcast %32 : vector<128x1xf32> to vector<128x64xf32>
    %39 = arith.mulf %37, %38 : vector<128x64xf32>
    %40 = vector.broadcast %35 : vector<128x1xf32> to vector<128x64xf32>
    %41 = arith.addf %39, %40 : vector<128x64xf32>
    %42 = arith.negf %41 : vector<128x64xf32>
    %43 = math.exp %42 : vector<128x64xf32>
    %cst_23 = arith.constant 1.000000e+00 : f32
    %44 = vector.broadcast %cst_23 : f32 to vector<128x64xf32>
    %45 = arith.addf %44, %43 : vector<128x64xf32>
    %46 = arith.divf %44, %45 : vector<128x64xf32>
    %47 = arith.mulf %41, %46 : vector<128x64xf32>
    %c0_24 = arith.constant 0 : index
    %c0_25 = arith.constant 0 : index
    %c0_26 = arith.constant 0 : index
    %48 = vector.load %arg4[%c0_24, %c0_25, %c0_26] : memref<2x128x64xf32, #tpu.memory_space<vmem>>, vector<1x128x64xf32>
    %49 = vector.shape_cast %48 : vector<1x128x64xf32> to vector<128x64xf32>
    %50 = vector.shape_cast %47 : vector<128x64xf32> to vector<1x128x64xf32>
    tpu.vector_store %arg4[%c0_24, %c0_25, %c0_26], %50 {strides = array<i32>} : memref<2x128x64xf32, #tpu.memory_space<vmem>>, vector<1x128x64xf32>,
    %c1_27 = arith.constant 1 : index
    %c0_28 = arith.constant 0 : index
    %c0_29 = arith.constant 0 : index
    %51 = vector.load %arg1[%c1_27, %c0_28, %c0_29] : memref<2x128x64xf32, #tpu.memory_space<vmem>>, vector<1x128x64xf32>
    %52 = vector.shape_cast %51 : vector<1x128x64xf32> to vector<128x64xf32>
    %53 = vector.broadcast %32 : vector<128x1xf32> to vector<128x64xf32>
    %54 = arith.mulf %52, %53 : vector<128x64xf32>
    %55 = vector.broadcast %35 : vector<128x1xf32> to vector<128x64xf32>
    %56 = arith.addf %54, %55 : vector<128x64xf32>
    %57 = arith.negf %56 : vector<128x64xf32>
    %58 = math.exp %57 : vector<128x64xf32>
    %cst_30 = arith.constant 1.000000e+00 : f32
    %59 = vector.broadcast %cst_30 : f32 to vector<128x64xf32>
    %60 = arith.addf %59, %58 : vector<128x64xf32>
    %61 = arith.divf %59, %60 : vector<128x64xf32>
    %62 = arith.mulf %56, %61 : vector<128x64xf32>
    %c1_31 = arith.constant 1 : index
    %c0_32 = arith.constant 0 : index
    %c0_33 = arith.constant 0 : index
    %63 = vector.load %arg4[%c1_31, %c0_32, %c0_33] : memref<2x128x64xf32, #tpu.memory_space<vmem>>, vector<1x128x64xf32>
    %64 = vector.shape_cast %63 : vector<1x128x64xf32> to vector<128x64xf32>
    %65 = vector.shape_cast %62 : vector<128x64xf32> to vector<1x128x64xf32>
    tpu.vector_store %arg4[%c1_31, %c0_32, %c0_33], %65 {strides = array<i32>} : memref<2x128x64xf32, #tpu.memory_space<vmem>>, vector<1x128x64xf32>,
    return
  }
  func.func @transform_0(%arg0: i32) -> (i32, i32, i32) {
    %c0_i32 = arith.constant 0 : i32
    %c0_i32_0 = arith.constant 0 : i32
    %c0_i32_1 = arith.constant 0 : i32
    %c0_i32_2 = arith.constant 0 : i32
    return %c0_i32, %c0_i32_0, %c0_i32_1 : i32, i32, i32
  }
  func.func @transform_1(%arg0: i32) -> (i32, i32) {
    %c0_i32 = arith.constant 0 : i32
    %c0_i32_0 = arith.constant 0 : i32
    %c0_i32_1 = arith.constant 0 : i32
    return %c0_i32, %c0_i32_0 : i32, i32
  }
  func.func @transform_2(%arg0: i32) -> (i32, i32) {
    %c0_i32 = arith.constant 0 : i32
    %c0_i32_0 = arith.constant 0 : i32
    %c0_i32_1 = arith.constant 0 : i32
    return %c0_i32, %c0_i32_0 : i32, i32
  }
  func.func @transform_3(%arg0: i32) -> (i32, i32, i32) {
    %c0_i32 = arith.constant 0 : i32
    %c0_i32_0 = arith.constant 0 : i32
    %c0_i32_1 = arith.constant 0 : i32
    %c0_i32_2 = arith.constant 0 : i32
    return %c0_i32, %c0_i32_0, %c0_i32_1 : i32, i32, i32
  }
}

module attributes {stable_mosaic.version = 11 : i64} {
  func.func @_bn_stats_swish_kernel(%arg0: i32, %arg1: memref<2x64x256xf32, #tpu.memory_space<vmem>>, %arg2: memref<64x1xf32, #tpu.memory_space<vmem>>, %arg3: memref<64x1xf32, #tpu.memory_space<vmem>>, %arg4: memref<2x64x256xf32, #tpu.memory_space<vmem>>) attributes {dimension_semantics = [#tpu.dimension_semantics<arbitrary>], iteration_bounds = array<i64: 1>, scalar_prefetch = 0 : i64, scratch_operands = 0 : i64, tpu.core_type = #tpu.core_type<tc>, window_params = [{pipeline_mode = #tpu.pipeline_mode<synchronous>, transform_indices = @transform_0, window_bounds = array<i64: 2, 64, 256>}, {pipeline_mode = #tpu.pipeline_mode<synchronous>, transform_indices = @transform_1, window_bounds = array<i64: 64, 1>}, {pipeline_mode = #tpu.pipeline_mode<synchronous>, transform_indices = @transform_2, window_bounds = array<i64: 64, 1>}, {pipeline_mode = #tpu.pipeline_mode<synchronous>, transform_indices = @transform_3, window_bounds = array<i64: 2, 64, 256>}]} {
    %c0 = arith.constant 0 : index
    %c0_0 = arith.constant 0 : index
    %c0_1 = arith.constant 0 : index
    %0 = vector.load %arg1[%c0, %c0_0, %c0_1] : memref<2x64x256xf32, #tpu.memory_space<vmem>>, vector<1x64x256xf32>
    %1 = vector.shape_cast %0 : vector<1x64x256xf32> to vector<64x256xf32>
    %cst = arith.constant dense<0.000000e+00> : vector<64xf32>
    %2 = vector.multi_reduction <add>, %1, %cst [1] : vector<64x256xf32> to vector<64xf32>
    %3 = vector.shape_cast %2 : vector<64xf32> to vector<64x1xf32>
    %c1 = arith.constant 1 : index
    %c0_2 = arith.constant 0 : index
    %c0_3 = arith.constant 0 : index
    %4 = vector.load %arg1[%c1, %c0_2, %c0_3] : memref<2x64x256xf32, #tpu.memory_space<vmem>>, vector<1x64x256xf32>
    %5 = vector.shape_cast %4 : vector<1x64x256xf32> to vector<64x256xf32>
    %cst_4 = arith.constant dense<0.000000e+00> : vector<64xf32>
    %6 = vector.multi_reduction <add>, %5, %cst_4 [1] : vector<64x256xf32> to vector<64xf32>
    %7 = vector.shape_cast %6 : vector<64xf32> to vector<64x1xf32>
    %8 = arith.addf %3, %7 : vector<64x1xf32>
    %cst_5 = arith.constant 0.001953125 : f32
    %9 = vector.broadcast %cst_5 : f32 to vector<64x1xf32>
    %10 = arith.mulf %8, %9 : vector<64x1xf32>
    %c0_6 = arith.constant 0 : index
    %c0_7 = arith.constant 0 : index
    %c0_8 = arith.constant 0 : index
    %11 = vector.load %arg1[%c0_6, %c0_7, %c0_8] : memref<2x64x256xf32, #tpu.memory_space<vmem>>, vector<1x64x256xf32>
    %12 = vector.shape_cast %11 : vector<1x64x256xf32> to vector<64x256xf32>
    %13 = vector.broadcast %10 : vector<64x1xf32> to vector<64x256xf32>
    %14 = arith.subf %12, %13 : vector<64x256xf32>
    %15 = arith.mulf %14, %14 : vector<64x256xf32>
    %cst_9 = arith.constant dense<0.000000e+00> : vector<64xf32>
    %16 = vector.multi_reduction <add>, %15, %cst_9 [1] : vector<64x256xf32> to vector<64xf32>
    %17 = vector.shape_cast %16 : vector<64xf32> to vector<64x1xf32>
    %c1_10 = arith.constant 1 : index
    %c0_11 = arith.constant 0 : index
    %c0_12 = arith.constant 0 : index
    %18 = vector.load %arg1[%c1_10, %c0_11, %c0_12] : memref<2x64x256xf32, #tpu.memory_space<vmem>>, vector<1x64x256xf32>
    %19 = vector.shape_cast %18 : vector<1x64x256xf32> to vector<64x256xf32>
    %20 = vector.broadcast %10 : vector<64x1xf32> to vector<64x256xf32>
    %21 = arith.subf %19, %20 : vector<64x256xf32>
    %22 = arith.mulf %21, %21 : vector<64x256xf32>
    %cst_13 = arith.constant dense<0.000000e+00> : vector<64xf32>
    %23 = vector.multi_reduction <add>, %22, %cst_13 [1] : vector<64x256xf32> to vector<64xf32>
    %24 = vector.shape_cast %23 : vector<64xf32> to vector<64x1xf32>
    %25 = arith.addf %17, %24 : vector<64x1xf32>
    %cst_14 = arith.constant 0.001953125 : f32
    %26 = vector.broadcast %cst_14 : f32 to vector<64x1xf32>
    %27 = arith.mulf %25, %26 : vector<64x1xf32>
    %c0_15 = arith.constant 0 : index
    %c0_16 = arith.constant 0 : index
    %28 = vector.load %arg2[%c0_15, %c0_16] : memref<64x1xf32, #tpu.memory_space<vmem>>, vector<64x1xf32>
    %cst_17 = arith.constant 9.99999974E-6 : f32
    %29 = vector.broadcast %cst_17 : f32 to vector<64x1xf32>
    %30 = arith.addf %27, %29 : vector<64x1xf32>
    %31 = math.rsqrt %30 : vector<64x1xf32>
    %32 = arith.mulf %28, %31 : vector<64x1xf32>
    %c0_18 = arith.constant 0 : index
    %c0_19 = arith.constant 0 : index
    %33 = vector.load %arg3[%c0_18, %c0_19] : memref<64x1xf32, #tpu.memory_space<vmem>>, vector<64x1xf32>
    %34 = arith.mulf %10, %32 : vector<64x1xf32>
    %35 = arith.subf %33, %34 : vector<64x1xf32>
    %c0_20 = arith.constant 0 : index
    %c0_21 = arith.constant 0 : index
    %c0_22 = arith.constant 0 : index
    %36 = vector.load %arg1[%c0_20, %c0_21, %c0_22] : memref<2x64x256xf32, #tpu.memory_space<vmem>>, vector<1x64x256xf32>
    %37 = vector.shape_cast %36 : vector<1x64x256xf32> to vector<64x256xf32>
    %38 = vector.broadcast %32 : vector<64x1xf32> to vector<64x256xf32>
    %39 = arith.mulf %37, %38 : vector<64x256xf32>
    %40 = vector.broadcast %35 : vector<64x1xf32> to vector<64x256xf32>
    %41 = arith.addf %39, %40 : vector<64x256xf32>
    %42 = arith.negf %41 : vector<64x256xf32>
    %43 = math.exp %42 : vector<64x256xf32>
    %cst_23 = arith.constant 1.000000e+00 : f32
    %44 = vector.broadcast %cst_23 : f32 to vector<64x256xf32>
    %45 = arith.addf %44, %43 : vector<64x256xf32>
    %46 = arith.divf %44, %45 : vector<64x256xf32>
    %47 = arith.mulf %41, %46 : vector<64x256xf32>
    %c0_24 = arith.constant 0 : index
    %c0_25 = arith.constant 0 : index
    %c0_26 = arith.constant 0 : index
    %48 = vector.load %arg4[%c0_24, %c0_25, %c0_26] : memref<2x64x256xf32, #tpu.memory_space<vmem>>, vector<1x64x256xf32>
    %49 = vector.shape_cast %48 : vector<1x64x256xf32> to vector<64x256xf32>
    %50 = vector.shape_cast %47 : vector<64x256xf32> to vector<1x64x256xf32>
    tpu.vector_store %arg4[%c0_24, %c0_25, %c0_26], %50 {strides = array<i32>} : memref<2x64x256xf32, #tpu.memory_space<vmem>>, vector<1x64x256xf32>,
    %c1_27 = arith.constant 1 : index
    %c0_28 = arith.constant 0 : index
    %c0_29 = arith.constant 0 : index
    %51 = vector.load %arg1[%c1_27, %c0_28, %c0_29] : memref<2x64x256xf32, #tpu.memory_space<vmem>>, vector<1x64x256xf32>
    %52 = vector.shape_cast %51 : vector<1x64x256xf32> to vector<64x256xf32>
    %53 = vector.broadcast %32 : vector<64x1xf32> to vector<64x256xf32>
    %54 = arith.mulf %52, %53 : vector<64x256xf32>
    %55 = vector.broadcast %35 : vector<64x1xf32> to vector<64x256xf32>
    %56 = arith.addf %54, %55 : vector<64x256xf32>
    %57 = arith.negf %56 : vector<64x256xf32>
    %58 = math.exp %57 : vector<64x256xf32>
    %cst_30 = arith.constant 1.000000e+00 : f32
    %59 = vector.broadcast %cst_30 : f32 to vector<64x256xf32>
    %60 = arith.addf %59, %58 : vector<64x256xf32>
    %61 = arith.divf %59, %60 : vector<64x256xf32>
    %62 = arith.mulf %56, %61 : vector<64x256xf32>
    %c1_31 = arith.constant 1 : index
    %c0_32 = arith.constant 0 : index
    %c0_33 = arith.constant 0 : index
    %63 = vector.load %arg4[%c1_31, %c0_32, %c0_33] : memref<2x64x256xf32, #tpu.memory_space<vmem>>, vector<1x64x256xf32>
    %64 = vector.shape_cast %63 : vector<1x64x256xf32> to vector<64x256xf32>
    %65 = vector.shape_cast %62 : vector<64x256xf32> to vector<1x64x256xf32>
    tpu.vector_store %arg4[%c1_31, %c0_32, %c0_33], %65 {strides = array<i32>} : memref<2x64x256xf32, #tpu.memory_space<vmem>>, vector<1x64x256xf32>,
    return
  }
  func.func @transform_0(%arg0: i32) -> (i32, i32, i32) {
    %c0_i32 = arith.constant 0 : i32
    %c0_i32_0 = arith.constant 0 : i32
    %c0_i32_1 = arith.constant 0 : i32
    %c0_i32_2 = arith.constant 0 : i32
    return %c0_i32, %c0_i32_0, %c0_i32_1 : i32, i32, i32
  }
  func.func @transform_1(%arg0: i32) -> (i32, i32) {
    %c0_i32 = arith.constant 0 : i32
    %c0_i32_0 = arith.constant 0 : i32
    %c0_i32_1 = arith.constant 0 : i32
    return %c0_i32, %c0_i32_0 : i32, i32
  }
  func.func @transform_2(%arg0: i32) -> (i32, i32) {
    %c0_i32 = arith.constant 0 : i32
    %c0_i32_0 = arith.constant 0 : i32
    %c0_i32_1 = arith.constant 0 : i32
    return %c0_i32, %c0_i32_0 : i32, i32
  }
  func.func @transform_3(%arg0: i32) -> (i32, i32, i32) {
    %c0_i32 = arith.constant 0 : i32
    %c0_i32_0 = arith.constant 0 : i32
    %c0_i32_1 = arith.constant 0 : i32
    %c0_i32_2 = arith.constant 0 : i32
    return %c0_i32, %c0_i32_0, %c0_i32_1 : i32, i32, i32
  }
}

module attributes {stable_mosaic.version = 11 : i64} {
  func.func @_bn_stats_swish_kernel(%arg0: i32, %arg1: memref<2x32x1024xf32, #tpu.memory_space<vmem>>, %arg2: memref<32x1xf32, #tpu.memory_space<vmem>>, %arg3: memref<32x1xf32, #tpu.memory_space<vmem>>, %arg4: memref<2x32x1024xf32, #tpu.memory_space<vmem>>) attributes {dimension_semantics = [#tpu.dimension_semantics<arbitrary>], iteration_bounds = array<i64: 1>, scalar_prefetch = 0 : i64, scratch_operands = 0 : i64, tpu.core_type = #tpu.core_type<tc>, window_params = [{pipeline_mode = #tpu.pipeline_mode<synchronous>, transform_indices = @transform_0, window_bounds = array<i64: 2, 32, 1024>}, {pipeline_mode = #tpu.pipeline_mode<synchronous>, transform_indices = @transform_1, window_bounds = array<i64: 32, 1>}, {pipeline_mode = #tpu.pipeline_mode<synchronous>, transform_indices = @transform_2, window_bounds = array<i64: 32, 1>}, {pipeline_mode = #tpu.pipeline_mode<synchronous>, transform_indices = @transform_3, window_bounds = array<i64: 2, 32, 1024>}]} {
    %c0 = arith.constant 0 : index
    %c0_0 = arith.constant 0 : index
    %c0_1 = arith.constant 0 : index
    %0 = vector.load %arg1[%c0, %c0_0, %c0_1] : memref<2x32x1024xf32, #tpu.memory_space<vmem>>, vector<1x32x1024xf32>
    %1 = vector.shape_cast %0 : vector<1x32x1024xf32> to vector<32x1024xf32>
    %cst = arith.constant dense<0.000000e+00> : vector<32xf32>
    %2 = vector.multi_reduction <add>, %1, %cst [1] : vector<32x1024xf32> to vector<32xf32>
    %3 = vector.shape_cast %2 : vector<32xf32> to vector<32x1xf32>
    %c1 = arith.constant 1 : index
    %c0_2 = arith.constant 0 : index
    %c0_3 = arith.constant 0 : index
    %4 = vector.load %arg1[%c1, %c0_2, %c0_3] : memref<2x32x1024xf32, #tpu.memory_space<vmem>>, vector<1x32x1024xf32>
    %5 = vector.shape_cast %4 : vector<1x32x1024xf32> to vector<32x1024xf32>
    %cst_4 = arith.constant dense<0.000000e+00> : vector<32xf32>
    %6 = vector.multi_reduction <add>, %5, %cst_4 [1] : vector<32x1024xf32> to vector<32xf32>
    %7 = vector.shape_cast %6 : vector<32xf32> to vector<32x1xf32>
    %8 = arith.addf %3, %7 : vector<32x1xf32>
    %cst_5 = arith.constant 4.8828125E-4 : f32
    %9 = vector.broadcast %cst_5 : f32 to vector<32x1xf32>
    %10 = arith.mulf %8, %9 : vector<32x1xf32>
    %c0_6 = arith.constant 0 : index
    %c0_7 = arith.constant 0 : index
    %c0_8 = arith.constant 0 : index
    %11 = vector.load %arg1[%c0_6, %c0_7, %c0_8] : memref<2x32x1024xf32, #tpu.memory_space<vmem>>, vector<1x32x1024xf32>
    %12 = vector.shape_cast %11 : vector<1x32x1024xf32> to vector<32x1024xf32>
    %13 = vector.broadcast %10 : vector<32x1xf32> to vector<32x1024xf32>
    %14 = arith.subf %12, %13 : vector<32x1024xf32>
    %15 = arith.mulf %14, %14 : vector<32x1024xf32>
    %cst_9 = arith.constant dense<0.000000e+00> : vector<32xf32>
    %16 = vector.multi_reduction <add>, %15, %cst_9 [1] : vector<32x1024xf32> to vector<32xf32>
    %17 = vector.shape_cast %16 : vector<32xf32> to vector<32x1xf32>
    %c1_10 = arith.constant 1 : index
    %c0_11 = arith.constant 0 : index
    %c0_12 = arith.constant 0 : index
    %18 = vector.load %arg1[%c1_10, %c0_11, %c0_12] : memref<2x32x1024xf32, #tpu.memory_space<vmem>>, vector<1x32x1024xf32>
    %19 = vector.shape_cast %18 : vector<1x32x1024xf32> to vector<32x1024xf32>
    %20 = vector.broadcast %10 : vector<32x1xf32> to vector<32x1024xf32>
    %21 = arith.subf %19, %20 : vector<32x1024xf32>
    %22 = arith.mulf %21, %21 : vector<32x1024xf32>
    %cst_13 = arith.constant dense<0.000000e+00> : vector<32xf32>
    %23 = vector.multi_reduction <add>, %22, %cst_13 [1] : vector<32x1024xf32> to vector<32xf32>
    %24 = vector.shape_cast %23 : vector<32xf32> to vector<32x1xf32>
    %25 = arith.addf %17, %24 : vector<32x1xf32>
    %cst_14 = arith.constant 4.8828125E-4 : f32
    %26 = vector.broadcast %cst_14 : f32 to vector<32x1xf32>
    %27 = arith.mulf %25, %26 : vector<32x1xf32>
    %c0_15 = arith.constant 0 : index
    %c0_16 = arith.constant 0 : index
    %28 = vector.load %arg2[%c0_15, %c0_16] : memref<32x1xf32, #tpu.memory_space<vmem>>, vector<32x1xf32>
    %cst_17 = arith.constant 9.99999974E-6 : f32
    %29 = vector.broadcast %cst_17 : f32 to vector<32x1xf32>
    %30 = arith.addf %27, %29 : vector<32x1xf32>
    %31 = math.rsqrt %30 : vector<32x1xf32>
    %32 = arith.mulf %28, %31 : vector<32x1xf32>
    %c0_18 = arith.constant 0 : index
    %c0_19 = arith.constant 0 : index
    %33 = vector.load %arg3[%c0_18, %c0_19] : memref<32x1xf32, #tpu.memory_space<vmem>>, vector<32x1xf32>
    %34 = arith.mulf %10, %32 : vector<32x1xf32>
    %35 = arith.subf %33, %34 : vector<32x1xf32>
    %c0_20 = arith.constant 0 : index
    %c0_21 = arith.constant 0 : index
    %c0_22 = arith.constant 0 : index
    %36 = vector.load %arg1[%c0_20, %c0_21, %c0_22] : memref<2x32x1024xf32, #tpu.memory_space<vmem>>, vector<1x32x1024xf32>
    %37 = vector.shape_cast %36 : vector<1x32x1024xf32> to vector<32x1024xf32>
    %38 = vector.broadcast %32 : vector<32x1xf32> to vector<32x1024xf32>
    %39 = arith.mulf %37, %38 : vector<32x1024xf32>
    %40 = vector.broadcast %35 : vector<32x1xf32> to vector<32x1024xf32>
    %41 = arith.addf %39, %40 : vector<32x1024xf32>
    %42 = arith.negf %41 : vector<32x1024xf32>
    %43 = math.exp %42 : vector<32x1024xf32>
    %cst_23 = arith.constant 1.000000e+00 : f32
    %44 = vector.broadcast %cst_23 : f32 to vector<32x1024xf32>
    %45 = arith.addf %44, %43 : vector<32x1024xf32>
    %46 = arith.divf %44, %45 : vector<32x1024xf32>
    %47 = arith.mulf %41, %46 : vector<32x1024xf32>
    %c0_24 = arith.constant 0 : index
    %c0_25 = arith.constant 0 : index
    %c0_26 = arith.constant 0 : index
    %48 = vector.load %arg4[%c0_24, %c0_25, %c0_26] : memref<2x32x1024xf32, #tpu.memory_space<vmem>>, vector<1x32x1024xf32>
    %49 = vector.shape_cast %48 : vector<1x32x1024xf32> to vector<32x1024xf32>
    %50 = vector.shape_cast %47 : vector<32x1024xf32> to vector<1x32x1024xf32>
    tpu.vector_store %arg4[%c0_24, %c0_25, %c0_26], %50 {strides = array<i32>} : memref<2x32x1024xf32, #tpu.memory_space<vmem>>, vector<1x32x1024xf32>,
    %c1_27 = arith.constant 1 : index
    %c0_28 = arith.constant 0 : index
    %c0_29 = arith.constant 0 : index
    %51 = vector.load %arg1[%c1_27, %c0_28, %c0_29] : memref<2x32x1024xf32, #tpu.memory_space<vmem>>, vector<1x32x1024xf32>
    %52 = vector.shape_cast %51 : vector<1x32x1024xf32> to vector<32x1024xf32>
    %53 = vector.broadcast %32 : vector<32x1xf32> to vector<32x1024xf32>
    %54 = arith.mulf %52, %53 : vector<32x1024xf32>
    %55 = vector.broadcast %35 : vector<32x1xf32> to vector<32x1024xf32>
    %56 = arith.addf %54, %55 : vector<32x1024xf32>
    %57 = arith.negf %56 : vector<32x1024xf32>
    %58 = math.exp %57 : vector<32x1024xf32>
    %cst_30 = arith.constant 1.000000e+00 : f32
    %59 = vector.broadcast %cst_30 : f32 to vector<32x1024xf32>
    %60 = arith.addf %59, %58 : vector<32x1024xf32>
    %61 = arith.divf %59, %60 : vector<32x1024xf32>
    %62 = arith.mulf %56, %61 : vector<32x1024xf32>
    %c1_31 = arith.constant 1 : index
    %c0_32 = arith.constant 0 : index
    %c0_33 = arith.constant 0 : index
    %63 = vector.load %arg4[%c1_31, %c0_32, %c0_33] : memref<2x32x1024xf32, #tpu.memory_space<vmem>>, vector<1x32x1024xf32>
    %64 = vector.shape_cast %63 : vector<1x32x1024xf32> to vector<32x1024xf32>
    %65 = vector.shape_cast %62 : vector<32x1024xf32> to vector<1x32x1024xf32>
    tpu.vector_store %arg4[%c1_31, %c0_32, %c0_33], %65 {strides = array<i32>} : memref<2x32x1024xf32, #tpu.memory_space<vmem>>, vector<1x32x1024xf32>,
    return
  }
  func.func @transform_0(%arg0: i32) -> (i32, i32, i32) {
    %c0_i32 = arith.constant 0 : i32
    %c0_i32_0 = arith.constant 0 : i32
    %c0_i32_1 = arith.constant 0 : i32
    %c0_i32_2 = arith.constant 0 : i32
    return %c0_i32, %c0_i32_0, %c0_i32_1 : i32, i32, i32
  }
  func.func @transform_1(%arg0: i32) -> (i32, i32) {
    %c0_i32 = arith.constant 0 : i32
    %c0_i32_0 = arith.constant 0 : i32
    %c0_i32_1 = arith.constant 0 : i32
    return %c0_i32, %c0_i32_0 : i32, i32
  }
  func.func @transform_2(%arg0: i32) -> (i32, i32) {
    %c0_i32 = arith.constant 0 : i32
    %c0_i32_0 = arith.constant 0 : i32
    %c0_i32_1 = arith.constant 0 : i32
    return %c0_i32, %c0_i32_0 : i32, i32
  }
  func.func @transform_3(%arg0: i32) -> (i32, i32, i32) {
    %c0_i32 = arith.constant 0 : i32
    %c0_i32_0 = arith.constant 0 : i32
    %c0_i32_1 = arith.constant 0 : i32
    %c0_i32_2 = arith.constant 0 : i32
    return %c0_i32, %c0_i32_0, %c0_i32_1 : i32, i32, i32
  }
}

module attributes {stable_mosaic.version = 11 : i64} {
  func.func @_sigmoid_kernel(%arg0: i32, %arg1: memref<24x1024xf32, #tpu.memory_space<vmem>>, %arg2: memref<24x1024xf32, #tpu.memory_space<vmem>>) attributes {dimension_semantics = [#tpu.dimension_semantics<parallel>], iteration_bounds = array<i64: 1>, scalar_prefetch = 0 : i64, scratch_operands = 0 : i64, tpu.core_type = #tpu.core_type<tc>, window_params = [{transform_indices = @transform_0, window_bounds = array<i64: 24, 1024>}, {transform_indices = @transform_1, window_bounds = array<i64: 24, 1024>}]} {
    %c0 = arith.constant 0 : index
    %c0_0 = arith.constant 0 : index
    %0 = vector.load %arg1[%c0, %c0_0] : memref<24x1024xf32, #tpu.memory_space<vmem>>, vector<24x1024xf32>
    %1 = arith.negf %0 : vector<24x1024xf32>
    %2 = math.exp %1 : vector<24x1024xf32>
    %cst = arith.constant 1.000000e+00 : f32
    %3 = vector.broadcast %cst : f32 to vector<24x1024xf32>
    %4 = arith.addf %3, %2 : vector<24x1024xf32>
    %5 = arith.divf %3, %4 : vector<24x1024xf32>
    %c0_1 = arith.constant 0 : index
    %c0_2 = arith.constant 0 : index
    %6 = vector.load %arg2[%c0_1, %c0_2] : memref<24x1024xf32, #tpu.memory_space<vmem>>, vector<24x1024xf32>
    tpu.vector_store %arg2[%c0_1, %c0_2], %5 {strides = array<i32>} : memref<24x1024xf32, #tpu.memory_space<vmem>>, vector<24x1024xf32>,
    return
  }
  func.func @transform_0(%arg0: i32) -> (i32, i32) {
    %c0_i32 = arith.constant 0 : i32
    %c0_i32_0 = arith.constant 0 : i32
    return %arg0, %c0_i32 : i32, i32
  }
  func.func @transform_1(%arg0: i32) -> (i32, i32) {
    %c0_i32 = arith.constant 0 : i32
    %c0_i32_0 = arith.constant 0 : i32
    return %arg0, %c0_i32 : i32, i32
  }
}

</mosaic_0001>

<bundles_post_ra>
// kernel: image_decoder_conv_forward.5
= control target key start
LH: loop header
LB: loop body
LE: loop exit
PB: predicated region body
PF: predicated region fallthrough
CT: control target
= control target key end

     0   :  { %8 = vsyncpa [#allocation3], 0  ;;  %s3119_s12 = smov [#allocation2]   ;;  %s3647_s0 = inlined_call_operand.vmem [shape: bf16[2,32], index: 0, kind: input, shape index: {}]   ;;  %s3648_s1 = inlined_call_operand.hbm [shape: bf16[32,6400], index: 1, kind: input, shape index: {}]   ;;  %s3649_s2 = inlined_call_operand.vmem [shape: f32[1,6400], index: 2, kind: input, shape index: {}]   ;;  %s3650_s3 = inlined_call_operand.vmem [shape: f32[2,6400], index: 3, kind: output, shape index: {}]  }
   0x1   :  { %s16_s13 = sshll.u32 %s3119_s12, 4  ;;  %s17_s13 = int_to_ptr.vmem [resolvable:$true] %s16_s13 }
   0x2   :  { %s3105_s14 = scalar_lea.vmem %s17_s13, 12800  ;;  %p3110_p1 = scmp.lt.s32.totalorder %s17_s13, %s17_s13 }
   0x3   :  { %p3106_p0 = scmp.ne.s32.totalorder %s17_s13, %s3105_s14  ;;  %p3111_p2 = scmp.lt.s32.totalorder %s3105_s14, %s3105_s14 }
   0x5   :  { %p3112_p3 = por %p3111_p2, %p3110_p1 }
   0x7   :  { %p3113_p4 = pnand %p3112_p3, %p3106_p0 }
   0x9   :  { %3116 = shalt.err (!%p3113_p4)
}
   0xa   :  { %s3120_s15 = smov 3200   ;;  %s3121_s16 = smov 200  }
   0xb   :  { %22 = dma.hbm_to_vmem [thread:$0]  %s3648_s1, 12800, %s17_s13, [#allocation3], %s3120_s15, %s3120_s15, %s3121_s16  }
   0xc   :  { %3117 = dma.done.wait [#allocation3], 12800  }
   0xd   :  { %3118 = vsyncadd [#allocation3], 4294954496  ;;  %v3122_v0 = vmov 0   ;;  %v2747_v1 = vld [vmem:[#allocation2 + $0x194] ss:$200 sps:$4 sm:$0xff]   ;;  %vm894_vm0 = vcmask 261120  }
   0xe   :  { %930 = vmatprep.mubr.bf16.mxu0 %v3122_v0  ;;  %971 = vmatprep.mubr.bf16.mxu1 %v3122_v0  ;;  %v2749_v2 = vld [vmem:[#allocation2 + $0x19c] ss:$200 sps:$4 sm:$0xff]   ;;  %v2751_v3 = vld [vmem:[#allocation2 + $0x190] ss:$200 sps:$4 sm:$0xff]   ;;  %v2755_v6 = vld [vmem:[#allocation2 + $0xc] ss:$200 sps:$4 sm:$0xff]  }
   0xf   :  { %910 = vmatprep.subr.bf16.mxu0 %v2747_v1  ;;  %v2752_v4 = vld [vmem:[#allocation2 + $0x198] ss:$200 sps:$4 sm:$0xff]   ;;  %951 = vmatprep.subr.bf16.mxu1 %v2749_v2  ;;  %v2753_v5 = vld [vmem:[#allocation2 + $0x4] ss:$200 sps:$4 sm:$0xff]   ;;  %v2758_v8 = vld [vmem:[#allocation2 + $0x8] ss:$200 sps:$4 sm:$0xff]  }
  0x10   :  { %911 = vmatpush1.bf16.msra.mxu0 %v2751_v3  ;;  %952 = vmatpush1.bf16.msra.mxu1 %v2752_v4  ;;  %v2757_v7 = vld [vmem:[#allocation2] ss:$200 sps:$4 sm:$0xff]   ;;  %v2761_v11 = vld [vmem:[#allocation2 + $0x1a4] ss:$200 sps:$4 sm:$0xff]   ;;  %v2767_v14 = vld [vmem:[#allocation2 + $0x14] ss:$200 sps:$4 sm:$0xff]  }
  0x11   :  { %912 = vmatprep.subr.bf16.mxu0 %v2753_v5  ;;  %953 = vmatprep.subr.bf16.mxu1 %v2755_v6  ;;  %v3152_v9 = vld [vmem:[%s3647_s0] sm:$0x1]  ;;  %v2762_v12 = vld [vmem:[#allocation2 + $0x1a8] ss:$200 sps:$4 sm:$0xff]   ;;  %v2764_v13 = vld [vmem:[#allocation2 + $0x1ac] ss:$200 sps:$4 sm:$0xff]  }
  0x12   :  { %v2759_v10 = vld [vmem:[#allocation2 + $0x1a0] ss:$200 sps:$4 sm:$0xff]   ;;  %v2770_v15 = vld [vmem:[#allocation2 + $0x1c] ss:$200 sps:$4 sm:$0xff]   ;;  %v2765_v16 = vld [vmem:[#allocation2 + $0x10] ss:$200 sps:$4 sm:$0xff]  }
  0x13   :  { %v2768_v17 = vld [vmem:[#allocation2 + $0x18] ss:$200 sps:$4 sm:$0xff]   ;;  %v2773_v18 = vld [vmem:[#allocation2 + $0x1b4] ss:$200 sps:$4 sm:$0xff]   ;;  %v2779_v22 = vld [vmem:[#allocation2 + $0x24] ss:$200 sps:$4 sm:$0xff]  }
  0x14   :  { %913 = vmatpush1.bf16.msra.mxu0 %v2757_v7  ;;  %954 = vmatpush1.bf16.msra.mxu1 %v2758_v8  ;;  %v2776_v19 = vld [vmem:[#allocation2 + $0x1bc] ss:$200 sps:$4 sm:$0xff]   ;;  %v2771_v20 = vld [vmem:[#allocation2 + $0x1b0] ss:$200 sps:$4 sm:$0xff]   ;;  %v2782_v23 = vld [vmem:[#allocation2 + $0x2c] ss:$200 sps:$4 sm:$0xff]  }
  0x15   :  { %992 = vmatprep.subr.bf16.mxu0 %v2761_v11  ;;  %1033 = vmatprep.subr.bf16.mxu1 %v2764_v13  ;;  %v2774_v21 = vld [vmem:[#allocation2 + $0x1b8] ss:$200 sps:$4 sm:$0xff]   ;;  %v2780_v25 = vld [vmem:[#allocation2 + $0x28] ss:$200 sps:$4 sm:$0xff]   ;;  %v2785_v26 = vld [vmem:[#allocation2 + $0x1c4] ss:$200 sps:$4 sm:$0xff]  }
  0x16   :  { %v2777_v24 = vld [vmem:[#allocation2 + $0x20] ss:$200 sps:$4 sm:$0xff]   ;;  %v2788_v27 = vld [vmem:[#allocation2 + $0x1cc] ss:$200 sps:$4 sm:$0xff]   ;;  %v2794_v31 = vld [vmem:[#allocation2 + $0x3c] ss:$200 sps:$4 sm:$0xff]  }
  0x17   :  { %2666 = vmatmul.mubr.msk.bf16.vlgmr.msra.gmra.mxu0 %vm894_vm0, %v3152_v9  ;;  %2667 = vmatmul.mubr.msk.bf16.vlgmr.msra.gmra.mxu1 %vm894_vm0, %v3152_v9  ;;  %v2783_v28 = vld [vmem:[#allocation2 + $0x1c0] ss:$200 sps:$4 sm:$0xff]   ;;  %v2791_v30 = vld [vmem:[#allocation2 + $0x34] ss:$200 sps:$4 sm:$0xff]   ;;  %v2789_v32 = vld [vmem:[#allocation2 + $0x30] ss:$200 sps:$4 sm:$0xff]  }
  0x18   :  { %993 = vmatpush1.bf16.msra.mxu0 %v2759_v10  ;;  %1034 = vmatpush1.bf16.msra.mxu1 %v2762_v12  ;;  %v2786_v29 = vld [vmem:[#allocation2 + $0x1c8] ss:$200 sps:$4 sm:$0xff]   ;;  %v2792_v33 = vld [vmem:[#allocation2 + $0x38] ss:$200 sps:$4 sm:$0xff]   ;;  %v2797_v34 = vld [vmem:[#allocation2 + $0x1d4] ss:$200 sps:$4 sm:$0xff]  }
  0x19   :  { %994 = vmatprep.subr.bf16.mxu0 %v2767_v14  ;;  %1035 = vmatprep.subr.bf16.mxu1 %v2770_v15  ;;  %v2800_v35 = vld [vmem:[#allocation2 + $0x1dc] ss:$200 sps:$4 sm:$0xff]   ;;  %v2795_v36 = vld [vmem:[#allocation2 + $0x1d0] ss:$200 sps:$4 sm:$0xff]   ;;  %v2806_v39 = vld [vmem:[#allocation2 + $0x4c] ss:$200 sps:$4 sm:$0xff]  }
  0x1a   :  { %1012 = vmatprep.mubr.bf16.mxu0 %v3122_v0  ;;  %1053 = vmatprep.mubr.bf16.mxu1 %v3122_v0  ;;  %v2798_v37 = vld [vmem:[#allocation2 + $0x1d8] ss:$200 sps:$4 sm:$0xff]   ;;  %v2803_v38 = vld [vmem:[#allocation2 + $0x44] ss:$200 sps:$4 sm:$0xff]   ;;  %v2804_v41 = vld [vmem:[#allocation2 + $0x48] ss:$200 sps:$4 sm:$0xff]  }
  0x1b   :  { %v2801_v40 = vld [vmem:[#allocation2 + $0x40] ss:$200 sps:$4 sm:$0xff]   ;;  %v2809_v42 = vld [vmem:[#allocation2 + $0x1e4] ss:$200 sps:$4 sm:$0xff]   ;;  %v2815_v46 = vld [vmem:[#allocation2 + $0x54] ss:$200 sps:$4 sm:$0xff]  }
  0x1c   :  { %995 = vmatpush1.bf16.msra.mxu0 %v2765_v16  ;;  %1036 = vmatpush1.bf16.msra.mxu1 %v2768_v17  ;;  %v2812_v43 = vld [vmem:[#allocation2 + $0x1ec] ss:$200 sps:$4 sm:$0xff]   ;;  %v2807_v44 = vld [vmem:[#allocation2 + $0x1e0] ss:$200 sps:$4 sm:$0xff]   ;;  %v2818_v47 = vld [vmem:[#allocation2 + $0x5c] ss:$200 sps:$4 sm:$0xff]  }
  0x1d   :  { %1074 = vmatprep.subr.bf16.mxu0 %v2773_v18  ;;  %1115 = vmatprep.subr.bf16.mxu1 %v2776_v19  ;;  %v2810_v45 = vld [vmem:[#allocation2 + $0x1e8] ss:$200 sps:$4 sm:$0xff]   ;;  %v2816_v49 = vld [vmem:[#allocation2 + $0x58] ss:$200 sps:$4 sm:$0xff]   ;;  %v2821_v50 = vld [vmem:[#allocation2 + $0x1f4] ss:$200 sps:$4 sm:$0xff]  }
  0x1e   :  { %v2813_v48 = vld [vmem:[#allocation2 + $0x50] ss:$200 sps:$4 sm:$0xff]   ;;  %v2824_v51 = vld [vmem:[#allocation2 + $0x1fc] ss:$200 sps:$4 sm:$0xff]   ;;  %v2830_v55 = vld [vmem:[#allocation2 + $0x6c] ss:$200 sps:$4 sm:$0xff]  }
  0x1f   :  { %2668 = vmatmul.mubr.msk.bf16.vlgmr.msra.gmra.mxu0 %vm894_vm0, %v3152_v9  ;;  %2669 = vmatmul.mubr.msk.bf16.vlgmr.msra.gmra.mxu1 %vm894_vm0, %v3152_v9  ;;  %v2819_v52 = vld [vmem:[#allocation2 + $0x1f0] ss:$200 sps:$4 sm:$0xff]   ;;  %v2827_v54 = vld [vmem:[#allocation2 + $0x64] ss:$200 sps:$4 sm:$0xff]   ;;  %v2825_v56 = vld [vmem:[#allocation2 + $0x60] ss:$200 sps:$4 sm:$0xff]  }
  0x20   :  { %1075 = vmatpush1.bf16.msra.mxu0 %v2771_v20  ;;  %1116 = vmatpush1.bf16.msra.mxu1 %v2774_v21  ;;  %v2822_v53 = vld [vmem:[#allocation2 + $0x1f8] ss:$200 sps:$4 sm:$0xff]   ;;  %v2828_v57 = vld [vmem:[#allocation2 + $0x68] ss:$200 sps:$4 sm:$0xff]   ;;  %v2833_v58 = vld [vmem:[#allocation2 + $0x204] ss:$200 sps:$4 sm:$0xff]  }
  0x21   :  { %1076 = vmatprep.subr.bf16.mxu0 %v2779_v22  ;;  %1117 = vmatprep.subr.bf16.mxu1 %v2782_v23  ;;  %v2836_v59 = vld [vmem:[#allocation2 + $0x20c] ss:$200 sps:$4 sm:$0xff]   ;;  %v2831_v60 = vld [vmem:[#allocation2 + $0x200] ss:$200 sps:$4 sm:$0xff]   ;;  %v2842_v63 = vld [vmem:[#allocation2 + $0x7c] ss:$200 sps:$4 sm:$0xff]  }
  0x22   :  { %1094 = vmatprep.mubr.bf16.mxu0 %v3122_v0  ;;  %1135 = vmatprep.mubr.bf16.mxu1 %v3122_v0  ;;  %v2834_v61 = vld [vmem:[#allocation2 + $0x208] ss:$200 sps:$4 sm:$0xff]   ;;  %v2839_v62 = vld [vmem:[#allocation2 + $0x74] ss:$200 sps:$4 sm:$0xff]   ;;  %v2840_v2 = vld [vmem:[#allocation2 + $0x78] ss:$200 sps:$4 sm:$0xff]  }
  0x23   :  { %v2837_v1 = vld [vmem:[#allocation2 + $0x70] ss:$200 sps:$4 sm:$0xff]   ;;  %v2845_v3 = vld [vmem:[#allocation2 + $0x214] ss:$200 sps:$4 sm:$0xff]   ;;  %v2851_v7 = vld [vmem:[#allocation2 + $0x84] ss:$200 sps:$4 sm:$0xff]  }
  0x24   :  { %1077 = vmatpush1.bf16.msra.mxu0 %v2777_v24  ;;  %1118 = vmatpush1.bf16.msra.mxu1 %v2780_v25  ;;  %v2848_v4 = vld [vmem:[#allocation2 + $0x21c] ss:$200 sps:$4 sm:$0xff]   ;;  %v2843_v5 = vld [vmem:[#allocation2 + $0x210] ss:$200 sps:$4 sm:$0xff]   ;;  %v2854_v8 = vld [vmem:[#allocation2 + $0x8c] ss:$200 sps:$4 sm:$0xff]  }
  0x25   :  { %1156 = vmatprep.subr.bf16.mxu0 %v2785_v26  ;;  %1197 = vmatprep.subr.bf16.mxu1 %v2788_v27  ;;  %v2846_v6 = vld [vmem:[#allocation2 + $0x218] ss:$200 sps:$4 sm:$0xff]   ;;  %v2852_v11 = vld [vmem:[#allocation2 + $0x88] ss:$200 sps:$4 sm:$0xff]   ;;  %v2857_v12 = vld [vmem:[#allocation2 + $0x224] ss:$200 sps:$4 sm:$0xff]  }
  0x26   :  { %v2849_v10 = vld [vmem:[#allocation2 + $0x80] ss:$200 sps:$4 sm:$0xff]   ;;  %v2860_v13 = vld [vmem:[#allocation2 + $0x22c] ss:$200 sps:$4 sm:$0xff]   ;;  %v2866_v17 = vld [vmem:[#allocation2 + $0x9c] ss:$200 sps:$4 sm:$0xff]  }
  0x27   :  { %2670 = vmatmul.mubr.msk.bf16.vlgmr.msra.gmra.mxu0 %vm894_vm0, %v3152_v9  ;;  %2671 = vmatmul.mubr.msk.bf16.vlgmr.msra.gmra.mxu1 %vm894_vm0, %v3152_v9  ;;  %v2855_v14 = vld [vmem:[#allocation2 + $0x220] ss:$200 sps:$4 sm:$0xff]   ;;  %v2863_v16 = vld [vmem:[#allocation2 + $0x94] ss:$200 sps:$4 sm:$0xff]   ;;  %v2861_v18 = vld [vmem:[#allocation2 + $0x90] ss:$200 sps:$4 sm:$0xff]  }
  0x28   :  { %1157 = vmatpush1.bf16.msra.mxu0 %v2783_v28  ;;  %1198 = vmatpush1.bf16.msra.mxu1 %v2786_v29  ;;  %v2858_v15 = vld [vmem:[#allocation2 + $0x228] ss:$200 sps:$4 sm:$0xff]   ;;  %v2864_v19 = vld [vmem:[#allocation2 + $0x98] ss:$200 sps:$4 sm:$0xff]   ;;  %v2869_v20 = vld [vmem:[#allocation2 + $0x234] ss:$200 sps:$4 sm:$0xff]  }
  0x29   :  { %1158 = vmatprep.subr.bf16.mxu0 %v2791_v30  ;;  %1199 = vmatprep.subr.bf16.mxu1 %v2794_v31  ;;  %v2872_v21 = vld [vmem:[#allocation2 + $0x23c] ss:$200 sps:$4 sm:$0xff]   ;;  %v2867_v22 = vld [vmem:[#allocation2 + $0x230] ss:$200 sps:$4 sm:$0xff]   ;;  %v2878_v25 = vld [vmem:[#allocation2 + $0xac] ss:$200 sps:$4 sm:$0xff]  }
  0x2a   :  { %1176 = vmatprep.mubr.bf16.mxu0 %v3122_v0  ;;  %1217 = vmatprep.mubr.bf16.mxu1 %v3122_v0  ;;  %v2870_v23 = vld [vmem:[#allocation2 + $0x238] ss:$200 sps:$4 sm:$0xff]   ;;  %v2875_v24 = vld [vmem:[#allocation2 + $0xa4] ss:$200 sps:$4 sm:$0xff]   ;;  %v2876_v27 = vld [vmem:[#allocation2 + $0xa8] ss:$200 sps:$4 sm:$0xff]  }
  0x2b   :  { %v2873_v26 = vld [vmem:[#allocation2 + $0xa0] ss:$200 sps:$4 sm:$0xff]   ;;  %v2881_v28 = vld [vmem:[#allocation2 + $0x244] ss:$200 sps:$4 sm:$0xff]  }
  0x2c   :  { %1159 = vmatpush1.bf16.msra.mxu0 %v2789_v32  ;;  %1200 = vmatpush1.bf16.msra.mxu1 %v2792_v33  ;;  %v2884_v29 = vld [vmem:[#allocation2 + $0x24c] ss:$200 sps:$4 sm:$0xff]   ;;  %v2879_v30 = vld [vmem:[#allocation2 + $0x240] ss:$200 sps:$4 sm:$0xff]   ;;  %v2890_v33 = vld [vmem:[#allocation2 + $0xbc] ss:$200 sps:$4 sm:$0xff]  }
  0x2d   :  { %1238 = vmatprep.subr.bf16.mxu0 %v2797_v34  ;;  %1279 = vmatprep.subr.bf16.mxu1 %v2800_v35  ;;  %v2882_v31 = vld [vmem:[#allocation2 + $0x248] ss:$200 sps:$4 sm:$0xff]   ;;  %v2887_v32 = vld [vmem:[#allocation2 + $0xb4] ss:$200 sps:$4 sm:$0xff]   ;;  %v2888_v35 = vld [vmem:[#allocation2 + $0xb8] ss:$200 sps:$4 sm:$0xff]  }
  0x2e   :  { %v2885_v34 = vld [vmem:[#allocation2 + $0xb0] ss:$200 sps:$4 sm:$0xff]  }
  0x2f   :  { %2672 = vmatmul.mubr.msk.bf16.vlgmr.msra.gmra.mxu0 %vm894_vm0, %v3152_v9  ;;  %2673 = vmatmul.mubr.msk.bf16.vlgmr.msra.gmra.mxu1 %vm894_vm0, %v3152_v9 }
  0x30   :  { %1239 = vmatpush1.bf16.msra.mxu0 %v2795_v36  ;;  %1280 = vmatpush1.bf16.msra.mxu1 %v2798_v37  ;;  %v2893_v36 = vld [vmem:[#allocation2 + $0x254] ss:$200 sps:$4 sm:$0xff]   ;;  %v2891_v37 = vld [vmem:[#allocation2 + $0x250] ss:$200 sps:$4 sm:$0xff]  }
  0x31   :  { %1240 = vmatprep.subr.bf16.mxu0 %v2803_v38  ;;  %1281 = vmatprep.subr.bf16.mxu1 %v2806_v39  ;;  %v2896_v38 = vld [vmem:[#allocation2 + $0xc4] ss:$200 sps:$4 sm:$0xff]   ;;  %v2894_v39 = vld [vmem:[#allocation2 + $0xc0] ss:$200 sps:$4 sm:$0xff]  }
  0x32   :  { %1258 = vmatprep.mubr.bf16.mxu0 %v3122_v0  ;;  %1299 = vmatprep.mubr.bf16.mxu1 %v3122_v0 }
  0x34   :  { %1241 = vmatpush1.bf16.msra.mxu0 %v2801_v40  ;;  %1282 = vmatpush1.bf16.msra.mxu1 %v2804_v41  ;;  %v144_v40 = vlaneseq }
  0x35   :  { %1320 = vmatprep.subr.bf16.mxu0 %v2809_v42  ;;  %1361 = vmatprep.subr.bf16.mxu1 %v2812_v43 }
  0x36   :  { %v3227_v41 = vshrl.u32 %v144_v40, 7 }
  0x37   :  { %2674 = vmatmul.mubr.msk.bf16.vlgmr.msra.gmra.mxu0 %vm894_vm0, %v3152_v9  ;;  %2675 = vmatmul.mubr.msk.bf16.vlgmr.msra.gmra.mxu1 %vm894_vm0, %v3152_v9 }
  0x38   :  { %1321 = vmatpush1.bf16.msra.mxu0 %v2807_v44  ;;  %1362 = vmatpush1.bf16.msra.mxu1 %v2810_v45  ;;  %v3230_v42 = vsub.s32 0, %v3227_v41  ;;  %v3233_v43 = vsub.s32 2, %v3227_v41  ;;  %v130_v44 = vld [vmem:[%s3649_s2] sm:$0xff]  ;;  %v3242_v45 = vsub.s32 3, %v3227_v41 }
  0x39   :  { %1322 = vmatprep.subr.bf16.mxu0 %v2815_v46  ;;  %1363 = vmatprep.subr.bf16.mxu1 %v2818_v47 }
  0x3a   :  { %1340 = vmatprep.mubr.bf16.mxu0 %v3122_v0  ;;  %1381 = vmatprep.mubr.bf16.mxu1 %v3122_v0  ;;  %v155_v46 = vrot.slane %v130_v44, %v3233_v43 }
  0x3c   :  { %1323 = vmatpush1.bf16.msra.mxu0 %v2813_v48  ;;  %1364 = vmatpush1.bf16.msra.mxu1 %v2816_v49  ;;  %v159_v48 = vrot.slane %v130_v44, %v3242_v45 }
  0x3d   :  { %1402 = vmatprep.subr.bf16.mxu0 %v2821_v50  ;;  %1443 = vmatprep.subr.bf16.mxu1 %v2824_v51  ;;  %v3249_v51 = vsub.s32 4, %v3227_v41 }
  0x3f   :  { %2676 = vmatmul.mubr.msk.bf16.vlgmr.msra.gmra.mxu0 %vm894_vm0, %v3152_v9  ;;  %2677 = vmatmul.mubr.msk.bf16.vlgmr.msra.gmra.mxu1 %vm894_vm0, %v3152_v9 }
  0x40   :  { %1403 = vmatpush1.bf16.msra.mxu0 %v2819_v52  ;;  %1444 = vmatpush1.bf16.msra.mxu1 %v2822_v53 }
  0x41   :  { %1404 = vmatprep.subr.bf16.mxu0 %v2827_v54  ;;  %1445 = vmatprep.subr.bf16.mxu1 %v2830_v55  ;;  %v3256_v54 = vsub.s32 6, %v3227_v41 }
  0x42   :  { %1422 = vmatprep.mubr.bf16.mxu0 %v3122_v0  ;;  %1463 = vmatprep.mubr.bf16.mxu1 %v3122_v0 }
  0x44   :  { %1405 = vmatpush1.bf16.msra.mxu0 %v2825_v56  ;;  %1446 = vmatpush1.bf16.msra.mxu1 %v2828_v57  ;;  %v3259_v57 = vsub.s32 5, %v3227_v41 }
  0x45   :  { %1484 = vmatprep.subr.bf16.mxu0 %v2833_v58  ;;  %1525 = vmatprep.subr.bf16.mxu1 %v2836_v59  ;;  %v3262_v58 = vsub.s32 7, %v3227_v41 }
  0x47   :  { %2678 = vmatmul.mubr.msk.bf16.vlgmr.msra.gmra.mxu0 %vm894_vm0, %v3152_v9  ;;  %2679 = vmatmul.mubr.msk.bf16.vlgmr.msra.gmra.mxu1 %vm894_vm0, %v3152_v9 }
  0x48   :  { %1485 = vmatpush1.bf16.msra.mxu0 %v2831_v60  ;;  %1526 = vmatpush1.bf16.msra.mxu1 %v2834_v61 }
  0x49   :  { %1486 = vmatprep.subr.bf16.mxu0 %v2839_v62  ;;  %1527 = vmatprep.subr.bf16.mxu1 %v2842_v63 }
  0x4a   :  { %1504 = vmatprep.mubr.bf16.mxu0 %v3122_v0  ;;  %1545 = vmatprep.mubr.bf16.mxu1 %v3122_v0 }
  0x4c   :  { %1487 = vmatpush1.bf16.msra.mxu0 %v2837_v1  ;;  %1528 = vmatpush1.bf16.msra.mxu1 %v2840_v2  ;;  %v163_v2 = vrot.slane %v130_v44, %v3249_v51 }
  0x4d   :  { %1566 = vmatprep.subr.bf16.mxu0 %v2845_v3  ;;  %1607 = vmatprep.subr.bf16.mxu1 %v2848_v4 }
  0x4f   :  { %2680 = vmatmul.mubr.msk.bf16.vlgmr.msra.gmra.mxu0 %vm894_vm0, %v3152_v9  ;;  %2681 = vmatmul.mubr.msk.bf16.vlgmr.msra.gmra.mxu1 %vm894_vm0, %v3152_v9 }
  0x50   :  { %1567 = vmatpush1.bf16.msra.mxu0 %v2843_v5  ;;  %1608 = vmatpush1.bf16.msra.mxu1 %v2846_v6  ;;  %v171_v5 = vrot.slane %v130_v44, %v3256_v54 }
  0x51   :  { %1568 = vmatprep.subr.bf16.mxu0 %v2851_v7  ;;  %1609 = vmatprep.subr.bf16.mxu1 %v2854_v8  ;;  %v167_v8 = vrot.slane %v130_v44, %v3259_v57 }
  0x52   :  { %1586 = vmatprep.mubr.bf16.mxu0 %v3122_v0  ;;  %1627 = vmatprep.mubr.bf16.mxu1 %v3122_v0 }
  0x54   :  { %1569 = vmatpush1.bf16.msra.mxu0 %v2849_v10  ;;  %1610 = vmatpush1.bf16.msra.mxu1 %v2852_v11  ;;  %v175_v10 = vrot.slane %v130_v44, %v3262_v58 }
  0x55   :  { %1648 = vmatprep.subr.bf16.mxu0 %v2857_v12  ;;  %1689 = vmatprep.subr.bf16.mxu1 %v2860_v13 }
  0x57   :  { %2682 = vmatmul.mubr.msk.bf16.vlgmr.msra.gmra.mxu0 %vm894_vm0, %v3152_v9  ;;  %2683 = vmatmul.mubr.msk.bf16.vlgmr.msra.gmra.mxu1 %vm894_vm0, %v3152_v9 }
  0x58   :  { %1649 = vmatpush1.bf16.msra.mxu0 %v2855_v14  ;;  %1690 = vmatpush1.bf16.msra.mxu1 %v2858_v15 }
  0x59   :  { %1650 = vmatprep.subr.bf16.mxu0 %v2863_v16  ;;  %1691 = vmatprep.subr.bf16.mxu1 %v2866_v17  ;;  %v3283_v17 = vld [vmem:[%s3649_s2 + $0x8] sm:$0xff] }
  0x5a   :  { %1668 = vmatprep.mubr.bf16.mxu0 %v3122_v0  ;;  %1709 = vmatprep.mubr.bf16.mxu1 %v3122_v0 }
  0x5c   :  { %1651 = vmatpush1.bf16.msra.mxu0 %v2861_v18  ;;  %1692 = vmatpush1.bf16.msra.mxu1 %v2864_v19 }
  0x5d   :  { %1730 = vmatprep.subr.bf16.mxu0 %v2869_v20  ;;  %1771 = vmatprep.subr.bf16.mxu1 %v2872_v21 }
  0x5f   :  { %2684 = vmatmul.mubr.msk.bf16.vlgmr.msra.gmra.mxu0 %vm894_vm0, %v3152_v9  ;;  %2685 = vmatmul.mubr.msk.bf16.vlgmr.msra.gmra.mxu1 %vm894_vm0, %v3152_v9 }
  0x60   :  { %1731 = vmatpush1.bf16.msra.mxu0 %v2867_v22  ;;  %1772 = vmatpush1.bf16.msra.mxu1 %v2870_v23 }
  0x61   :  { %1732 = vmatprep.subr.bf16.mxu0 %v2875_v24  ;;  %1773 = vmatprep.subr.bf16.mxu1 %v2878_v25 }
  0x62   :  { %1750 = vmatprep.mubr.bf16.mxu0 %v3122_v0  ;;  %1791 = vmatprep.mubr.bf16.mxu1 %v3122_v0 }
  0x64   :  { %1733 = vmatpush1.bf16.msra.mxu0 %v2873_v26  ;;  %1774 = vmatpush1.bf16.msra.mxu1 %v2876_v27  ;;  %v179_v26 = vrot.slane %v3283_v17, %v3230_v42 }
  0x65   :  { %1812 = vmatprep.subr.bf16.mxu0 %v2881_v28  ;;  %1853 = vmatprep.subr.bf16.mxu1 %v2884_v29  ;;  %v187_v29 = vrot.slane %v3283_v17, %v3233_v43 }
  0x67   :  { %2686 = vmatmul.mubr.msk.bf16.vlgmr.msra.gmra.mxu0 %vm894_vm0, %v3152_v9  ;;  %2687 = vmatmul.mubr.msk.bf16.vlgmr.msra.gmra.mxu1 %vm894_vm0, %v3152_v9 }
  0x68   :  { %1813 = vmatpush1.bf16.msra.mxu0 %v2879_v30  ;;  %1854 = vmatpush1.bf16.msra.mxu1 %v2882_v31 }
  0x69   :  { %1814 = vmatprep.subr.bf16.mxu0 %v2887_v32  ;;  %1855 = vmatprep.subr.bf16.mxu1 %v2890_v33  ;;  %v191_v33 = vrot.slane %v3283_v17, %v3242_v45 }
  0x6a   :  { %1832 = vmatprep.mubr.bf16.mxu0 %v3122_v0  ;;  %1873 = vmatprep.mubr.bf16.mxu1 %v3122_v0 }
  0x6c   :  { %1815 = vmatpush1.bf16.msra.mxu0 %v2885_v34  ;;  %1856 = vmatpush1.bf16.msra.mxu1 %v2888_v35 }
  0x6d   :  { %1894 = vmatprep.subr.bf16.mxu0 %v2893_v36 }
  0x6f   :  { %2688 = vmatmul.mubr.msk.bf16.vlgmr.msra.gmra.mxu0 %vm894_vm0, %v3152_v9  ;;  %2689 = vmatmul.mubr.msk.bf16.vlgmr.msra.gmra.mxu1 %vm894_vm0, %v3152_v9 }
  0x70   :  { %1895 = vmatpush1.bf16.msra.mxu0 %v2891_v37  ;;  %1914 = vmatprep.mubr.bf16.mxu0 %v3122_v0  ;;  %v3239_v0 = vsub.s32 1, %v3227_v41 }
  0x71   :  { %1896 = vmatprep.subr.bf16.mxu0 %v2896_v38 }
  0x72   :  { %v151_v47 = vrot.slane %v130_v44, %v3239_v0  ;;  %v183_v30 = vrot.slane %v3283_v17, %v3239_v0 }
  0x74   :  { %1897 = vmatpush1.bf16.msra.mxu0 %v2894_v39 }
  0x77   :  { %2690 = vmatmul.mubr.msk.bf16.vlgmr.msra.gmra.mxu0 %vm894_vm0, %v3152_v9  ;;  %v147_v9 = vrot.slane %v130_v44, %v3230_v42 }
  0xd7   :  { %v932_v49 = vpop.f32.mrf.mxu0  ;;  %v973_v50 = vpop.f32.mrf.mxu1 }
  0xd8   :  { %v3251_v52 = vadd.f32 %v932_v49, %v147_v9  ;;  %v3253_v53 = vadd.f32 %v973_v50, %v155_v46 }
  0xd9   :  { %v934_v55 = vpop.f32.mrf.mxu0  ;;  %v975_v56 = vpop.f32.mrf.mxu1 }
  0xda   :  { %v2691_v59 = vmul.f32 -1.442695, %v3251_v52  ;;  %v2693_v60 = vmul.f32 -1.442695, %v3253_v53  ;;  %v3266_v61 = vadd.f32 %v934_v55, %v151_v47  ;;  %v3268_v62 = vadd.f32 %v975_v56, %v159_v48 }
  0xdb   :  { %v936_v63 = vpop.f32.mrf.mxu0  ;;  %v977_v1 = vpop.f32.mrf.mxu1 }
  0xdc   :  { %2897 = vpow2.f32 %v2691_v59  ;;  %v2692_v3 = vmul.f32 -1.442695, %v3266_v61  ;;  %v2694_v4 = vmul.f32 -1.442695, %v3268_v62  ;;  %v195_v59 = vrot.slane %v3283_v17, %v3249_v51 }
  0xdd   :  { %2899 = vpow2.f32 %v2693_v60  ;;  %v937_v6 = vpop.f32.mrf.mxu0  ;;  %v978_v7 = vpop.f32.mrf.mxu1 }
  0xde   :  { %2901 = vpow2.f32 %v2692_v3  ;;  %v203_v3 = vrot.slane %v3283_v17, %v3256_v54 }
  0xdf   :  { %2903 = vpow2.f32 %v2694_v4  ;;  %v1014_v11 = vpop.f32.mrf.mxu0  ;;  %v1055_v12 = vpop.f32.mrf.mxu1 }
  0xe0   :  { %v3276_v13 = vadd.f32 %v1014_v11, %v163_v2  ;;  %v3278_v14 = vadd.f32 %v1055_v12, %v171_v5  ;;  %v199_v5 = vrot.slane %v3283_v17, %v3259_v57  ;;  %v3324_v11 = vld [vmem:[%s3649_s2 + $0x10] sm:$0xff] }
  0xe1   :  { %v1016_v15 = vpop.f32.mrf.mxu0  ;;  %v1057_v16 = vpop.f32.mrf.mxu1 }
  0xe2   :  { %v2695_v18 = vmul.f32 -1.442695, %v3276_v13  ;;  %v2697_v19 = vmul.f32 -1.442695, %v3278_v14  ;;  %v3287_v20 = vadd.f32 %v1016_v15, %v167_v8  ;;  %v3289_v21 = vadd.f32 %v1057_v16, %v175_v10 }
  0xe3   :  { %v1018_v22 = vpop.f32.mrf.mxu0  ;;  %v1059_v23 = vpop.f32.mrf.mxu1  ;;  %v207_v10 = vrot.slane %v3283_v17, %v3262_v58  ;;  %v211_v17 = vrot.slane %v3324_v11, %v3230_v42 }
  0xe4   :  { %2905 = vpow2.f32 %v2695_v18  ;;  %v2696_v24 = vmul.f32 -1.442695, %v3287_v20  ;;  %v2698_v25 = vmul.f32 -1.442695, %v3289_v21  ;;  %v3123_v23 = vmov 1983009808  }
  0xe5   :  { %2907 = vpow2.f32 %v2697_v19  ;;  %v1019_v27 = vpop.f32.mrf.mxu0  ;;  %v1060_v28 = vpop.f32.mrf.mxu1 }
  0xe6   :  { %2909 = vpow2.f32 %v2696_v24  ;;  %v2326_v24 = vunpack.c.l.s4 %v3123_v23 }
  0xe7   :  { %2911 = vpow2.f32 %v2698_v25  ;;  %v1096_v31 = vpop.f32.mrf.mxu0  ;;  %v1137_v32 = vpop.f32.mrf.mxu1 }
  0xe8   :  { %v3301_v34 = vadd.f32 %v1096_v31, %v179_v26  ;;  %v3303_v36 = vadd.f32 %v1137_v32, %v187_v29 }
  0xe9   :  { %v2898_v35 = vpop.eup %2897  ;;  %v1098_v37 = vpop.f32.mrf.mxu0 }
  0xea   :  { %v1139_v38 = vpop.f32.mrf.mxu1  ;;  %v2900_v39 = vpop.eup %2899  ;;  %v2073_v40 = vadd.f32 1.0, %v2898_v35  ;;  %v3305_v44 = vadd.f32 %v1098_v37, %v183_v30  ;;  %v2699_v56 = vmul.f32 -1.442695, %v3301_v34  ;;  %v2701_v63 = vmul.f32 -1.442695, %v3303_v36 }
  0xeb   :  { %v2902_v9 = vpop.eup %2901  ;;  %v2075_v46 = vadd.f32 1.0, %v2900_v39  ;;  %v3307_v47 = vadd.f32 %v1139_v38, %v191_v33  ;;  %v1100_v48 = vpop.f32.mrf.mxu0  ;;  %v219_v37 = vrot.slane %v3324_v11, %v3233_v43 }
  0xec   :  { %v1141_v49 = vpop.f32.mrf.mxu1  ;;  %v2904_v50 = vpop.eup %2903  ;;  %2913 = vrcp.f32 %v2073_v40  ;;  %v2074_v55 = vadd.f32 1.0, %v2902_v9  ;;  %v2700_v4 = vmul.f32 -1.442695, %v3305_v44 }
  0xed   :  { %2915 = vrcp.f32 %v2075_v46  ;;  %v2076_v60 = vadd.f32 1.0, %v2904_v50  ;;  %v1101_v1 = vpop.f32.mrf.mxu0  ;;  %v2702_v6 = vmul.f32 -1.442695, %v3307_v47  ;;  %v2327_v46 = vunpack.c.0.s8 %v2326_v24 }
  0xee   :  { %v1142_v2 = vpop.f32.mrf.mxu1  ;;  %2917 = vrcp.f32 %v2074_v55 }
  0xef   :  { %2919 = vrcp.f32 %v2076_v60  ;;  %v1178_v7 = vpop.f32.mrf.mxu0 }
  0xf0   :  { %v1219_v8 = vpop.f32.mrf.mxu1  ;;  %2921 = vpow2.f32 %v2699_v56  ;;  %v3326_v12 = vadd.f32 %v1178_v7, %v195_v59  ;;  %v215_v56 = vrot.slane %v3324_v11, %v3239_v0  ;;  %v223_v59 = vrot.slane %v3324_v11, %v3242_v45 }
  0xf1   :  { %v2906_v15 = vpop.eup %2905  ;;  %2923 = vpow2.f32 %v2701_v63  ;;  %v3328_v16 = vadd.f32 %v1219_v8, %v203_v3  ;;  %v1180_v18 = vpop.f32.mrf.mxu0 }
  0xf2   :  { %v1221_v19 = vpop.f32.mrf.mxu1  ;;  %v2908_v22 = vpop.eup %2907  ;;  %v2077_v25 = vadd.f32 1.0, %v2906_v15  ;;  %2925 = vpow2.f32 %v2700_v4  ;;  %v3332_v28 = vadd.f32 %v1180_v18, %v199_v5  ;;  %v2703_v35 = vmul.f32 -1.442695, %v3326_v12 }
  0xf3   :  { %v2910_v26 = vpop.eup %2909  ;;  %v2079_v27 = vadd.f32 1.0, %v2908_v22  ;;  %2927 = vpow2.f32 %v2702_v6  ;;  %v3334_v29 = vadd.f32 %v1221_v19, %v207_v10  ;;  %v1182_v30 = vpop.f32.mrf.mxu0  ;;  %v2705_v39 = vmul.f32 -1.442695, %v3328_v16 }
  0xf4   :  { %v1223_v31 = vpop.f32.mrf.mxu1  ;;  %v2912_v32 = vpop.eup %2911  ;;  %2929 = vrcp.f32 %v2077_v25  ;;  %v2078_v33 = vadd.f32 1.0, %v2910_v26  ;;  %v2704_v48 = vmul.f32 -1.442695, %v3332_v28  ;;  %v3351_v5 = vsub.s32 %v2327_v46, %v3227_v41  ;;  %v3376_v46 = vld [vmem:[%s3649_s2 + $0x18] sm:$0xff] }
  0xf5   :  { %2931 = vrcp.f32 %v2079_v27  ;;  %v2080_v38 = vadd.f32 1.0, %v2912_v32  ;;  %v1183_v40 = vpop.f32.mrf.mxu0  ;;  %v2706_v49 = vmul.f32 -1.442695, %v3334_v29  ;;  %v227_v22 = vrot.slane %v3324_v11, %v3249_v51 }
  0xf6   :  { %v1224_v9 = vpop.f32.mrf.mxu1  ;;  %2933 = vrcp.f32 %v2078_v33  ;;  %v235_v25 = vrot.slane %v3324_v11, %v3256_v54 }
  0xf7   :  { %2935 = vrcp.f32 %v2080_v38  ;;  %v1260_v50 = vpop.f32.mrf.mxu0 }
  0xf8   :  { %v1301_v55 = vpop.f32.mrf.mxu1  ;;  %2937 = vpow2.f32 %v2703_v35  ;;  %v3346_v60 = vadd.f32 %v1260_v50, %v211_v17 }
  0xf9   :  { %v3348_v63 = vadd.f32 %v1301_v55, %v219_v37  ;;  %v2914_v1 = vpop.eup %2913  ;;  %2939 = vpow2.f32 %v2705_v39  ;;  %v1262_v2 = vpop.f32.mrf.mxu0 }
  0xfa   :  { %v1303_v3 = vpop.f32.mrf.mxu1  ;;  %v2916_v4 = vpop.eup %2915  ;;  %2941 = vpow2.f32 %v2704_v48  ;;  %v2707_v6 = vmul.f32 -1.442695, %v3346_v60  ;;  %v3355_v10 = vadd.f32 %v1262_v2, %v215_v56  ;;  %v2223_v41 = vmul.f32 %v2914_v1, %v3251_v52 }
  0xfb   :  { %v2709_v7 = vmul.f32 -1.442695, %v3348_v63  ;;  %v2918_v8 = vpop.eup %2917  ;;  %2943 = vpow2.f32 %v2706_v49  ;;  %v3357_v15 = vadd.f32 %v1303_v3, %v223_v59  ;;  %v1264_v18 = vpop.f32.mrf.mxu0  ;;  %v2225_v26 = vmul.f32 %v2916_v4, %v3253_v53 }
  0xfc   :  { %v1305_v19 = vpop.f32.mrf.mxu1  ;;  %v2920_v23 = vpop.eup %2919  ;;  %v2224_v24 = vmul.f32 %v2918_v8, %v3266_v61  ;;  %2945 = vpow2.f32 %v2707_v6  ;;  %v2708_v30 = vmul.f32 -1.442695, %v3355_v10  ;;  %v231_v52 = vrot.slane %v3324_v11, %v3259_v57 }
  0xfd   :  { %v2922_v17 = vpop.eup %2921  ;;  %v2226_v27 = vmul.f32 %v2920_v23, %v3268_v62  ;;  %2947 = vpow2.f32 %v2709_v7  ;;  %v1265_v31 = vpop.f32.mrf.mxu0  ;;  %v239_v61 = vrot.slane %v3324_v11, %v3262_v58  ;;  %v2710_v53 = vmul.f32 -1.442695, %v3357_v15 }
  0xfe   :  { %v1306_v32 = vpop.f32.mrf.mxu1  ;;  %v2924_v33 = vpop.eup %2923  ;;  %v2323_v35 = vcombine.low %v2223_v41, %v2224_v24  ;;  %v2081_v37 = vadd.f32 1.0, %v2922_v17  ;;  %2949 = vpow2.f32 %v2708_v30  ;;  %v243_v8 = vrot.slane %v3376_v46, %v3230_v42 }
  0xff   :  { %v2926_v38 = vpop.eup %2925  ;;  %v2324_v39 = vcombine.low %v2225_v26, %v2226_v27  ;;  %v2083_v40 = vadd.f32 1.0, %v2924_v33  ;;  %v1342_v62 = vpop.f32.mrf.mxu0  ;;  %v251_v24 = vrot.slane %v3376_v46, %v3233_v43 }
 0x100   :  { %v1383_v9 = vpop.f32.mrf.mxu1  ;;  %v2928_v48 = vpop.eup %2927  ;;  %v2331_v49 = vrot.slane %v2323_v35, %v3351_v5  ;;  %2951 = vrcp.f32 %v2081_v37  ;;  %v2082_v50 = vadd.f32 1.0, %v2926_v38  ;;  %v3379_v55 = vadd.f32 %v1342_v62, %v227_v22 }
 0x101   :  { %v2930_v11 = vpop.eup %2929  ;;  %v2338_v56 = vrot.slane %v2324_v39, %v3351_v5  ;;  %2953 = vrcp.f32 %v2083_v40  ;;  %v2084_v59 = vadd.f32 1.0, %v2928_v48  ;;  %v3382_v1 = vadd.f32 %v1383_v9, %v235_v25  ;;  %v1344_v2 = vpop.f32.mrf.mxu0 }
 0x102   :  { %v1385_v3 = vpop.f32.mrf.mxu1  ;;  %v2932_v4 = vpop.eup %2931  ;;  %2955 = vrcp.f32 %v2082_v50  ;;  %v2711_v6 = vmul.f32 -1.442695, %v3379_v55  ;;  %v3385_v7 = vadd.f32 %v1344_v2, %v231_v52  ;;  %v2227_v17 = vmul.f32 %v2930_v11, %v3276_v13 }
 0x103   :  { %v2934_v18 = vpop.eup %2933  ;;  %v2339_v19 = vcombine.low %v2331_v49, %v2338_v56  ;;  %2957 = vrcp.f32 %v2084_v59  ;;  %v2713_v22 = vmul.f32 -1.442695, %v3382_v1  ;;  %v1346_v23 = vpop.f32.mrf.mxu0  ;;  %v2229_v31 = vmul.f32 %v2932_v4, %v3278_v14 }
 0x104   :  { %v1387_v41 = vpop.f32.mrf.mxu1  ;;  %v2936_v25 = vpop.eup %2935  ;;  %v2228_v26 = vmul.f32 %v2934_v18, %v3287_v20  ;;  %2959 = vpow2.f32 %v2710_v53  ;;  %v2712_v27 = vmul.f32 -1.442695, %v3385_v7  ;;  %v247_v13 = vrot.slane %v3376_v46, %v3239_v0 }
 0x105   :  { %v2938_v30 = vpop.eup %2937  ;;  %2548 = vst [vmem:[%s3650_s3] sm:$0xff] %v2339_v19  ;;  %v2230_v32 = vmul.f32 %v2936_v25, %v3289_v21  ;;  %2961 = vpow2.f32 %v2711_v6  ;;  %v1347_v33 = vpop.f32.mrf.mxu0  ;;  %v3402_v38 = vadd.f32 %v1385_v3, %v239_v61  ;;  %v255_v21 = vrot.slane %v3376_v46, %v3242_v45 }
 0x106   :  { %v1388_v35 = vpop.f32.mrf.mxu1  ;;  %v2940_v37 = vpop.eup %2939  ;;  %v2340_v20 = vcombine.low %v2227_v17, %v2228_v26  ;;  %v2085_v52 = vadd.f32 1.0, %v2938_v30  ;;  %2963 = vpow2.f32 %v2713_v22  ;;  %v259_v25 = vrot.slane %v3376_v46, %v3249_v51  ;;  %v3425_v30 = vld [vmem:[%s3649_s2 + $0x20] sm:$0xff] }
 0x107   :  { %v2942_v39 = vpop.eup %2941  ;;  %v2341_v40 = vcombine.low %v2229_v31, %v2230_v32  ;;  %v2087_v53 = vadd.f32 1.0, %v2940_v37  ;;  %2965 = vpow2.f32 %v2712_v27  ;;  %v1424_v62 = vpop.f32.mrf.mxu0  ;;  %v2714_v18 = vmul.f32 -1.442695, %v3402_v38 }
 0x108   :  { %v1465_v14 = vpop.f32.mrf.mxu1  ;;  %v2944_v9 = vpop.eup %2943  ;;  %v2348_v48 = vrot.slane %v2340_v20, %v3351_v5  ;;  %2967 = vrcp.f32 %v2085_v52  ;;  %v2086_v49 = vadd.f32 1.0, %v2942_v39  ;;  %v3407_v50 = vadd.f32 %v1424_v62, %v243_v8 }
 0x109   :  { %v2946_v11 = vpop.eup %2945  ;;  %v2355_v61 = vrot.slane %v2341_v40, %v3351_v5  ;;  %2969 = vrcp.f32 %v2087_v53  ;;  %v2088_v56 = vadd.f32 1.0, %v2944_v9  ;;  %v3410_v59 = vadd.f32 %v1465_v14, %v251_v24  ;;  %v1426_v2 = vpop.f32.mrf.mxu0 }
 0x10a   :  { %v1467_v3 = vpop.f32.mrf.mxu1  ;;  %v2948_v4 = vpop.eup %2947  ;;  %2971 = vrcp.f32 %v2086_v49  ;;  %v2089_v6 = vadd.f32 1.0, %v2946_v11  ;;  %v3413_v19 = vadd.f32 %v1426_v2, %v247_v13  ;;  %v2715_v24 = vmul.f32 -1.442695, %v3407_v50 }
 0x10b   :  { %v2356_v22 = vcombine.low %v2348_v48, %v2355_v61  ;;  %2973 = vrcp.f32 %v2088_v56  ;;  %v2091_v8 = vadd.f32 1.0, %v2948_v4  ;;  %v1428_v23 = vpop.f32.mrf.mxu0  ;;  %v2950_v17 = vpop.eup %2949  ;;  %v3418_v26 = vadd.f32 %v1467_v3, %v255_v21 }
 0x10c   :  { %v1469_v41 = vpop.f32.mrf.mxu1  ;;  %2975 = vrcp.f32 %v2089_v6  ;;  %v267_v27 = vrot.slane %v3376_v46, %v3256_v54  ;;  %v2090_v32 = vadd.f32 1.0, %v2950_v17  ;;  %v2717_v33 = vmul.f32 -1.442695, %v3410_v59 }
 0x10d   :  { %v2952_v31 = vpop.eup %2951  ;;  %2549 = vst [vmem:[%s3650_s3 + $0x8] sm:$0xff] %v2356_v22  ;;  %2977 = vrcp.f32 %v2091_v8  ;;  %v1429_v35 = vpop.f32.mrf.mxu0  ;;  %v2716_v20 = vmul.f32 -1.442695, %v3413_v19  ;;  %v263_v52 = vrot.slane %v3376_v46, %v3259_v57  ;;  %v271_v39 = vrot.slane %v3376_v46, %v3262_v58 }
 0x10e   :  { %v1470_v13 = vpop.f32.mrf.mxu1  ;;  %v2954_v37 = vpop.eup %2953  ;;  %2979 = vpow2.f32 %v2714_v18  ;;  %v2231_v53 = vmul.f32 %v2952_v31, %v3301_v34  ;;  %v2718_v62 = vmul.f32 -1.442695, %v3418_v26  ;;  %v275_v9 = vrot.slane %v3425_v30, %v3230_v42 }
 0x10f   :  { %v2956_v40 = vpop.eup %2955  ;;  %2981 = vrcp.f32 %v2090_v32  ;;  %v1506_v14 = vpop.f32.mrf.mxu0  ;;  %v2233_v56 = vmul.f32 %v2954_v37, %v3303_v36  ;;  %v283_v4 = vrot.slane %v3425_v30, %v3233_v43 }
 0x110   :  { %v1547_v21 = vpop.f32.mrf.mxu1  ;;  %v2958_v48 = vpop.eup %2957  ;;  %v2232_v49 = vmul.f32 %v2956_v40, %v3305_v44  ;;  %2983 = vpow2.f32 %v2715_v24  ;;  %v3441_v11 = vadd.f32 %v1506_v14, %v259_v25 }
 0x111   :  { %v3443_v61 = vadd.f32 %v1547_v21, %v267_v27  ;;  %v2960_v46 = vpop.eup %2959  ;;  %v2234_v34 = vmul.f32 %v2958_v48, %v3307_v47  ;;  %2985 = vpow2.f32 %v2717_v33  ;;  %v1508_v2 = vpop.f32.mrf.mxu0 }
 0x112   :  { %v1549_v3 = vpop.f32.mrf.mxu1  ;;  %v2962_v6 = vpop.eup %2961  ;;  %v2357_v18 = vcombine.low %v2231_v53, %v2232_v49  ;;  %v2092_v22 = vadd.f32 1.0, %v2960_v46  ;;  %2987 = vpow2.f32 %v2716_v20  ;;  %v2719_v44 = vmul.f32 -1.442695, %v3441_v11 }
 0x113   :  { %v2964_v8 = vpop.eup %2963  ;;  %v2358_v23 = vcombine.low %v2233_v56, %v2234_v34  ;;  %v2093_v41 = vadd.f32 1.0, %v2962_v6  ;;  %2989 = vpow2.f32 %v2718_v62  ;;  %v2721_v36 = vmul.f32 -1.442695, %v3443_v61  ;;  %v1510_v25 = vpop.f32.mrf.mxu0 }
 0x114   :  { %v1551_v47 = vpop.f32.mrf.mxu1  ;;  %v2966_v17 = vpop.eup %2965  ;;  %v2365_v24 = vrot.slane %v2357_v18, %v3351_v5  ;;  %2991 = vrcp.f32 %v2092_v22  ;;  %v2095_v27 = vadd.f32 1.0, %v2964_v8  ;;  %v3452_v31 = vadd.f32 %v1508_v2, %v263_v52 }
 0x115   :  { %v2968_v32 = vpop.eup %2967  ;;  %v2372_v33 = vrot.slane %v2358_v23, %v3351_v5  ;;  %2993 = vrcp.f32 %v2093_v41  ;;  %v2094_v35 = vadd.f32 1.0, %v2966_v17  ;;  %v3455_v13 = vadd.f32 %v1549_v3, %v271_v39  ;;  %v1511_v37 = vpop.f32.mrf.mxu0 }
 0x116   :  { %v1552_v20 = vpop.f32.mrf.mxu1  ;;  %v2970_v40 = vpop.eup %2969  ;;  %2995 = vrcp.f32 %v2095_v27  ;;  %v2720_v53 = vmul.f32 -1.442695, %v3452_v31  ;;  %v279_v62 = vrot.slane %v3425_v30, %v3239_v0  ;;  %v287_v52 = vrot.slane %v3425_v30, %v3242_v45 }
 0x117   :  { %v2972_v14 = vpop.eup %2971  ;;  %v2373_v21 = vcombine.low %v2365_v24, %v2372_v33  ;;  %v2235_v48 = vmul.f32 %v2968_v32, %v3326_v12  ;;  %2997 = vrcp.f32 %v2094_v35  ;;  %v2722_v39 = vmul.f32 -1.442695, %v3455_v13  ;;  %v1588_v49 = vpop.f32.mrf.mxu0 }
 0x118   :  { %v1629_v46 = vpop.f32.mrf.mxu1  ;;  %v2974_v56 = vpop.eup %2973  ;;  %v2236_v34 = vmul.f32 %v2972_v14, %v3332_v28  ;;  %2999 = vpow2.f32 %v2719_v44  ;;  %v3465_v2 = vadd.f32 %v1588_v49, %v275_v9  ;;  %v2237_v12 = vmul.f32 %v2970_v40, %v3328_v16 }
 0x119   :  { %v3467_v3 = vadd.f32 %v1629_v46, %v283_v4  ;;  %v2976_v6 = vpop.eup %2975  ;;  %2550 = vst [vmem:[%s3650_s3 + $0x10] sm:$0xff] %v2373_v21  ;;  %v2238_v18 = vmul.f32 %v2974_v56, %v3334_v29  ;;  %3001 = vpow2.f32 %v2721_v36  ;;  %v1590_v22 = vpop.f32.mrf.mxu0  ;;  %v291_v28 = vrot.slane %v3425_v30, %v3249_v51 }
 0x11a   :  { %v1631_v8 = vpop.f32.mrf.mxu1  ;;  %v2978_v44 = vpop.eup %2977  ;;  %v2374_v9 = vcombine.low %v2235_v48, %v2236_v34  ;;  %3003 = vpow2.f32 %v2720_v53  ;;  %v2723_v4 = vmul.f32 -1.442695, %v3465_v2  ;;  %v299_v23 = vrot.slane %v3425_v30, %v3256_v54 }
 0x11b   :  { %v2980_v41 = vpop.eup %2979  ;;  %v2375_v25 = vcombine.low %v2237_v12, %v2238_v18  ;;  %v2239_v16 = vmul.f32 %v2976_v6, %v3346_v60  ;;  %3005 = vpow2.f32 %v2722_v39  ;;  %v2725_v29 = vmul.f32 -1.442695, %v3467_v3  ;;  %v1592_v36 = vpop.f32.mrf.mxu0  ;;  %v3498_v18 = vld [vmem:[%s3649_s2 + $0x28] sm:$0xff] }
 0x11c   :  { %v1633_v47 = vpop.f32.mrf.mxu1  ;;  %v2982_v17 = vpop.eup %2981  ;;  %v2382_v24 = vrot.slane %v2374_v9, %v3351_v5  ;;  %v2096_v27 = vadd.f32 1.0, %v2980_v41  ;;  %3007 = vpow2.f32 %v2723_v4  ;;  %v3482_v32 = vadd.f32 %v1590_v22, %v279_v62 }
 0x11d   :  { %v2984_v33 = vpop.eup %2983  ;;  %v2389_v35 = vrot.slane %v2375_v25, %v3351_v5  ;;  %v2240_v37 = vmul.f32 %v2982_v17, %v3355_v10  ;;  %3009 = vpow2.f32 %v2725_v29  ;;  %v3486_v20 = vadd.f32 %v1631_v8, %v287_v52  ;;  %v1593_v60 = vpop.f32.mrf.mxu0 }
 0x11e   :  { %v1634_v40 = vpop.f32.mrf.mxu1  ;;  %v2986_v53 = vpop.eup %2985  ;;  %3011 = vrcp.f32 %v2096_v27  ;;  %v2097_v14 = vadd.f32 1.0, %v2984_v33  ;;  %v295_v21 = vrot.slane %v3425_v30, %v3259_v57  ;;  %v2724_v46 = vmul.f32 -1.442695, %v3482_v32 }
 0x11f   :  { %v2988_v48 = vpop.eup %2987  ;;  %v2390_v39 = vcombine.low %v2382_v24, %v2389_v35  ;;  %v2391_v62 = vcombine.low %v2239_v16, %v2240_v37  ;;  %v2099_v49 = vadd.f32 1.0, %v2986_v53  ;;  %v1670_v56 = vpop.f32.mrf.mxu0  ;;  %v2726_v9 = vmul.f32 -1.442695, %v3486_v20 }
 0x120   :  { %v1711_v34 = vpop.f32.mrf.mxu1  ;;  %v2990_v10 = vpop.eup %2989  ;;  %3013 = vrcp.f32 %v2097_v14  ;;  %v2098_v52 = vadd.f32 1.0, %v2988_v48  ;;  %v3491_v6 = vadd.f32 %v1670_v56, %v291_v28  ;;  %v303_v28 = vrot.slane %v3425_v30, %v3262_v58 }
 0x121   :  { %v3493_v12 = vadd.f32 %v1711_v34, %v299_v23  ;;  %v2992_v22 = vpop.eup %2991  ;;  %2551 = vst [vmem:[%s3650_s3 + $0x18] sm:$0xff] %v2390_v39  ;;  %3015 = vrcp.f32 %v2099_v49  ;;  %v2100_v8 = vadd.f32 1.0, %v2990_v10  ;;  %v1672_v4 = vpop.f32.mrf.mxu0  ;;  %v2241_v25 = vmul.f32 %v2978_v44, %v3348_v63 }
 0x122   :  { %v1713_v23 = vpop.f32.mrf.mxu1  ;;  %v2994_v41 = vpop.eup %2993  ;;  %v2242_v16 = vmul.f32 %v2992_v22, %v3357_v15  ;;  %3017 = vrcp.f32 %v2098_v52  ;;  %v2727_v29 = vmul.f32 -1.442695, %v3491_v6  ;;  %v307_v27 = vrot.slane %v3498_v18, %v3230_v42 }
 0x123   :  { %v2996_v36 = vpop.eup %2995  ;;  %3019 = vrcp.f32 %v2100_v8  ;;  %v2729_v47 = vmul.f32 -1.442695, %v3493_v12  ;;  %v1674_v17 = vpop.f32.mrf.mxu0  ;;  %v315_v30 = vrot.slane %v3498_v18, %v3233_v43  ;;  %v2399_v63 = vrot.slane %v2391_v62, %v3351_v5 }
 0x124   :  { %v1715_v24 = vpop.f32.mrf.mxu1  ;;  %v2998_v33 = vpop.eup %2997  ;;  %v2392_v44 = vcombine.low %v2241_v25, %v2242_v16  ;;  %3021 = vpow2.f32 %v2724_v46  ;;  %v311_v15 = vrot.slane %v3498_v18, %v3239_v0  ;;  %v3517_v37 = vadd.f32 %v1672_v4, %v295_v21 }
 0x125   :  { %v3000_v35 = vpop.eup %2999  ;;  %3023 = vpow2.f32 %v2726_v9  ;;  %v1675_v60 = vpop.f32.mrf.mxu0  ;;  %v319_v53 = vrot.slane %v3498_v18, %v3242_v45  ;;  %v323_v43 = vrot.slane %v3498_v18, %v3249_v51  ;;  %v2244_v39 = vmul.f32 %v2998_v33, %v3385_v7 }
 0x126   :  { %v1716_v40 = vpop.f32.mrf.mxu1  ;;  %v3002_v14 = vpop.eup %3001  ;;  %v2406_v48 = vrot.slane %v2392_v44, %v3351_v5  ;;  %v2101_v62 = vadd.f32 1.0, %v3000_v35  ;;  %3025 = vpow2.f32 %v2727_v29  ;;  %v2243_v46 = vmul.f32 %v2994_v41, %v3379_v55 }
 0x127   :  { %v3004_v49 = vpop.eup %3003  ;;  %v2103_v21 = vadd.f32 1.0, %v3002_v14  ;;  %3027 = vpow2.f32 %v2729_v47  ;;  %v3526_v56 = vadd.f32 %v1713_v23, %v303_v28  ;;  %v1752_v34 = vpop.f32.mrf.mxu0  ;;  %v2728_v4 = vmul.f32 -1.442695, %v3517_v37 }
 0x128   :  { %v1793_v10 = vpop.f32.mrf.mxu1  ;;  %v3006_v45 = vpop.eup %3005  ;;  %v2407_v52 = vcombine.low %v2399_v63, %v2406_v48  ;;  %3029 = vrcp.f32 %v2101_v62  ;;  %v2102_v22 = vadd.f32 1.0, %v3004_v49  ;;  %v3528_v8 = vadd.f32 %v1752_v34, %v307_v27 }
 0x129   :  { %v3008_v9 = vpop.eup %3007  ;;  %3031 = vrcp.f32 %v2103_v21  ;;  %v2104_v7 = vadd.f32 1.0, %v3006_v45  ;;  %v3531_v25 = vadd.f32 %v1793_v10, %v315_v30  ;;  %v1754_v55 = vpop.f32.mrf.mxu0  ;;  %v2408_v28 = vcombine.low %v2243_v46, %v2244_v39 }
 0x12a   :  { %v1795_v41 = vpop.f32.mrf.mxu1  ;;  %v3010_v16 = vpop.eup %3009  ;;  %2552 = vst [vmem:[%s3650_s3 + $0x20] sm:$0xff] %v2407_v52  ;;  %3033 = vrcp.f32 %v2102_v22  ;;  %v2105_v23 = vadd.f32 1.0, %v3008_v9  ;;  %v3536_v29 = vadd.f32 %v1754_v55, %v311_v15  ;;  %v2730_v24 = vmul.f32 -1.442695, %v3526_v56 }
 0x12b   :  { %v3012_v47 = vpop.eup %3011  ;;  %3035 = vrcp.f32 %v2104_v7  ;;  %v2107_v17 = vadd.f32 1.0, %v3010_v16  ;;  %v3539_v27 = vadd.f32 %v1795_v41, %v319_v53  ;;  %v1756_v30 = vpop.f32.mrf.mxu0  ;;  %v2245_v63 = vmul.f32 %v2996_v36, %v3382_v1 }
 0x12c   :  { %v1797_v33 = vpop.f32.mrf.mxu1  ;;  %v2246_v44 = vmul.f32 %v3012_v47, %v3402_v38  ;;  %3037 = vrcp.f32 %v2105_v23  ;;  %v2731_v35 = vmul.f32 -1.442695, %v3528_v8  ;;  %v2733_v15 = vmul.f32 -1.442695, %v3531_v25 }
 0x12d   :  { %v3014_v60 = vpop.eup %3013  ;;  %3039 = vrcp.f32 %v2107_v17  ;;  %v1757_v40 = vpop.f32.mrf.mxu0  ;;  %v331_v48 = vrot.slane %v3498_v18, %v3256_v54  ;;  %v327_v53 = vrot.slane %v3498_v18, %v3259_v57  ;;  %v2416_v1 = vrot.slane %v2408_v28, %v3351_v5 }
 0x12e   :  { %v1798_v14 = vpop.f32.mrf.mxu1  ;;  %v3016_v39 = vpop.eup %3015  ;;  %v2409_v36 = vcombine.low %v2245_v63, %v2246_v44  ;;  %3041 = vpow2.f32 %v2728_v4  ;;  %v2732_v38 = vmul.f32 -1.442695, %v3536_v29  ;;  %v2247_v49 = vmul.f32 %v3014_v60, %v3407_v50  ;;  %v3565_v50 = vld [vmem:[%s3649_s2 + $0x30] sm:$0x3] }
 0x12f   :  { %v3018_v62 = vpop.eup %3017  ;;  %3043 = vpow2.f32 %v2730_v24  ;;  %v2734_v46 = vmul.f32 -1.442695, %v3539_v27  ;;  %v1834_v21 = vpop.f32.mrf.mxu0  ;;  %v335_v54 = vrot.slane %v3498_v18, %v3262_v58  ;;  %v2249_v9 = vmul.f32 %v3016_v39, %v3410_v59 }
 0x130   :  { %v1875_v34 = vpop.f32.mrf.mxu1  ;;  %v3020_v10 = vpop.eup %3019  ;;  %v2423_v57 = vrot.slane %v2409_v36, %v3351_v5  ;;  %v2248_v45 = vmul.f32 %v3018_v62, %v3413_v19  ;;  %3045 = vpow2.f32 %v2731_v35  ;;  %v3560_v52 = vadd.f32 %v1834_v21, %v323_v43 }
 0x131   :  { %v3022_v22 = vpop.eup %3021  ;;  %v2250_v58 = vmul.f32 %v3020_v10, %v3418_v26  ;;  %3047 = vpow2.f32 %v2733_v15  ;;  %v3569_v7 = vadd.f32 %v1875_v34, %v331_v48  ;;  %v1836_v19 = vpop.f32.mrf.mxu0  ;;  %v339_v59 = vrot.slane %v3565_v50, %v3230_v42 }
 0x132   :  { %v1877_v4 = vpop.f32.mrf.mxu1  ;;  %v3024_v55 = vpop.eup %3023  ;;  %v2424_v41 = vcombine.low %v2416_v1, %v2423_v57  ;;  %v2425_v51 = vcombine.low %v2247_v49, %v2248_v45  ;;  %v2106_v18 = vadd.f32 1.0, %v3022_v22  ;;  %3049 = vpow2.f32 %v2732_v38 }
 0x133   :  { %v3026_v43 = vpop.eup %3025  ;;  %v2426_v16 = vcombine.low %v2249_v9, %v2250_v58  ;;  %v2108_v28 = vadd.f32 1.0, %v3024_v55  ;;  %3051 = vpow2.f32 %v2734_v46  ;;  %v1838_v23 = vpop.f32.mrf.mxu0  ;;  %v2735_v30 = vmul.f32 -1.442695, %v3560_v52 }
 0x134   :  { %v1879_v47 = vpop.f32.mrf.mxu1  ;;  %v3028_v26 = vpop.eup %3027  ;;  %2553 = vst [vmem:[%s3650_s3 + $0x28] sm:$0xff] %v2424_v41  ;;  %v2433_v17 = vrot.slane %v2425_v51, %v3351_v5  ;;  %3053 = vrcp.f32 %v2106_v18  ;;  %v2109_v24 = vadd.f32 1.0, %v3026_v43  ;;  %v2737_v44 = vmul.f32 -1.442695, %v3569_v7 }
 0x135   :  { %v3030_v33 = vpop.eup %3029  ;;  %v2440_v63 = vrot.slane %v2426_v16, %v3351_v5  ;;  %3055 = vrcp.f32 %v2108_v28  ;;  %v3580_v35 = vadd.f32 %v1836_v19, %v327_v53  ;;  %v1839_v42 = vpop.f32.mrf.mxu0  ;;  %v2111_v40 = vadd.f32 1.0, %v3028_v26 }
 0x136   :  { %v1880_v60 = vpop.f32.mrf.mxu1  ;;  %v3032_v15 = vpop.eup %3031  ;;  %v3582_v14 = vadd.f32 %v1877_v4, %v335_v54  ;;  %v343_v48 = vrot.slane %v3565_v50, %v3239_v0  ;;  %v2251_v36 = vmul.f32 %v3030_v33, %v3441_v11  ;;  %3057 = vrcp.f32 %v2109_v24 }
 0x137   :  { %v3034_v39 = vpop.eup %3033  ;;  %v2441_v1 = vcombine.low %v2433_v17, %v2440_v63  ;;  %v2736_v38 = vmul.f32 -1.442695, %v3580_v35  ;;  %v1916_v62 = vpop.f32.mrf.mxu0  ;;  %3059 = vpow2.f32 %v2735_v30  ;;  %v2253_v0 = vmul.f32 %v3032_v15, %v3443_v61 }
 0x138   :  { %v3036_v49 = vpop.eup %3035  ;;  %v2252_v53 = vmul.f32 %v3034_v39, %v3452_v31  ;;  %v2738_v46 = vmul.f32 -1.442695, %v3582_v14  ;;  %v3590_v21 = vadd.f32 %v1916_v62, %v339_v59  ;;  %3061 = vpow2.f32 %v2737_v44 }
 0x139   :  { %v3038_v34 = vpop.eup %3037  ;;  %2554 = vst [vmem:[%s3650_s3 + $0x30] sm:$0xff] %v2441_v1  ;;  %v2254_v11 = vmul.f32 %v3036_v49, %v3455_v13  ;;  %v1918_v54 = vpop.f32.mrf.mxu0  ;;  %3063 = vpow2.f32 %v2736_v38 }
 0x13a   :  { %v3040_v10 = vpop.eup %3039  ;;  %v2442_v57 = vcombine.low %v2251_v36, %v2252_v53  ;;  %v2739_v31 = vmul.f32 -1.442695, %v3590_v21  ;;  %3065 = vpow2.f32 %v2738_v46  ;;  %v3599_v4 = vadd.f32 %v1918_v54, %v343_v48 }
 0x13b   :  { %v3042_v45 = vpop.eup %3041  ;;  %v2443_v50 = vcombine.low %v2253_v0, %v2254_v11  ;;  %v1920_v22 = vpop.f32.mrf.mxu0  ;;  %3067 = vrcp.f32 %v2111_v40  ;;  %v2255_v30 = vmul.f32 %v3038_v34, %v3465_v2  ;;  %v2257_v63 = vmul.f32 %v3040_v10, %v3467_v3 }
 0x13c   :  { %v3044_v9 = vpop.eup %3043  ;;  %v2450_v58 = vrot.slane %v2442_v57, %v3351_v5  ;;  %v2110_v19 = vadd.f32 1.0, %v3042_v45  ;;  %3069 = vpow2.f32 %v2739_v31  ;;  %v2740_v59 = vmul.f32 -1.442695, %v3599_v4 }
 0x13d   :  { %v3046_v61 = vpop.eup %3045  ;;  %v2457_v13 = vrot.slane %v2443_v50, %v3351_v5  ;;  %v2112_v55 = vadd.f32 1.0, %v3044_v9  ;;  %v1921_v41 = vpop.f32.mrf.mxu0 }
 0x13e   :  { %v3048_v51 = vpop.eup %3047  ;;  %3071 = vrcp.f32 %v2110_v19  ;;  %v2113_v18 = vadd.f32 1.0, %v3046_v61 }
 0x13f   :  { %v3050_v43 = vpop.eup %3049  ;;  %v2458_v16 = vcombine.low %v2450_v58, %v2457_v13  ;;  %3073 = vrcp.f32 %v2112_v55  ;;  %v2115_v28 = vadd.f32 1.0, %v3048_v51 }
 0x140   :  { %v3052_v23 = vpop.eup %3051  ;;  %3075 = vrcp.f32 %v2113_v18  ;;  %v2114_v47 = vadd.f32 1.0, %v3050_v43 }
 0x141   :  { %v3054_v26 = vpop.eup %3053  ;;  %2555 = vst [vmem:[%s3650_s3 + $0x38] sm:$0xff] %v2458_v16  ;;  %3077 = vrcp.f32 %v2115_v28  ;;  %v2116_v17 = vadd.f32 1.0, %v3052_v23 }
 0x142   :  { %v3056_v24 = vpop.eup %3055  ;;  %v2256_v33 = vmul.f32 %v3054_v26, %v3482_v32  ;;  %3079 = vrcp.f32 %v2114_v47 }
 0x143   :  { %v2258_v44 = vmul.f32 %v3056_v24, %v3486_v20  ;;  %3081 = vrcp.f32 %v2116_v17  ;;  %v3058_v42 = vpop.eup %3057 }
 0x144   :  { %v2459_v60 = vcombine.low %v2255_v30, %v2256_v33  ;;  %3083 = vpow2.f32 %v2740_v59  ;;  %v3060_v15 = vpop.eup %3059  ;;  %v2259_v0 = vmul.f32 %v3058_v42, %v3491_v6 }
 0x145   :  { %v2460_v40 = vcombine.low %v2257_v63, %v2258_v44  ;;  %v3062_v48 = vpop.eup %3061  ;;  %v2117_v1 = vadd.f32 1.0, %v3060_v15 }
 0x146   :  { %v2467_v39 = vrot.slane %v2459_v60, %v3351_v5  ;;  %v3064_v36 = vpop.eup %3063  ;;  %v2119_v38 = vadd.f32 1.0, %v3062_v48 }
 0x147   :  { %v2474_v2 = vrot.slane %v2460_v40, %v3351_v5  ;;  %v3066_v32 = vpop.eup %3065  ;;  %3085 = vrcp.f32 %v2117_v1  ;;  %v2118_v62 = vadd.f32 1.0, %v3064_v36 }
 0x148   :  { %v3068_v3 = vpop.eup %3067  ;;  %3087 = vrcp.f32 %v2119_v38  ;;  %v2120_v20 = vadd.f32 1.0, %v3066_v32 }
 0x149   :  { %v2475_v49 = vcombine.low %v2467_v39, %v2474_v2  ;;  %v3070_v53 = vpop.eup %3069  ;;  %3089 = vrcp.f32 %v2118_v62  ;;  %v2261_v10 = vmul.f32 %v3068_v3, %v3493_v12 }
 0x14a   :  { %3091 = vrcp.f32 %v2120_v20  ;;  %v2121_v50 = vadd.f32 1.0, %v3070_v53 }
 0x14b   :  { %v3072_v46 = vpop.eup %3071  ;;  %2556 = vst [vmem:[%s3650_s3 + $0x40] sm:$0xff] %v2475_v49 }
 0x14c   :  { %v3074_v34 = vpop.eup %3073  ;;  %v2260_v11 = vmul.f32 %v3072_v46, %v3517_v37  ;;  %3093 = vrcp.f32 %v2121_v50 }
 0x14d   :  { %v3076_v54 = vpop.eup %3075  ;;  %v2262_v57 = vmul.f32 %v3074_v34, %v3526_v56 }
 0x14e   :  { %v3078_v31 = vpop.eup %3077  ;;  %v2476_v45 = vcombine.low %v2259_v0, %v2260_v11  ;;  %v2263_v61 = vmul.f32 %v3076_v54, %v3528_v8 }
 0x14f   :  { %v3080_v22 = vpop.eup %3079  ;;  %v2477_v9 = vcombine.low %v2261_v10, %v2262_v57  ;;  %v2265_v55 = vmul.f32 %v3078_v31, %v3531_v25 }
 0x150   :  { %v3082_v58 = vpop.eup %3081  ;;  %v2484_v19 = vrot.slane %v2476_v45, %v3351_v5  ;;  %v2264_v13 = vmul.f32 %v3080_v22, %v3536_v29 }
 0x151   :  { %v3084_v6 = vpop.eup %3083  ;;  %v2491_v37 = vrot.slane %v2477_v9, %v3351_v5  ;;  %v2266_v12 = vmul.f32 %v3082_v58, %v3539_v27 }
 0x152   :  { %v2493_v56 = vcombine.low %v2263_v61, %v2264_v13  ;;  %v2122_v41 = vadd.f32 1.0, %v3084_v6 }
 0x153   :  { %v2492_v51 = vcombine.low %v2484_v19, %v2491_v37  ;;  %v2494_v18 = vcombine.low %v2265_v55, %v2266_v12 }
 0x154   :  { %v2501_v43 = vrot.slane %v2493_v56, %v3351_v5  ;;  %3095 = vrcp.f32 %v2122_v41  ;;  %v3086_v16 = vpop.eup %3085 }
 0x155   :  { %2557 = vst [vmem:[%s3650_s3 + $0x48] sm:$0xff] %v2492_v51  ;;  %v2508_v8 = vrot.slane %v2494_v18, %v3351_v5  ;;  %v3088_v29 = vpop.eup %3087  ;;  %v2267_v27 = vmul.f32 %v3086_v16, %v3560_v52 }
 0x156   :  { %v3090_v28 = vpop.eup %3089  ;;  %v2269_v59 = vmul.f32 %v3088_v29, %v3569_v7 }
 0x157   :  { %v2509_v25 = vcombine.low %v2501_v43, %v2508_v8  ;;  %v3092_v23 = vpop.eup %3091  ;;  %v2268_v47 = vmul.f32 %v3090_v28, %v3580_v35 }
 0x158   :  { %v2270_v26 = vmul.f32 %v3092_v23, %v3582_v14 }
 0x159   :  { %2558 = vst [vmem:[%s3650_s3 + $0x50] sm:$0xff] %v2509_v25  ;;  %v2510_v17 = vcombine.low %v2267_v27, %v2268_v47  ;;  %v3094_v63 = vpop.eup %3093 }
 0x15a   :  { %v2511_v24 = vcombine.low %v2269_v59, %v2270_v26  ;;  %v2271_v52 = vmul.f32 %v3094_v63, %v3590_v21 }
 0x15b   :  { %v2518_v30 = vrot.slane %v2510_v17, %v3351_v5 }
 0x15c   :  { %v2525_v33 = vrot.slane %v2511_v24, %v3351_v5 }
 0x15e   :  { %v2526_v44 = vcombine.low %v2518_v30, %v2525_v33 }
 0x160   :  { %2559 = vst [vmem:[%s3650_s3 + $0x58] sm:$0xff] %v2526_v44 }
 0x161   :  { %v3096_v42 = vpop.eup %3095 }
 0x162   :  { %v2272_v35 = vmul.f32 %v3096_v42, %v3599_v4 }
 0x164   :  { %v2527_v7 = vcombine.low %v2271_v52, %v2272_v35 }
 0x166   :  { %2741 = vst.sshfl [vmem:[%s3650_s3 + $0x60] sm:$0x33 pattern:$0x76325410] %v2527_v7 }
 0x167   :  { %2565 = vsyncpa [#allocation3], 1 }

// kernel: image_decoder_conv_forward.6
= control target key start
LH: loop header
LB: loop body
LE: loop exit
PB: predicated region body
PF: predicated region fallthrough
CT: control target
= control target key end

     0   :  { %vm30_vm0 = vcmask 523264   ;;  %s2175_s0 = inlined_call_operand.vmem [shape: f32[2,128,64], index: 0, kind: input, shape index: {}]   ;;  %s2176_s1 = inlined_call_operand.vmem [shape: f32[128,1], index: 1, kind: input, shape index: {}]   ;;  %s2177_s2 = inlined_call_operand.vmem [shape: f32[128,1], index: 2, kind: input, shape index: {}]   ;;  %s2178_s3 = inlined_call_operand.vmem [shape: f32[2,128,64], index: 3, kind: output, shape index: {}]  }
   0x1   :  { %v1275_v0 = vld [vmem:[%s2175_s0 + $0x10] sm:$0xff]  ;;  %v1280_v1 = vld [vmem:[%s2175_s0] sm:$0xff]  ;;  %v1285_v2 = vld [vmem:[%s2175_s0 + $0x18] sm:$0xff] }
   0x2   :  { %v37_v3 = vsel %vm30_vm0, %v1275_v0, 0.0  ;;  %v31_v4 = vsel %vm30_vm0, %v1280_v1, 0.0  ;;  %v1294_v5 = vld [vmem:[%s2175_s0 + $0x8] sm:$0xff]  ;;  %v40_v6 = vsel %vm30_vm0, %v1285_v2, 0.0  ;;  %v1308_v9 = vld [vmem:[%s2175_s0 + $0x20] sm:$0xff]  ;;  %v1317_v12 = vld [vmem:[%s2175_s0 + $0x38] sm:$0xff] }
   0x3   :  { %38 = vadd.xlane.f32.xlu1 %v37_v3  ;;  %32 = vadd.xlane.f32.xlu0 %v31_v4  ;;  %v34_v7 = vsel %vm30_vm0, %v1294_v5, 0.0  ;;  %v1303_v8 = vld [vmem:[%s2175_s0 + $0x28] sm:$0xff]  ;;  %v43_v11 = vsel %vm30_vm0, %v1308_v9, 0.0  ;;  %v1322_v13 = vld [vmem:[%s2175_s0 + $0x30] sm:$0xff]  ;;  %v52_v14 = vsel %vm30_vm0, %v1317_v12, 0.0  ;;  %v1336_v17 = vld [vmem:[%s2175_s0 + $0x40] sm:$0xff] }
   0x4   :  { %v46_v10 = vsel %vm30_vm0, %v1303_v8, 0.0  ;;  %v49_v15 = vsel %vm30_vm0, %v1322_v13, 0.0  ;;  %v1331_v16 = vld [vmem:[%s2175_s0 + $0x48] sm:$0xff]  ;;  %v55_v19 = vsel %vm30_vm0, %v1336_v17, 0.0  ;;  %v1345_v20 = vld [vmem:[%s2175_s0 + $0x58] sm:$0xff]  ;;  %v1350_v21 = vld [vmem:[%s2175_s0 + $0x50] sm:$0xff] }
   0x5   :  { %v58_v18 = vsel %vm30_vm0, %v1331_v16, 0.0  ;;  %v64_v22 = vsel %vm30_vm0, %v1345_v20, 0.0  ;;  %v61_v23 = vsel %vm30_vm0, %v1350_v21, 0.0  ;;  %v1359_v24 = vld [vmem:[%s2175_s0 + $0x68] sm:$0xff]  ;;  %v1364_v25 = vld [vmem:[%s2175_s0 + $0x60] sm:$0xff]  ;;  %v1373_v28 = vld [vmem:[%s2175_s0 + $0x78] sm:$0xff] }
   0x6   :  { %v70_v26 = vsel %vm30_vm0, %v1359_v24, 0.0  ;;  %v67_v27 = vsel %vm30_vm0, %v1364_v25, 0.0  ;;  %v1378_v29 = vld [vmem:[%s2175_s0 + $0x70] sm:$0xff]  ;;  %v76_v30 = vsel %vm30_vm0, %v1373_v28, 0.0  ;;  %v1387_v32 = vld [vmem:[%s2175_s0 + $0x88] sm:$0xff]  ;;  %v1392_v33 = vld [vmem:[%s2175_s0 + $0x80] sm:$0xff] }
   0x7   :  { %41 = vadd.xlane.f32.xlu1 %v40_v6  ;;  %35 = vadd.xlane.f32.xlu0 %v34_v7  ;;  %v73_v31 = vsel %vm30_vm0, %v1378_v29, 0.0  ;;  %v99_v34 = vsel %vm30_vm0, %v1387_v32, 0.0  ;;  %v96_v35 = vsel %vm30_vm0, %v1392_v33, 0.0  ;;  %v1401_v36 = vld [vmem:[%s2175_s0 + $0x98] sm:$0xff]  ;;  %v1406_v37 = vld [vmem:[%s2175_s0 + $0x90] sm:$0xff]  ;;  %v1415_v40 = vld [vmem:[%s2175_s0 + $0xa8] sm:$0xff] }
   0x8   :  { %v105_v38 = vsel %vm30_vm0, %v1401_v36, 0.0  ;;  %v102_v39 = vsel %vm30_vm0, %v1406_v37, 0.0  ;;  %v1420_v41 = vld [vmem:[%s2175_s0 + $0xa0] sm:$0xff]  ;;  %v111_v42 = vsel %vm30_vm0, %v1415_v40, 0.0  ;;  %v1429_v44 = vld [vmem:[%s2175_s0 + $0xb8] sm:$0xff]  ;;  %v1434_v45 = vld [vmem:[%s2175_s0 + $0xb0] sm:$0xff] }
   0x9   :  { %v108_v43 = vsel %vm30_vm0, %v1420_v41, 0.0  ;;  %v117_v46 = vsel %vm30_vm0, %v1429_v44, 0.0  ;;  %v114_v47 = vsel %vm30_vm0, %v1434_v45, 0.0  ;;  %v1443_v48 = vld [vmem:[%s2175_s0 + $0xc8] sm:$0xff]  ;;  %v1448_v49 = vld [vmem:[%s2175_s0 + $0xc0] sm:$0xff]  ;;  %v1457_v52 = vld [vmem:[%s2175_s0 + $0xd8] sm:$0xff] }
   0xa   :  { %v123_v50 = vsel %vm30_vm0, %v1443_v48, 0.0  ;;  %v120_v51 = vsel %vm30_vm0, %v1448_v49, 0.0  ;;  %v1462_v53 = vld [vmem:[%s2175_s0 + $0xd0] sm:$0xff]  ;;  %v129_v54 = vsel %vm30_vm0, %v1457_v52, 0.0  ;;  %v1471_v56 = vld [vmem:[%s2175_s0 + $0xe8] sm:$0xff]  ;;  %v1476_v57 = vld [vmem:[%s2175_s0 + $0xe0] sm:$0xff] }
   0xb   :  { %47 = vadd.xlane.f32.xlu1 %v46_v10  ;;  %44 = vadd.xlane.f32.xlu0 %v43_v11  ;;  %v126_v55 = vsel %vm30_vm0, %v1462_v53, 0.0  ;;  %v135_v58 = vsel %vm30_vm0, %v1471_v56, 0.0  ;;  %v132_v59 = vsel %vm30_vm0, %v1476_v57, 0.0  ;;  %v1485_v60 = vld [vmem:[%s2175_s0 + $0xf8] sm:$0xff]  ;;  %v1490_v61 = vld [vmem:[%s2175_s0 + $0xf0] sm:$0xff] }
   0xc   :  { %v141_v62 = vsel %vm30_vm0, %v1485_v60, 0.0  ;;  %v138_v63 = vsel %vm30_vm0, %v1490_v61, 0.0 }
   0xf   :  { %53 = vadd.xlane.f32.xlu1 %v52_v14  ;;  %50 = vadd.xlane.f32.xlu0 %v49_v15 }
  0x13   :  { %59 = vadd.xlane.f32.xlu1 %v58_v18  ;;  %56 = vadd.xlane.f32.xlu0 %v55_v19 }
  0x17   :  { %65 = vadd.xlane.f32.xlu1 %v64_v22  ;;  %62 = vadd.xlane.f32.xlu0 %v61_v23 }
  0x1b   :  { %71 = vadd.xlane.f32.xlu1 %v70_v26  ;;  %68 = vadd.xlane.f32.xlu0 %v67_v27 }
  0x1f   :  { %77 = vadd.xlane.f32.xlu1 %v76_v30  ;;  %74 = vadd.xlane.f32.xlu0 %v73_v31 }
  0x23   :  { %100 = vadd.xlane.f32.xlu1 %v99_v34  ;;  %97 = vadd.xlane.f32.xlu0 %v96_v35 }
  0x27   :  { %106 = vadd.xlane.f32.xlu1 %v105_v38  ;;  %103 = vadd.xlane.f32.xlu0 %v102_v39 }
  0x2b   :  { %112 = vadd.xlane.f32.xlu1 %v111_v42  ;;  %109 = vadd.xlane.f32.xlu0 %v108_v43 }
  0x2f   :  { %118 = vadd.xlane.f32.xlu1 %v117_v46  ;;  %115 = vadd.xlane.f32.xlu0 %v114_v47 }
  0x33   :  { %124 = vadd.xlane.f32.xlu1 %v123_v50  ;;  %121 = vadd.xlane.f32.xlu0 %v120_v51 }
  0x37   :  { %130 = vadd.xlane.f32.xlu1 %v129_v54  ;;  %127 = vadd.xlane.f32.xlu0 %v126_v55 }
  0x3b   :  { %136 = vadd.xlane.f32.xlu1 %v135_v58  ;;  %133 = vadd.xlane.f32.xlu0 %v132_v59 }
  0x3f   :  { %142 = vadd.xlane.f32.xlu1 %v141_v62  ;;  %139 = vadd.xlane.f32.xlu0 %v138_v63 }
  0x8c   :  { %v39_v3 = vpop.xlane.xlu1 %38  ;;  %v33_v4 = vpop.xlane.xlu0 %32 }
  0x90   :  { %v42_v6 = vpop.xlane.xlu1 %41  ;;  %v36_v7 = vpop.xlane.xlu0 %35 }
  0x94   :  { %v48_v10 = vpop.xlane.xlu1 %47  ;;  %v45_v11 = vpop.xlane.xlu0 %44 }
  0x98   :  { %v54_v14 = vpop.xlane.xlu1 %53  ;;  %v51_v15 = vpop.xlane.xlu0 %50 }
  0x9c   :  { %v60_v18 = vpop.xlane.xlu1 %59  ;;  %v57_v19 = vpop.xlane.xlu0 %56 }
  0xa0   :  { %v1496_v22 = vpop.xlane.xlu1 %65  ;;  %v1498_v23 = vpop.xlane.xlu0 %62 }
  0xa4   :  { %v1500_v26 = vpop.xlane.xlu1 %71  ;;  %v1502_v27 = vpop.xlane.xlu0 %68 }
  0xa8   :  { %v1504_v30 = vpop.xlane.xlu1 %77  ;;  %v1506_v31 = vpop.xlane.xlu0 %74 }
  0xac   :  { %v101_v34 = vpop.xlane.xlu1 %100  ;;  %v98_v35 = vpop.xlane.xlu0 %97 }
  0xad   :  { %v145_v38 = vadd.f32 %v101_v34, %v36_v7  ;;  %v144_v39 = vadd.f32 %v98_v35, %v33_v4 }
  0xaf   :  { %v1508_v42 = vmul.f32 0.0078125, %v145_v38  ;;  %v1510_v43 = vmul.f32 0.0078125, %v144_v39 }
  0xb0   :  { %v107_v46 = vpop.xlane.xlu1 %106  ;;  %v104_v47 = vpop.xlane.xlu0 %103 }
  0xb1   :  { %v147_v50 = vadd.f32 %v107_v46, %v42_v6  ;;  %v146_v51 = vadd.f32 %v104_v47, %v39_v3  ;;  %v177_v54 = vsub.f32 %v1294_v5, %v1508_v42  ;;  %v176_v55 = vsub.f32 %v1280_v1, %v1510_v43 }
  0xb3   :  { %v1516_v58 = vmul.f32 0.0078125, %v147_v50  ;;  %v1518_v59 = vmul.f32 0.0078125, %v146_v51  ;;  %v193_v62 = vmul.f32 %v177_v54, %v177_v54  ;;  %v192_v63 = vmul.f32 %v176_v55, %v176_v55 }
  0xb4   :  { %v113_v4 = vpop.xlane.xlu1 %112  ;;  %v110_v7 = vpop.xlane.xlu0 %109 }
  0xb5   :  { %v149_v34 = vadd.f32 %v113_v4, %v48_v10  ;;  %v148_v35 = vadd.f32 %v110_v7, %v45_v11  ;;  %v211_v38 = vsel %vm30_vm0, %v193_v62, 0.0  ;;  %v208_v3 = vsel %vm30_vm0, %v192_v63, 0.0 }
  0xb6   :  { %212 = vadd.xlane.f32.xlu1 %v211_v38  ;;  %209 = vadd.xlane.f32.xlu0 %v208_v3  ;;  %v179_v5 = vsub.f32 %v1285_v2, %v1516_v58  ;;  %v178_v1 = vsub.f32 %v1275_v0, %v1518_v59 }
  0xb7   :  { %v1526_v6 = vmul.f32 0.0078125, %v149_v34  ;;  %v1528_v39 = vmul.f32 0.0078125, %v148_v35 }
  0xb8   :  { %v119_v46 = vpop.xlane.xlu1 %118  ;;  %v116_v47 = vpop.xlane.xlu0 %115  ;;  %v195_v10 = vmul.f32 %v179_v5, %v179_v5  ;;  %v194_v11 = vmul.f32 %v178_v1, %v178_v1 }
  0xb9   :  { %v151_v50 = vadd.f32 %v119_v46, %v54_v14  ;;  %v150_v51 = vadd.f32 %v116_v47, %v51_v15  ;;  %v181_v54 = vsub.f32 %v1303_v8, %v1526_v6  ;;  %v180_v55 = vsub.f32 %v1308_v9, %v1528_v39 }
  0xba   :  { %v217_v2 = vsel %vm30_vm0, %v195_v10, 0.0  ;;  %v214_v0 = vsel %vm30_vm0, %v194_v11, 0.0 }
  0xbb   :  { %v1536_v62 = vmul.f32 0.0078125, %v151_v50  ;;  %v1538_v63 = vmul.f32 0.0078125, %v150_v51  ;;  %218 = vadd.xlane.f32.xlu1 %v217_v2  ;;  %215 = vadd.xlane.f32.xlu0 %v214_v0  ;;  %v197_v4 = vmul.f32 %v181_v54, %v181_v54  ;;  %v196_v7 = vmul.f32 %v180_v55, %v180_v55 }
  0xbc   :  { %v125_v14 = vpop.xlane.xlu1 %124  ;;  %v122_v15 = vpop.xlane.xlu0 %121 }
  0xbd   :  { %v153_v34 = vadd.f32 %v125_v14, %v60_v18  ;;  %v152_v35 = vadd.f32 %v122_v15, %v57_v19  ;;  %v223_v8 = vsel %vm30_vm0, %v197_v4, 0.0  ;;  %v220_v9 = vsel %vm30_vm0, %v196_v7, 0.0 }
  0xbe   :  { %v183_v38 = vsub.f32 %v1317_v12, %v1536_v62  ;;  %v182_v3 = vsub.f32 %v1322_v13, %v1538_v63 }
  0xbf   :  { %v1546_v5 = vmul.f32 0.0078125, %v153_v34  ;;  %v1548_v1 = vmul.f32 0.0078125, %v152_v35  ;;  %224 = vadd.xlane.f32.xlu1 %v223_v8  ;;  %221 = vadd.xlane.f32.xlu0 %v220_v9 }
  0xc0   :  { %v131_v46 = vpop.xlane.xlu1 %130  ;;  %v128_v47 = vpop.xlane.xlu0 %127  ;;  %v199_v18 = vmul.f32 %v183_v38, %v183_v38  ;;  %v198_v19 = vmul.f32 %v182_v3, %v182_v3 }
  0xc1   :  { %v155_v10 = vadd.f32 %v131_v46, %v1496_v22  ;;  %v154_v11 = vadd.f32 %v128_v47, %v1498_v23  ;;  %v185_v12 = vsub.f32 %v1331_v16, %v1546_v5  ;;  %v184_v13 = vsub.f32 %v1336_v17, %v1548_v1 }
  0xc2   :  { %v229_v50 = vsel %vm30_vm0, %v199_v18, 0.0  ;;  %v226_v51 = vsel %vm30_vm0, %v198_v19, 0.0 }
  0xc3   :  { %v1558_v54 = vmul.f32 0.0078125, %v155_v10  ;;  %v1560_v55 = vmul.f32 0.0078125, %v154_v11  ;;  %230 = vadd.xlane.f32.xlu1 %v229_v50  ;;  %227 = vadd.xlane.f32.xlu0 %v226_v51  ;;  %v201_v2 = vmul.f32 %v185_v12, %v185_v12  ;;  %v200_v22 = vmul.f32 %v184_v13, %v184_v13 }
  0xc4   :  { %v137_v0 = vpop.xlane.xlu1 %136  ;;  %v134_v23 = vpop.xlane.xlu0 %133  ;;  %v257_v12 = vsub.f32 %v1387_v32, %v1508_v42  ;;  %v256_v13 = vsub.f32 %v1392_v33, %v1510_v43  ;;  %v261_v33 = vsub.f32 %v1415_v40, %v1526_v6 }
  0xc5   :  { %v157_v4 = vadd.f32 %v137_v0, %v1500_v26  ;;  %v156_v16 = vadd.f32 %v134_v23, %v1502_v27  ;;  %v235_v17 = vsel %vm30_vm0, %v201_v2, 0.0  ;;  %v232_v7 = vsel %vm30_vm0, %v200_v22, 0.0 }
  0xc6   :  { %v187_v14 = vsub.f32 %v1345_v20, %v1558_v54  ;;  %v186_v15 = vsub.f32 %v1350_v21, %v1560_v55  ;;  %v273_v0 = vmul.f32 %v257_v12, %v257_v12  ;;  %v272_v23 = vmul.f32 %v256_v13, %v256_v13 }
  0xc7   :  { %v1570_v34 = vmul.f32 0.0078125, %v157_v4  ;;  %v1572_v35 = vmul.f32 0.0078125, %v156_v16  ;;  %236 = vadd.xlane.f32.xlu1 %v235_v17  ;;  %233 = vadd.xlane.f32.xlu0 %v232_v7  ;;  %v260_v4 = vsub.f32 %v1420_v41, %v1528_v39  ;;  %v262_v41 = vsub.f32 %v1434_v45, %v1538_v63 }
  0xc8   :  { %v143_v8 = vpop.xlane.xlu1 %142  ;;  %v140_v26 = vpop.xlane.xlu0 %139  ;;  %v203_v9 = vmul.f32 %v187_v14, %v187_v14  ;;  %v202_v27 = vmul.f32 %v186_v15, %v186_v15  ;;  %v291_v16 = vsel %vm30_vm0, %v273_v0, 0.0  ;;  %v288_v17 = vsel %vm30_vm0, %v272_v23, 0.0 }
  0xc9   :  { %v159_v38 = vadd.f32 %v143_v8, %v1504_v30  ;;  %v158_v3 = vadd.f32 %v140_v26, %v1506_v31  ;;  %v189_v20 = vsub.f32 %v1359_v24, %v1570_v34  ;;  %v188_v21 = vsub.f32 %v1364_v25, %v1572_v35 }
  0xca   :  { %v241_v46 = vsel %vm30_vm0, %v203_v9, 0.0  ;;  %v238_v47 = vsel %vm30_vm0, %v202_v27, 0.0  ;;  %v277_v15 = vmul.f32 %v261_v33, %v261_v33  ;;  %v276_v8 = vmul.f32 %v260_v4, %v260_v4 }
  0xcb   :  { %v1582_v18 = vmul.f32 0.0078125, %v159_v38  ;;  %v1584_v19 = vmul.f32 0.0078125, %v158_v3  ;;  %242 = vadd.xlane.f32.xlu1 %v241_v46  ;;  %239 = vadd.xlane.f32.xlu0 %v238_v47  ;;  %v205_v10 = vmul.f32 %v189_v20, %v189_v20  ;;  %v204_v30 = vmul.f32 %v188_v21, %v188_v21 }
  0xcc   :  { %v263_v9 = vsub.f32 %v1429_v44, %v1536_v62  ;;  %v303_v27 = vsel %vm30_vm0, %v277_v15, 0.0  ;;  %v300_v38 = vsel %vm30_vm0, %v276_v8, 0.0  ;;  %v278_v20 = vmul.f32 %v262_v41, %v262_v41 }
  0xcd   :  { %v247_v31 = vsel %vm30_vm0, %v205_v10, 0.0  ;;  %v244_v11 = vsel %vm30_vm0, %v204_v30, 0.0  ;;  %v191_v24 = vsub.f32 %v1373_v28, %v1582_v18  ;;  %v190_v25 = vsub.f32 %v1378_v29, %v1584_v19 }
  0xce   :  { %v259_v28 = vsub.f32 %v1401_v36, %v1516_v58  ;;  %v258_v29 = vsub.f32 %v1406_v37, %v1518_v59  ;;  %v279_v3 = vmul.f32 %v263_v9, %v263_v9  ;;  %v265_v21 = vsub.f32 %v1443_v48, %v1546_v5 }
  0xcf   :  { %248 = vadd.xlane.f32.xlu1 %v247_v31  ;;  %245 = vadd.xlane.f32.xlu0 %v244_v11  ;;  %v207_v50 = vmul.f32 %v191_v24, %v191_v24  ;;  %v206_v51 = vmul.f32 %v190_v25, %v190_v25  ;;  %v264_v46 = vsub.f32 %v1448_v49, %v1548_v1  ;;  %v306_v30 = vsel %vm30_vm0, %v278_v20, 0.0 }
  0xd0   :  { %v275_v7 = vmul.f32 %v259_v28, %v259_v28  ;;  %v274_v14 = vmul.f32 %v258_v29, %v258_v29  ;;  %v267_v47 = vsub.f32 %v1457_v52, %v1558_v54  ;;  %v266_v45 = vsub.f32 %v1462_v53, %v1560_v55 }
  0xd1   :  { %v253_v2 = vsel %vm30_vm0, %v207_v50, 0.0  ;;  %v250_v22 = vsel %vm30_vm0, %v206_v51, 0.0  ;;  %v309_v10 = vsel %vm30_vm0, %v279_v3, 0.0  ;;  %v281_v31 = vmul.f32 %v265_v21, %v265_v21 }
  0xd2   :  { %v297_v37 = vsel %vm30_vm0, %v275_v7, 0.0  ;;  %v294_v26 = vsel %vm30_vm0, %v274_v14, 0.0  ;;  %v280_v11 = vmul.f32 %v264_v46, %v264_v46  ;;  %v283_v24 = vmul.f32 %v267_v47, %v267_v47 }
  0xd3   :  { %254 = vadd.xlane.f32.xlu1 %v253_v2  ;;  %251 = vadd.xlane.f32.xlu0 %v250_v22  ;;  %v282_v25 = vmul.f32 %v266_v45, %v266_v45  ;;  %v315_v49 = vsel %vm30_vm0, %v281_v31, 0.0  ;;  %v269_v52 = vsub.f32 %v1471_v56, %v1570_v34  ;;  %v268_v53 = vsub.f32 %v1476_v57, %v1572_v35 }
  0xd4   :  { %v312_v12 = vsel %vm30_vm0, %v280_v11, 0.0  ;;  %v321_v13 = vsel %vm30_vm0, %v283_v24, 0.0  ;;  %v271_v22 = vsub.f32 %v1485_v60, %v1582_v18  ;;  %v270_v0 = vsub.f32 %v1490_v61, %v1584_v19 }
  0xd5   :  { %v318_v50 = vsel %vm30_vm0, %v282_v25, 0.0  ;;  %v285_v51 = vmul.f32 %v269_v52, %v269_v52  ;;  %v284_v2 = vmul.f32 %v268_v53, %v268_v53  ;;  %v1251_v60 = vmov 0  }
  0xd6   :  { %v287_v23 = vmul.f32 %v271_v22, %v271_v22  ;;  %v286_v28 = vmul.f32 %v270_v0, %v270_v0  ;;  %1063 = vset.pattern.permute.xlu1 %v1251_v60  ;;  %1062 = vset.pattern.permute.xlu0 %v1251_v60 }
  0xd7   :  { %292 = vadd.xlane.f32.xlu1 %v291_v16  ;;  %289 = vadd.xlane.f32.xlu0 %v288_v17  ;;  %v327_v56 = vsel %vm30_vm0, %v285_v51, 0.0  ;;  %v324_v57 = vsel %vm30_vm0, %v284_v2, 0.0 }
  0xd8   :  { %v333_v29 = vsel %vm30_vm0, %v287_v23, 0.0  ;;  %v330_v33 = vsel %vm30_vm0, %v286_v28, 0.0 }
  0xdb   :  { %298 = vadd.xlane.f32.xlu1 %v297_v37  ;;  %295 = vadd.xlane.f32.xlu0 %v294_v26 }
  0xdf   :  { %304 = vadd.xlane.f32.xlu1 %v303_v27  ;;  %301 = vadd.xlane.f32.xlu0 %v300_v38 }
  0xe3   :  { %310 = vadd.xlane.f32.xlu1 %v309_v10  ;;  %307 = vadd.xlane.f32.xlu0 %v306_v30 }
  0xe7   :  { %316 = vadd.xlane.f32.xlu1 %v315_v49  ;;  %313 = vadd.xlane.f32.xlu0 %v312_v12 }
  0xeb   :  { %322 = vadd.xlane.f32.xlu1 %v321_v13  ;;  %319 = vadd.xlane.f32.xlu0 %v318_v50 }
  0xef   :  { %328 = vadd.xlane.f32.xlu1 %v327_v56  ;;  %325 = vadd.xlane.f32.xlu0 %v324_v57 }
  0xf3   :  { %334 = vadd.xlane.f32.xlu1 %v333_v29  ;;  %331 = vadd.xlane.f32.xlu0 %v330_v33 }
 0x13f   :  { %v213_v61 = vpop.xlane.xlu1 %212  ;;  %v210_v4 = vpop.xlane.xlu0 %209 }
 0x144   :  { %v219_v16 = vpop.xlane.xlu1 %218  ;;  %v216_v17 = vpop.xlane.xlu0 %215 }
 0x148   :  { %v225_v7 = vpop.xlane.xlu1 %224  ;;  %v222_v14 = vpop.xlane.xlu0 %221 }
 0x14c   :  { %v231_v15 = vpop.xlane.xlu1 %230  ;;  %v228_v8 = vpop.xlane.xlu0 %227 }
 0x150   :  { %v237_v37 = vpop.xlane.xlu1 %236  ;;  %v234_v26 = vpop.xlane.xlu0 %233 }
 0x154   :  { %v243_v9 = vpop.xlane.xlu1 %242  ;;  %v1642_v41 = vpop.xlane.xlu0 %239 }
 0x158   :  { %v1644_v27 = vpop.xlane.xlu1 %248  ;;  %v1646_v38 = vpop.xlane.xlu0 %245 }
 0x15c   :  { %v1648_v3 = vpop.xlane.xlu1 %254  ;;  %v1650_v20 = vpop.xlane.xlu0 %251 }
 0x160   :  { %v293_v21 = vpop.xlane.xlu1 %292  ;;  %v290_v46 = vpop.xlane.xlu0 %289 }
 0x161   :  { %v337_v47 = vadd.f32 %v293_v21, %v213_v61  ;;  %v336_v45 = vadd.f32 %v290_v46, %v210_v4 }
 0x163   :  { %v353_v10 = vmul.f32 0.0078125, %v337_v47  ;;  %v352_v30 = vmul.f32 0.0078125, %v336_v45 }
 0x164   :  { %v299_v31 = vpop.xlane.xlu1 %298  ;;  %v296_v11 = vpop.xlane.xlu0 %295 }
 0x165   :  { %v385_v24 = vadd.f32 1e-05, %v353_v10  ;;  %v384_v25 = vadd.f32 1e-05, %v352_v30  ;;  %v339_v49 = vadd.f32 %v299_v31, %v219_v16  ;;  %v338_v12 = vadd.f32 %v296_v11, %v216_v17 }
 0x167   :  { %1064 = vrsqrt.f32 %v385_v24  ;;  %v355_v52 = vmul.f32 0.0078125, %v339_v49  ;;  %v354_v53 = vmul.f32 0.0078125, %v338_v12  ;;  %v370_v12 = vld [vmem:[%s2176_s1 + $0x10] sm:$0xff] }
 0x168   :  { %1066 = vrsqrt.f32 %v384_v25  ;;  %v305_v13 = vpop.xlane.xlu1 %304  ;;  %v302_v50 = vpop.xlane.xlu0 %301 }
 0x169   :  { %v386_v51 = vadd.f32 1e-05, %v354_v53  ;;  %v341_v2 = vadd.f32 %v305_v13, %v225_v7  ;;  %v340_v22 = vadd.f32 %v302_v50, %v222_v14  ;;  %v387_v0 = vadd.f32 1e-05, %v355_v52  ;;  %v369_v7 = vld [vmem:[%s2176_s1 + $0x8] sm:$0xff]  ;;  %v368_v14 = vld [vmem:[%s2176_s1] sm:$0xff] }
 0x16b   :  { %v356_v56 = vmul.f32 0.0078125, %v340_v22  ;;  %1068 = vrsqrt.f32 %v386_v51  ;;  %v357_v28 = vmul.f32 0.0078125, %v341_v2 }
 0x16c   :  { %v311_v57 = vpop.xlane.xlu1 %310  ;;  %v308_v23 = vpop.xlane.xlu0 %307  ;;  %1070 = vrsqrt.f32 %v387_v0 }
 0x16d   :  { %v388_v29 = vadd.f32 1e-05, %v356_v56  ;;  %v342_v33 = vadd.f32 %v308_v23, %v228_v8  ;;  %v389_v4 = vadd.f32 1e-05, %v357_v28  ;;  %v343_v17 = vadd.f32 %v311_v57, %v231_v15  ;;  %v371_v57 = vld [vmem:[%s2176_s1 + $0x18] sm:$0xff] }
 0x16f   :  { %1072 = vrsqrt.f32 %v388_v29  ;;  %v358_v21 = vmul.f32 0.0078125, %v342_v33  ;;  %v359_v11 = vmul.f32 0.0078125, %v343_v17  ;;  %v372_v17 = vld [vmem:[%s2176_s1 + $0x20] sm:$0xff] }
 0x170   :  { %v317_v60 = vpop.xlane.xlu1 %316  ;;  %v314_v61 = vpop.xlane.xlu0 %313  ;;  %1074 = vrsqrt.f32 %v389_v4 }
 0x171   :  { %v345_v16 = vadd.f32 %v317_v60, %v237_v37  ;;  %v344_v31 = vadd.f32 %v314_v61, %v234_v26  ;;  %v390_v15 = vadd.f32 1e-05, %v358_v21  ;;  %v391_v51 = vadd.f32 1e-05, %v359_v11 }
 0x173   :  { %v361_v46 = vmul.f32 0.0078125, %v345_v16  ;;  %v360_v26 = vmul.f32 0.0078125, %v344_v31 }
 0x174   :  { %v1065_v47 = vpop.eup %1064  ;;  %v323_v45 = vpop.xlane.xlu1 %322 }
 0x175   :  { %v320_v10 = vpop.xlane.xlu0 %319  ;;  %v1067_v8 = vpop.eup %1066  ;;  %v393_v30 = vadd.f32 1e-05, %v361_v46  ;;  %v347_v37 = vadd.f32 %v323_v45, %v243_v9  ;;  %v1658_v24 = vmul.f32 %v1065_v47, %v369_v7  ;;  %v392_v28 = vadd.f32 1e-05, %v360_v26  ;;  %v373_v45 = vld [vmem:[%s2176_s1 + $0x28] sm:$0xff] }
 0x176   :  { %v1660_v25 = vmul.f32 %v1067_v8, %v368_v14  ;;  %v346_v2 = vadd.f32 %v320_v10, %v1642_v41  ;;  %v381_v26 = vld [vmem:[%s2176_s1 + $0x68] sm:$0xff] }
 0x177   :  { %1076 = vrsqrt.f32 %v393_v30  ;;  %v363_v49 = vmul.f32 0.0078125, %v347_v37  ;;  %487 = vperm.xlu1 %1063, %v1658_v24   ;;  %v379_v37 = vld [vmem:[%s2176_s1 + $0x58] sm:$0xff] }
 0x178   :  { %482 = vperm.xlu0 %1062, %v1660_v25   ;;  %v329_v52 = vpop.xlane.xlu1 %328  ;;  %v1069_v53 = vpop.eup %1068  ;;  %1078 = vrsqrt.f32 %v390_v15  ;;  %v362_v33 = vmul.f32 0.0078125, %v346_v2  ;;  %v374_v15 = vld [vmem:[%s2176_s1 + $0x30] sm:$0xff] }
 0x179   :  { %v395_v9 = vadd.f32 1e-05, %v363_v49  ;;  %v349_v13 = vadd.f32 %v329_v52, %v1644_v27  ;;  %v326_v50 = vpop.xlane.xlu0 %325  ;;  %v1669_v22 = vmul.f32 %v1069_v53, %v370_v12  ;;  %v1071_v0 = vpop.eup %1070 }
 0x17a   :  { %v348_v41 = vadd.f32 %v326_v50, %v1646_v38  ;;  %v419_v60 = vmul.f32 %v1071_v0, %v371_v57  ;;  %v394_v7 = vadd.f32 1e-05, %v362_v33  ;;  %v377_v38 = vld [vmem:[%s2176_s1 + $0x48] sm:$0xff]  ;;  %v376_v57 = vld [vmem:[%s2176_s1 + $0x40] sm:$0xff] }
 0x17b   :  { %1080 = vrsqrt.f32 %v395_v9  ;;  %v365_v56 = vmul.f32 0.0078125, %v349_v13  ;;  %492 = vperm.xlu1 %1063, %v1669_v22   ;;  %v375_v13 = vld [vmem:[%s2176_s1 + $0x38] sm:$0xff]  ;;  %v433_v33 = vld [vmem:[%s2177_s2 + $0x8] sm:$0xff] }
 0x17c   :  { %v335_v23 = vpop.xlane.xlu1 %334  ;;  %1082 = vrsqrt.f32 %v391_v51  ;;  %v1073_v61 = vpop.eup %1072  ;;  %v364_v14 = vmul.f32 0.0078125, %v348_v41 }
 0x17d   :  { %v397_v29 = vadd.f32 1e-05, %v365_v56  ;;  %v351_v27 = vadd.f32 %v335_v23, %v1648_v3  ;;  %v332_v16 = vpop.xlane.xlu0 %331  ;;  %v1075_v46 = vpop.eup %1074  ;;  %v1681_v47 = vmul.f32 %v1073_v61, %v372_v17  ;;  %v383_v56 = vld [vmem:[%s2176_s1 + $0x78] sm:$0xff]  ;;  %v378_v61 = vld [vmem:[%s2176_s1 + $0x50] sm:$0xff] }
 0x17e   :  { %v350_v3 = vadd.f32 %v332_v16, %v1650_v20  ;;  %v396_v30 = vadd.f32 1e-05, %v364_v14  ;;  %v421_v20 = vmul.f32 %v1075_v46, %v373_v45  ;;  %v451_v16 = vmul.f32 %v419_v60, %v1516_v58  ;;  %v437_v58 = vld [vmem:[%s2177_s2 + $0x28] sm:$0xff] }
 0x17f   :  { %1084 = vrsqrt.f32 %v397_v29  ;;  %v367_v4 = vmul.f32 0.0078125, %v351_v27  ;;  %497 = vperm.xlu1 %1063, %v419_v60   ;;  %v449_v29 = vmul.f32 %v1658_v24, %v1508_v42  ;;  %v435_v42 = vld [vmem:[%s2177_s2 + $0x18] sm:$0xff] }
 0x180   :  { %1086 = vrsqrt.f32 %v392_v28  ;;  %v366_v31 = vmul.f32 0.0078125, %v350_v3  ;;  %v467_v46 = vsub.f32 %v435_v42, %v451_v16  ;;  %v382_v3 = vld [vmem:[%s2176_s1 + $0x70] sm:$0xff] }
 0x181   :  { %v399_v21 = vadd.f32 1e-05, %v367_v4  ;;  %v465_v4 = vsub.f32 %v433_v33, %v449_v29 }
 0x182   :  { %v398_v52 = vadd.f32 1e-05, %v366_v31  ;;  %v432_v31 = vld [vmem:[%s2177_s2] sm:$0xff] }
 0x183   :  { %1088 = vrsqrt.f32 %v399_v21  ;;  %502 = vperm.xlu1 %1063, %v1681_v47   ;;  %v380_v21 = vld [vmem:[%s2176_s1 + $0x60] sm:$0xff] }
 0x184   :  { %v1077_v10 = vpop.eup %1076  ;;  %1090 = vrsqrt.f32 %v394_v7  ;;  %v453_v7 = vmul.f32 %v421_v20, %v1526_v6  ;;  %v439_v6 = vld [vmem:[%s2177_s2 + $0x38] sm:$0xff] }
 0x185   :  { %v1690_v8 = vmul.f32 %v1077_v10, %v377_v38  ;;  %v1079_v11 = vpop.eup %1078  ;;  %1092 = vrsqrt.f32 %v396_v30  ;;  %v448_v30 = vmul.f32 %v1660_v25, %v1510_v43  ;;  %v434_v43 = vld [vmem:[%s2177_s2 + $0x10] sm:$0xff] }
 0x186   :  { %v1699_v53 = vmul.f32 %v1079_v11, %v374_v15  ;;  %1094 = vrsqrt.f32 %v398_v52  ;;  %v469_v38 = vsub.f32 %v437_v58, %v453_v7  ;;  %v450_v15 = vmul.f32 %v1669_v22, %v1518_v59  ;;  %v436_v59 = vld [vmem:[%s2177_s2 + $0x20] sm:$0xff]  ;;  %v1224_v7 = vld [vmem:[%s2175_s0 + $0x8] sm:$0xff] }
 0x187   :  { %527 = vperm.xlu0 %1062, %v1690_v8   ;;  %507 = vperm.xlu1 %1063, %v421_v20   ;;  %v464_v11 = vsub.f32 %v432_v31, %v448_v30 }
 0x188   :  { %v1081_v49 = vpop.eup %1080  ;;  %v466_v52 = vsub.f32 %v434_v43, %v450_v15  ;;  %v1226_v15 = vld [vmem:[%s2175_s0 + $0x28] sm:$0xff] }
 0x189   :  { %v427_v12 = vmul.f32 %v1081_v49, %v379_v37  ;;  %v1083_v9 = vpop.eup %1082  ;;  %v457_v37 = vmul.f32 %v1690_v8, %v1546_v5  ;;  %v443_v5 = vld [vmem:[%s2177_s2 + $0x58] sm:$0xff]  ;;  %v452_v8 = vmul.f32 %v1681_v47, %v1528_v39  ;;  %v438_v39 = vld [vmem:[%s2177_s2 + $0x30] sm:$0xff] }
 0x18a   :  { %v423_v0 = vmul.f32 %v1083_v9, %v375_v13 }
 0x18b   :  { %537 = vperm.xlu0 %1062, %v427_v12   ;;  %512 = vperm.xlu1 %1063, %v1699_v53   ;;  %v459_v49 = vmul.f32 %v427_v12, %v1558_v54  ;;  %v468_v9 = vsub.f32 %v436_v59, %v452_v8  ;;  %v445_v54 = vld [vmem:[%s2177_s2 + $0x68] sm:$0xff]  ;;  %v454_v12 = vmul.f32 %v1699_v53, %v1538_v63  ;;  %v440_v63 = vld [vmem:[%s2177_s2 + $0x40] sm:$0xff] }
 0x18c   :  { %v1085_v50 = vpop.eup %1084  ;;  %v455_v45 = vmul.f32 %v423_v0, %v1536_v62  ;;  %v441_v62 = vld [vmem:[%s2177_s2 + $0x48] sm:$0xff] }
 0x18d   :  { %v429_v51 = vmul.f32 %v1085_v50, %v381_v26  ;;  %v1087_v2 = vpop.eup %1086  ;;  %v473_v25 = vsub.f32 %v441_v62, %v457_v37  ;;  %v475_v22 = vsub.f32 %v443_v5, %v459_v49  ;;  %v470_v50 = vsub.f32 %v438_v39, %v454_v12  ;;  %v1228_v12 = vld [vmem:[%s2175_s0] sm:$0xff] }
 0x18e   :  { %v424_v27 = vmul.f32 %v1087_v2, %v376_v57  ;;  %v471_v20 = vsub.f32 %v439_v6, %v455_v45 }
 0x18f   :  { %547 = vperm.xlu0 %1062, %v429_v51   ;;  %517 = vperm.xlu1 %1063, %v423_v0   ;;  %v461_v26 = vmul.f32 %v429_v51, %v1570_v34  ;;  %v447_v34 = vld [vmem:[%s2177_s2 + $0x78] sm:$0xff] }
 0x190   :  { %v1089_v23 = vpop.eup %1088  ;;  %v456_v51 = vmul.f32 %v424_v27, %v1548_v1  ;;  %v444_v1 = vld [vmem:[%s2177_s2 + $0x60] sm:$0xff] }
 0x191   :  { %v431_v28 = vmul.f32 %v1089_v23, %v383_v56  ;;  %v1091_v41 = vpop.eup %1090  ;;  %v477_v47 = vsub.f32 %v445_v54, %v461_v26 }
 0x192   :  { %v426_v17 = vmul.f32 %v1091_v41, %v378_v61  ;;  %v1093_v24 = vpop.eup %1092  ;;  %v472_v2 = vsub.f32 %v440_v63, %v456_v51 }
 0x193   :  { %557 = vperm.xlu0 %1062, %v431_v28   ;;  %522 = vperm.xlu1 %1063, %v424_v27   ;;  %v428_v14 = vmul.f32 %v1093_v24, %v380_v21  ;;  %v1095_v60 = vpop.eup %1094  ;;  %v463_v13 = vmul.f32 %v431_v28, %v1582_v18  ;;  %v442_v18 = vld [vmem:[%s2177_s2 + $0x50] sm:$0xff] }
 0x194   :  { %v430_v10 = vmul.f32 %v1095_v60, %v382_v3  ;;  %v458_v0 = vmul.f32 %v426_v17, %v1560_v55  ;;  %v446_v55 = vld [vmem:[%s2177_s2 + $0x70] sm:$0xff] }
 0x195   :  { %v479_v53 = vsub.f32 %v447_v34, %v463_v13  ;;  %v460_v56 = vmul.f32 %v428_v14, %v1572_v35 }
 0x196   :  { %v474_v57 = vsub.f32 %v442_v18, %v458_v0  ;;  %v462_v23 = vmul.f32 %v430_v10, %v1584_v19 }
 0x197   :  { %583 = vperm.xlu0 %1062, %v465_v4   ;;  %532 = vperm.xlu1 %1063, %v426_v17   ;;  %v476_v28 = vsub.f32 %v444_v1, %v460_v56  ;;  %v1231_v56 = vld [vmem:[%s2175_s0 + $0x90] sm:$0xff] }
 0x198   :  { %v478_v29 = vsub.f32 %v446_v55, %v462_v23 }
 0x19b   :  { %593 = vperm.xlu0 %1062, %v467_v46   ;;  %542 = vperm.xlu1 %1063, %v428_v14  }
 0x19f   :  { %603 = vperm.xlu0 %1062, %v469_v38   ;;  %552 = vperm.xlu1 %1063, %v430_v10   ;;  %v1225_v10 = vld [vmem:[%s2175_s0 + $0x18] sm:$0xff] }
 0x1a3   :  { %613 = vperm.xlu0 %1062, %v471_v20   ;;  %578 = vperm.xlu1 %1063, %v464_v11  }
 0x1a7   :  { %623 = vperm.xlu0 %1062, %v473_v25   ;;  %588 = vperm.xlu1 %1063, %v466_v52  }
 0x1ab   :  { %633 = vperm.xlu0 %1062, %v475_v22   ;;  %598 = vperm.xlu1 %1063, %v468_v9   ;;  %v1227_v22 = vld [vmem:[%s2175_s0 + $0x38] sm:$0xff] }
 0x1af   :  { %643 = vperm.xlu0 %1062, %v477_v47   ;;  %608 = vperm.xlu1 %1063, %v470_v50   ;;  %v1229_v47 = vld [vmem:[%s2175_s0 + $0x80] sm:$0xff] }
 0x1b3   :  { %653 = vperm.xlu0 %1062, %v479_v53   ;;  %618 = vperm.xlu1 %1063, %v472_v2   ;;  %v1230_v2 = vld [vmem:[%s2175_s0 + $0x10] sm:$0xff] }
 0x1b7   :  { %628 = vperm.xlu1 %1063, %v474_v57  }
 0x1bb   :  { %638 = vperm.xlu1 %1063, %v476_v28  }
 0x1bf   :  { %648 = vperm.xlu1 %1063, %v478_v29   ;;  %v1232_v29 = vld [vmem:[%s2175_s0 + $0x48] sm:$0xff] }
 0x1f2   :  { %v488_v27 = vpop.permute.xlu1 %487 }
 0x1f3   :  { %v483_v35 = vpop.permute.xlu0 %482  ;;  %v561_v14 = vmul.f32 %v1224_v7, %v488_v27  ;;  %v817_v58 = vmul.f32 %v1387_v32, %v488_v27 }
 0x1f4   :  { %v560_v39 = vmul.f32 %v1228_v12, %v483_v35  ;;  %v816_v13 = vmul.f32 %v1229_v47, %v483_v35 }
 0x1f6   :  { %v493_v33 = vpop.permute.xlu1 %492 }
 0x1f7   :  { %v562_v0 = vmul.f32 %v1230_v2, %v493_v33  ;;  %v818_v57 = vmul.f32 %v1231_v56, %v493_v33 }
 0x1fa   :  { %v498_v41 = vpop.permute.xlu1 %497 }
 0x1fb   :  { %v563_v6 = vmul.f32 %v1225_v10, %v498_v41  ;;  %v819_v30 = vmul.f32 %v1401_v36, %v498_v41 }
 0x1fe   :  { %v1793_v61 = vpop.permute.xlu1 %502 }
 0x202   :  { %v1795_v4 = vpop.permute.xlu0 %527  ;;  %v508_v16 = vpop.permute.xlu1 %507 }
 0x203   :  { %v565_v43 = vmul.f32 %v1226_v15, %v508_v16  ;;  %v821_v36 = vmul.f32 %v1415_v40, %v508_v16  ;;  %v569_v27 = vmul.f32 %v1232_v29, %v1795_v4  ;;  %v825_v41 = vmul.f32 %v1443_v48, %v1795_v4  ;;  %v1233_v4 = vld [vmem:[%s2175_s0 + $0x20] sm:$0xff]  ;;  %v1238_v29 = vld [vmem:[%s2175_s0 + $0xb0] sm:$0xff] }
 0x206   :  { %v1797_v17 = vpop.permute.xlu0 %537  ;;  %v1799_v19 = vpop.permute.xlu1 %512 }
 0x20a   :  { %v1801_v42 = vpop.permute.xlu0 %547  ;;  %v518_v24 = vpop.permute.xlu1 %517 }
 0x20b   :  { %v567_v26 = vmul.f32 %v1227_v22, %v518_v24  ;;  %v823_v40 = vmul.f32 %v1429_v44, %v518_v24 }
 0x20e   :  { %v1803_v21 = vpop.permute.xlu0 %557  ;;  %v1805_v46 = vpop.permute.xlu1 %522 }
 0x212   :  { %v584_v60 = vpop.permute.xlu0 %583  ;;  %v1811_v3 = vpop.permute.xlu1 %532 }
 0x213   :  { %v1813_v38 = vadd.f32 %v584_v60, %v561_v14  ;;  %v1815_v45 = vadd.f32 %v817_v58, %v584_v60 }
 0x215   :  { %v998_v31 = vmul.f32 -1.442695, %v1813_v38  ;;  %v1030_v20 = vmul.f32 -1.442695, %v1815_v45 }
 0x216   :  { %v594_v37 = vpop.permute.xlu0 %593  ;;  %v1823_v32 = vpop.permute.xlu1 %542 }
 0x217   :  { %1096 = vpow2.f32 %v998_v31  ;;  %v1825_v11 = vadd.f32 %v594_v37, %v563_v6  ;;  %v1827_v62 = vadd.f32 %v819_v30, %v594_v37  ;;  %v564_v30 = vmul.f32 %v1233_v4, %v1793_v61  ;;  %v1234_v37 = vld [vmem:[%s2175_s0 + $0xa0] sm:$0xff] }
 0x218   :  { %1098 = vpow2.f32 %v1030_v20  ;;  %v820_v15 = vmul.f32 %v1234_v37, %v1793_v61  ;;  %v1235_v61 = vld [vmem:[%s2175_s0 + $0x58] sm:$0xff] }
 0x219   :  { %v1000_v25 = vmul.f32 -1.442695, %v1825_v11  ;;  %v1032_v49 = vmul.f32 -1.442695, %v1827_v62  ;;  %v571_v12 = vmul.f32 %v1235_v61, %v1797_v17 }
 0x21a   :  { %v604_v52 = vpop.permute.xlu0 %603  ;;  %v1835_v5 = vpop.permute.xlu1 %552 }
 0x21b   :  { %1100 = vpow2.f32 %v1000_v25  ;;  %v1837_v8 = vadd.f32 %v604_v52, %v565_v43  ;;  %v1839_v59 = vadd.f32 %v821_v36, %v604_v52 }
 0x21c   :  { %1102 = vpow2.f32 %v1032_v49 }
 0x21d   :  { %v1002_v9 = vmul.f32 -1.442695, %v1837_v8  ;;  %v1034_v54 = vmul.f32 -1.442695, %v1839_v59 }
 0x21e   :  { %v614_v50 = vpop.permute.xlu0 %613  ;;  %v579_v34 = vpop.permute.xlu1 %578 }
 0x21f   :  { %1104 = vpow2.f32 %v1002_v9  ;;  %v1853_v51 = vadd.f32 %v614_v50, %v567_v26  ;;  %v1855_v44 = vadd.f32 %v823_v40, %v614_v50  ;;  %v1857_v63 = vadd.f32 %v579_v34, %v560_v39 }
 0x220   :  { %1106 = vpow2.f32 %v1034_v54  ;;  %v1859_v53 = vadd.f32 %v816_v13, %v579_v34  ;;  %v1236_v13 = vld [vmem:[%s2175_s0 + $0xd8] sm:$0xff] }
 0x221   :  { %v1004_v18 = vmul.f32 -1.442695, %v1853_v51  ;;  %v997_v1 = vmul.f32 -1.442695, %v1857_v63  ;;  %v1036_v28 = vmul.f32 -1.442695, %v1855_v44  ;;  %v827_v50 = vmul.f32 %v1236_v13, %v1797_v17 }
 0x222   :  { %v1029_v23 = vmul.f32 -1.442695, %v1859_v53  ;;  %v624_v55 = vpop.permute.xlu0 %623  ;;  %v589_v35 = vpop.permute.xlu1 %588  ;;  %v1242_v13 = vld [vmem:[%s2175_s0 + $0x78] sm:$0xff] }
 0x223   :  { %1108 = vpow2.f32 %v1004_v18  ;;  %v1877_v33 = vadd.f32 %v589_v35, %v562_v0  ;;  %v1879_v24 = vadd.f32 %v818_v57, %v589_v35  ;;  %v1881_v58 = vadd.f32 %v624_v55, %v569_v27 }
 0x224   :  { %v1097_v16 = vpop.eup %1096  ;;  %1110 = vpow2.f32 %v997_v1  ;;  %v1883_v60 = vadd.f32 %v825_v41, %v624_v55  ;;  %v822_v27 = vmul.f32 %v1238_v29, %v1799_v19 }
 0x225   :  { %v1099_v7 = vpop.eup %1098  ;;  %v721_v14 = vadd.f32 1.0, %v1097_v16  ;;  %1112 = vpow2.f32 %v1029_v23  ;;  %v999_v6 = vmul.f32 -1.442695, %v1877_v33  ;;  %v1031_v48 = vmul.f32 -1.442695, %v1879_v24  ;;  %v1237_v23 = vld [vmem:[%s2175_s0 + $0x30] sm:$0xff] }
 0x226   :  { %v897_v10 = vadd.f32 1.0, %v1099_v7  ;;  %1114 = vpow2.f32 %v1036_v28  ;;  %v599_v31 = vpop.permute.xlu1 %598  ;;  %v1006_v25 = vmul.f32 -1.442695, %v1881_v58  ;;  %v1038_v22 = vmul.f32 -1.442695, %v1883_v60  ;;  %v634_v9 = vpop.permute.xlu0 %633 }
 0x227   :  { %1116 = vrcp.f32 %v721_v14  ;;  %v1896_v49 = vadd.f32 %v599_v31, %v564_v30  ;;  %v1899_v26 = vadd.f32 %v820_v15, %v599_v31  ;;  %v1911_v18 = vadd.f32 %v634_v9, %v571_v12 }
 0x228   :  { %v1101_v20 = vpop.eup %1100  ;;  %1118 = vrcp.f32 %v897_v10  ;;  %v1913_v57 = vadd.f32 %v827_v50, %v634_v9  ;;  %v566_v28 = vmul.f32 %v1237_v23, %v1799_v19  ;;  %v1239_v19 = vld [vmem:[%s2175_s0 + $0x68] sm:$0xff]  ;;  %v575_v50 = vmul.f32 %v1242_v13, %v1803_v21 }
 0x229   :  { %v1103_v43 = vpop.eup %1102  ;;  %v723_v36 = vadd.f32 1.0, %v1101_v20  ;;  %1120 = vpow2.f32 %v999_v6  ;;  %v1001_v47 = vmul.f32 -1.442695, %v1896_v49  ;;  %v1033_v2 = vmul.f32 -1.442695, %v1899_v26 }
 0x22a   :  { %v899_v52 = vadd.f32 1.0, %v1103_v43  ;;  %1122 = vpow2.f32 %v1031_v48  ;;  %v609_v0 = vpop.permute.xlu1 %608  ;;  %v1008_v7 = vmul.f32 -1.442695, %v1911_v18  ;;  %v1040_v48 = vmul.f32 -1.442695, %v1913_v57  ;;  %v644_v30 = vpop.permute.xlu0 %643 }
 0x22b   :  { %1124 = vrcp.f32 %v723_v36  ;;  %v1924_v14 = vadd.f32 %v609_v0, %v566_v28  ;;  %v1927_v4 = vadd.f32 %v822_v27, %v609_v0  ;;  %v573_v37 = vmul.f32 %v1239_v19, %v1801_v42  ;;  %v1240_v36 = vld [vmem:[%s2175_s0 + $0xe8] sm:$0xff]  ;;  %v1243_v0 = vld [vmem:[%s2175_s0 + $0xc0] sm:$0xff]  ;;  %v1245_v19 = vld [vmem:[%s2175_s0 + $0x50] sm:$0xff] }
 0x22c   :  { %v1105_v40 = vpop.eup %1104  ;;  %1126 = vrcp.f32 %v899_v52 }
 0x22d   :  { %v1107_v54 = vpop.eup %1106  ;;  %v725_v39 = vadd.f32 1.0, %v1105_v40  ;;  %1128 = vpow2.f32 %v1006_v25  ;;  %v829_v25 = vmul.f32 %v1240_v36, %v1801_v42  ;;  %v1944_v9 = vadd.f32 %v644_v30, %v573_v37 }
 0x22e   :  { %v901_v34 = vadd.f32 1.0, %v1107_v54  ;;  %1130 = vpow2.f32 %v1038_v22  ;;  %v619_v31 = vpop.permute.xlu1 %618 }
 0x22f   :  { %1132 = vrcp.f32 %v725_v39  ;;  %v1951_v61 = vadd.f32 %v829_v25, %v644_v30  ;;  %v1241_v39 = vld [vmem:[%s2175_s0 + $0x40] sm:$0xff] }
 0x230   :  { %v1109_v56 = vpop.eup %1108  ;;  %1134 = vrcp.f32 %v901_v34 }
 0x231   :  { %v1111_v1 = vpop.eup %1110  ;;  %v727_v17 = vadd.f32 1.0, %v1109_v56  ;;  %1136 = vpow2.f32 %v1001_v47  ;;  %v568_v47 = vmul.f32 %v1241_v39, %v1805_v46  ;;  %v824_v56 = vmul.f32 %v1243_v0, %v1805_v46 }
 0x232   :  { %v1113_v55 = vpop.eup %1112  ;;  %v720_v41 = vadd.f32 1.0, %v1111_v1  ;;  %1138 = vpow2.f32 %v1033_v2  ;;  %v1244_v1 = vld [vmem:[%s2175_s0 + $0xf8] sm:$0xff]  ;;  %v1010_v46 = vmul.f32 -1.442695, %v1944_v9 }
 0x233   :  { %v1115_v35 = vpop.eup %1114  ;;  %v896_v16 = vadd.f32 1.0, %v1113_v55  ;;  %1140 = vrcp.f32 %v727_v17  ;;  %v831_v23 = vmul.f32 %v1244_v1, %v1803_v21  ;;  %v654_v17 = vpop.permute.xlu0 %653  ;;  %v1976_v27 = vadd.f32 %v619_v31, %v568_v47  ;;  %v1247_v47 = vld [vmem:[%s2175_s0 + $0x60] sm:$0xff] }
 0x234   :  { %v1117_v10 = vpop.eup %1116  ;;  %1142 = vrcp.f32 %v720_v41  ;;  %v903_v6 = vadd.f32 1.0, %v1115_v35  ;;  %v629_v55 = vpop.permute.xlu1 %628  ;;  %v1983_v35 = vadd.f32 %v824_v56, %v619_v31  ;;  %v570_v31 = vmul.f32 %v1245_v19, %v1811_v3 }
 0x235   :  { %v1119_v20 = vpop.eup %1118  ;;  %v769_v15 = vmul.f32 %v1117_v10, %v1813_v38  ;;  %1144 = vrcp.f32 %v896_v16  ;;  %v1003_v38 = vmul.f32 -1.442695, %v1924_v14  ;;  %v1986_v10 = vadd.f32 %v654_v17, %v575_v50  ;;  %v1248_v50 = vld [vmem:[%s2175_s0 + $0xe0] sm:$0xff] }
 0x236   :  { %v1121_v43 = vpop.eup %1120  ;;  %v945_v52 = vmul.f32 %v1119_v20, %v1815_v45  ;;  %1146 = vrcp.f32 %v903_v6  ;;  %v1035_v45 = vmul.f32 -1.442695, %v1927_v4  ;;  %v1989_v30 = vadd.f32 %v831_v23, %v654_v17 }
 0x237   :  { %v1123_v22 = vpop.eup %1122  ;;  %785 = vst.msk [vmem:[%s2178_s3 + $0x8] sm:$0xff] %vm30_vm0, %v769_v15  ;;  %v722_v40 = vadd.f32 1.0, %v1121_v43  ;;  %1148 = vpow2.f32 %v1008_v7  ;;  %v1005_v37 = vmul.f32 -1.442695, %v1976_v27  ;;  %v1246_v15 = vld [vmem:[%s2175_s0 + $0xd0] sm:$0xff] }
 0x238   :  { %v1125_v54 = vpop.eup %1124  ;;  %1046 = vst.msk [vmem:[%s2178_s3 + $0x88] sm:$0xff] %vm30_vm0, %v945_v52  ;;  %v898_v42 = vadd.f32 1.0, %v1123_v22  ;;  %1150 = vpow2.f32 %v1040_v48  ;;  %v826_v43 = vmul.f32 %v1246_v15, %v1811_v3  ;;  %v1037_v25 = vmul.f32 -1.442695, %v1983_v35  ;;  %v639_v52 = vpop.permute.xlu1 %638 }
 0x239   :  { %v1127_v12 = vpop.eup %1126  ;;  %v771_v34 = vmul.f32 %v1125_v54, %v1825_v11  ;;  %1152 = vrcp.f32 %v722_v40  ;;  %v2011_v54 = vadd.f32 %v629_v55, %v570_v31 }
 0x23a   :  { %v1129_v2 = vpop.eup %1128  ;;  %v947_v28 = vmul.f32 %v1127_v12, %v1827_v62  ;;  %1154 = vrcp.f32 %v898_v42  ;;  %v1042_v62 = vmul.f32 -1.442695, %v1951_v61  ;;  %v2015_v12 = vadd.f32 %v826_v43, %v629_v55 }
 0x23b   :  { %v1131_v11 = vpop.eup %1130  ;;  %787 = vst.msk [vmem:[%s2178_s3 + $0x18] sm:$0xff] %vm30_vm0, %v771_v34  ;;  %v729_v29 = vadd.f32 1.0, %v1129_v2  ;;  %1156 = vpow2.f32 %v1003_v38  ;;  %v1012_v38 = vmul.f32 -1.442695, %v1986_v10  ;;  %v828_v34 = vmul.f32 %v1248_v50, %v1823_v32 }
 0x23c   :  { %v1133_v41 = vpop.eup %1132  ;;  %1048 = vst.msk [vmem:[%s2178_s3 + $0x98] sm:$0xff] %vm30_vm0, %v947_v28  ;;  %v905_v21 = vadd.f32 1.0, %v1131_v11  ;;  %1158 = vpow2.f32 %v1035_v45  ;;  %v1044_v45 = vmul.f32 -1.442695, %v1989_v30  ;;  %v1007_v56 = vmul.f32 -1.442695, %v2011_v54  ;;  %v649_v17 = vpop.permute.xlu1 %648 }
 0x23d   :  { %v1135_v16 = vpop.eup %1134  ;;  %v773_v7 = vmul.f32 %v1133_v41, %v1837_v8  ;;  %1160 = vrcp.f32 %v729_v29  ;;  %v1039_v23 = vmul.f32 -1.442695, %v2015_v12  ;;  %v2047_v28 = vadd.f32 %v828_v34, %v639_v52  ;;  %v1249_v11 = vld [vmem:[%s2175_s0 + $0x70] sm:$0xff] }
 0x23e   :  { %v1137_v6 = vpop.eup %1136  ;;  %v949_v48 = vmul.f32 %v1135_v16, %v1839_v59  ;;  %1162 = vrcp.f32 %v905_v21  ;;  %v574_v29 = vmul.f32 %v1249_v11, %v1835_v5  ;;  %v1250_v21 = vld [vmem:[%s2175_s0 + $0xf0] sm:$0xff] }
 0x23f   :  { %v1139_v20 = vpop.eup %1138  ;;  %789 = vst.msk [vmem:[%s2178_s3 + $0x28] sm:$0xff] %vm30_vm0, %v773_v7  ;;  %v724_v8 = vadd.f32 1.0, %v1137_v6  ;;  %1164 = vpow2.f32 %v1010_v46 }
 0x240   :  { %v1141_v59 = vpop.eup %1140  ;;  %1050 = vst.msk [vmem:[%s2178_s3 + $0xa8] sm:$0xff] %vm30_vm0, %v949_v48  ;;  %v900_v36 = vadd.f32 1.0, %v1139_v20  ;;  %1166 = vpow2.f32 %v1042_v62  ;;  %v830_v62 = vmul.f32 %v1250_v21, %v1835_v5  ;;  %v2064_v48 = vadd.f32 %v649_v17, %v574_v29 }
 0x241   :  { %v1143_v22 = vpop.eup %1142  ;;  %v775_v40 = vmul.f32 %v1141_v59, %v1853_v51  ;;  %1168 = vrcp.f32 %v724_v8  ;;  %v572_v51 = vmul.f32 %v1247_v47, %v1823_v32 }
 0x242   :  { %v1145_v42 = vpop.eup %1144  ;;  %v768_v3 = vmul.f32 %v1143_v22, %v1857_v63  ;;  %1170 = vrcp.f32 %v900_v36  ;;  %v2071_v19 = vadd.f32 %v830_v62, %v649_v17  ;;  %v1011_v36 = vmul.f32 -1.442695, %v2064_v48 }
 0x243   :  { %v1147_v39 = vpop.eup %1146  ;;  %v944_v13 = vmul.f32 %v1145_v42, %v1859_v53  ;;  %791 = vst.msk [vmem:[%s2178_s3 + $0x38] sm:$0xff] %vm30_vm0, %v775_v40  ;;  %1172 = vpow2.f32 %v1005_v37  ;;  %v2040_v1 = vadd.f32 %v639_v52, %v572_v51 }
 0x244   :  { %v1149_v63 = vpop.eup %1148  ;;  %784 = vst.msk [vmem:[%s2178_s3] sm:$0xff] %vm30_vm0, %v768_v3  ;;  %v951_v53 = vmul.f32 %v1147_v39, %v1855_v44  ;;  %1174 = vpow2.f32 %v1037_v25 }
 0x245   :  { %v1151_v2 = vpop.eup %1150  ;;  %1045 = vst.msk [vmem:[%s2178_s3 + $0x80] sm:$0xff] %vm30_vm0, %v944_v13  ;;  %v731_v0 = vadd.f32 1.0, %v1149_v63  ;;  %1176 = vpow2.f32 %v1012_v38 }
 0x246   :  { %v1153_v32 = vpop.eup %1152  ;;  %1052 = vst.msk [vmem:[%s2178_s3 + $0xb8] sm:$0xff] %vm30_vm0, %v951_v53  ;;  %v907_v44 = vadd.f32 1.0, %v1151_v2  ;;  %1178 = vpow2.f32 %v1044_v45 }
 0x247   :  { %v1155_v55 = vpop.eup %1154  ;;  %v770_v46 = vmul.f32 %v1153_v32, %v1877_v33  ;;  %1180 = vrcp.f32 %v731_v0  ;;  %v1009_v33 = vmul.f32 -1.442695, %v2040_v1 }
 0x248   :  { %v1157_v41 = vpop.eup %1156  ;;  %v946_v16 = vmul.f32 %v1155_v55, %v1879_v24  ;;  %1182 = vrcp.f32 %v907_v44  ;;  %v1041_v24 = vmul.f32 -1.442695, %v2047_v28 }
 0x249   :  { %v1159_v7 = vpop.eup %1158  ;;  %786 = vst.msk [vmem:[%s2178_s3 + $0x10] sm:$0xff] %vm30_vm0, %v770_v46  ;;  %v726_v6 = vadd.f32 1.0, %v1157_v41  ;;  %1184 = vpow2.f32 %v1007_v56 }
 0x24a   :  { %v1161_v20 = vpop.eup %1160  ;;  %1047 = vst.msk [vmem:[%s2178_s3 + $0x90] sm:$0xff] %vm30_vm0, %v946_v16  ;;  %v902_v5 = vadd.f32 1.0, %v1159_v7  ;;  %1186 = vpow2.f32 %v1039_v23 }
 0x24b   :  { %v1163_v31 = vpop.eup %1162  ;;  %v777_v8 = vmul.f32 %v1161_v20, %v1881_v58  ;;  %1188 = vrcp.f32 %v726_v6 }
 0x24c   :  { %v1165_v37 = vpop.eup %1164  ;;  %v953_v59 = vmul.f32 %v1163_v31, %v1883_v60  ;;  %1190 = vrcp.f32 %v902_v5  ;;  %v1043_v60 = vmul.f32 -1.442695, %v2071_v19 }
 0x24d   :  { %v1167_v15 = vpop.eup %1166  ;;  %793 = vst.msk [vmem:[%s2178_s3 + $0x48] sm:$0xff] %vm30_vm0, %v777_v8  ;;  %v733_v43 = vadd.f32 1.0, %v1165_v37  ;;  %1192 = vpow2.f32 %v1009_v33 }
 0x24e   :  { %v1169_v25 = vpop.eup %1168  ;;  %1054 = vst.msk [vmem:[%s2178_s3 + $0xc8] sm:$0xff] %vm30_vm0, %v953_v59  ;;  %v909_v58 = vadd.f32 1.0, %v1167_v15  ;;  %1194 = vpow2.f32 %v1041_v24 }
 0x24f   :  { %v1171_v52 = vpop.eup %1170  ;;  %v772_v22 = vmul.f32 %v1169_v25, %v1896_v49  ;;  %1196 = vrcp.f32 %v733_v43 }
 0x250   :  { %v1173_v40 = vpop.eup %1172  ;;  %v948_v38 = vmul.f32 %v1171_v52, %v1899_v26  ;;  %1198 = vrcp.f32 %v909_v58 }
 0x251   :  { %v1175_v42 = vpop.eup %1174  ;;  %788 = vst.msk [vmem:[%s2178_s3 + $0x20] sm:$0xff] %vm30_vm0, %v772_v22  ;;  %v728_v3 = vadd.f32 1.0, %v1173_v40  ;;  %1200 = vpow2.f32 %v1011_v36 }
 0x252   :  { %v1177_v45 = vpop.eup %1176  ;;  %1049 = vst.msk [vmem:[%s2178_s3 + $0xa0] sm:$0xff] %vm30_vm0, %v948_v38  ;;  %v904_v49 = vadd.f32 1.0, %v1175_v42  ;;  %1202 = vpow2.f32 %v1043_v60 }
 0x253   :  { %v1179_v39 = vpop.eup %1178  ;;  %1204 = vrcp.f32 %v728_v3  ;;  %v735_v26 = vadd.f32 1.0, %v1177_v45 }
 0x254   :  { %v1181_v47 = vpop.eup %1180  ;;  %1206 = vrcp.f32 %v904_v49  ;;  %v911_v51 = vadd.f32 1.0, %v1179_v39 }
 0x255   :  { %v1183_v13 = vpop.eup %1182  ;;  %v779_v63 = vmul.f32 %v1181_v47, %v1911_v18  ;;  %1208 = vrcp.f32 %v735_v26 }
 0x256   :  { %v1185_v50 = vpop.eup %1184  ;;  %v955_v34 = vmul.f32 %v1183_v13, %v1913_v57  ;;  %1210 = vrcp.f32 %v911_v51 }
 0x257   :  { %v1187_v53 = vpop.eup %1186  ;;  %795 = vst.msk [vmem:[%s2178_s3 + $0x58] sm:$0xff] %vm30_vm0, %v779_v63  ;;  %v730_v2 = vadd.f32 1.0, %v1185_v50 }
 0x258   :  { %v1189_v0 = vpop.eup %1188  ;;  %1056 = vst.msk [vmem:[%s2178_s3 + $0xd8] sm:$0xff] %vm30_vm0, %v955_v34  ;;  %v906_v56 = vadd.f32 1.0, %v1187_v53 }
 0x259   :  { %v1191_v18 = vpop.eup %1190  ;;  %v774_v32 = vmul.f32 %v1189_v0, %v1924_v14  ;;  %1212 = vrcp.f32 %v730_v2 }
 0x25a   :  { %v1193_v57 = vpop.eup %1192  ;;  %v950_v44 = vmul.f32 %v1191_v18, %v1927_v4  ;;  %1214 = vrcp.f32 %v906_v56 }
 0x25b   :  { %v1195_v23 = vpop.eup %1194  ;;  %790 = vst.msk [vmem:[%s2178_s3 + $0x30] sm:$0xff] %vm30_vm0, %v774_v32  ;;  %v732_v17 = vadd.f32 1.0, %v1193_v57 }
 0x25c   :  { %v1197_v55 = vpop.eup %1196  ;;  %1051 = vst.msk [vmem:[%s2178_s3 + $0xb0] sm:$0xff] %vm30_vm0, %v950_v44  ;;  %v908_v11 = vadd.f32 1.0, %v1195_v23 }
 0x25d   :  { %v1199_v14 = vpop.eup %1198  ;;  %v781_v29 = vmul.f32 %v1197_v55, %v1944_v9  ;;  %1216 = vrcp.f32 %v732_v17 }
 0x25e   :  { %v1201_v4 = vpop.eup %1200  ;;  %v957_v46 = vmul.f32 %v1199_v14, %v1951_v61  ;;  %1218 = vrcp.f32 %v908_v11 }
 0x25f   :  { %v1203_v41 = vpop.eup %1202  ;;  %797 = vst.msk [vmem:[%s2178_s3 + $0x68] sm:$0xff] %vm30_vm0, %v781_v29  ;;  %v734_v21 = vadd.f32 1.0, %v1201_v4 }
 0x260   :  { %v1205_v62 = vpop.eup %1204  ;;  %1058 = vst.msk [vmem:[%s2178_s3 + $0xe8] sm:$0xff] %vm30_vm0, %v957_v46  ;;  %v910_v16 = vadd.f32 1.0, %v1203_v41 }
 0x261   :  { %v1207_v9 = vpop.eup %1206  ;;  %v776_v7 = vmul.f32 %v1205_v62, %v1976_v27  ;;  %1220 = vrcp.f32 %v734_v21 }
 0x262   :  { %v1209_v61 = vpop.eup %1208  ;;  %v952_v6 = vmul.f32 %v1207_v9, %v1983_v35  ;;  %1222 = vrcp.f32 %v910_v16 }
 0x263   :  { %v1211_v33 = vpop.eup %1210  ;;  %792 = vst.msk [vmem:[%s2178_s3 + $0x40] sm:$0xff] %vm30_vm0, %v776_v7  ;;  %v783_v20 = vmul.f32 %v1209_v61, %v1986_v10 }
 0x264   :  { %1053 = vst.msk [vmem:[%s2178_s3 + $0xc0] sm:$0xff] %vm30_vm0, %v952_v6  ;;  %v959_v27 = vmul.f32 %v1211_v33, %v1989_v30 }
 0x265   :  { %799 = vst.msk [vmem:[%s2178_s3 + $0x78] sm:$0xff] %vm30_vm0, %v783_v20 }
 0x266   :  { %v1213_v35 = vpop.eup %1212  ;;  %1060 = vst.msk [vmem:[%s2178_s3 + $0xf8] sm:$0xff] %vm30_vm0, %v959_v27 }
 0x267   :  { %v1215_v5 = vpop.eup %1214  ;;  %v778_v10 = vmul.f32 %v1213_v35, %v2011_v54 }
 0x268   :  { %v954_v24 = vmul.f32 %v1215_v5, %v2015_v12 }
 0x269   :  { %794 = vst.msk [vmem:[%s2178_s3 + $0x50] sm:$0xff] %vm30_vm0, %v778_v10 }
 0x26a   :  { %v1217_v30 = vpop.eup %1216  ;;  %1055 = vst.msk [vmem:[%s2178_s3 + $0xd0] sm:$0xff] %vm30_vm0, %v954_v24 }
 0x26b   :  { %v1219_v31 = vpop.eup %1218  ;;  %v780_v8 = vmul.f32 %v1217_v30, %v2040_v1 }
 0x26c   :  { %v956_v37 = vmul.f32 %v1219_v31, %v2047_v28 }
 0x26d   :  { %796 = vst.msk [vmem:[%s2178_s3 + $0x60] sm:$0xff] %vm30_vm0, %v780_v8 }
 0x26e   :  { %v1221_v54 = vpop.eup %1220  ;;  %1057 = vst.msk [vmem:[%s2178_s3 + $0xe0] sm:$0xff] %vm30_vm0, %v956_v37 }
 0x26f   :  { %v1223_v12 = vpop.eup %1222  ;;  %v782_v59 = vmul.f32 %v1221_v54, %v2064_v48 }
 0x270   :  { %v958_v15 = vmul.f32 %v1223_v12, %v2071_v19 }
 0x271   :  { %798 = vst.msk [vmem:[%s2178_s3 + $0x70] sm:$0xff] %vm30_vm0, %v782_v59 }
 0x272   :  { %1059 = vst.msk [vmem:[%s2178_s3 + $0xf0] sm:$0xff] %vm30_vm0, %v958_v15 }

// kernel: image_decoder_conv_forward.7
= control target key start
LH: loop header
LB: loop body
LE: loop exit
PB: predicated region body
PF: predicated region fallthrough
CT: control target
= control target key end

     0   :  { %s1572_s0 = inlined_call_operand.vmem [shape: f32[2,64,256], index: 0, kind: input, shape index: {}]   ;;  %s1573_s1 = inlined_call_operand.vmem [shape: f32[64,1], index: 1, kind: input, shape index: {}]   ;;  %s1574_s2 = inlined_call_operand.vmem [shape: f32[64,1], index: 2, kind: input, shape index: {}]   ;;  %s1575_s3 = inlined_call_operand.vmem [shape: f32[2,64,256], index: 3, kind: output, shape index: {}]  }
   0x1   :  { %v967_v0 = vld [vmem:[%s1572_s0 + $0x20] sm:$0xff]  ;;  %v972_v1 = vld [vmem:[%s1572_s0 + $0x28] sm:$0xff]  ;;  %v989_v5 = vld [vmem:[%s1572_s0 + $0x30] sm:$0xff] }
   0x2   :  { %v977_v2 = vld [vmem:[%s1572_s0] sm:$0xff]  ;;  %v36_v3 = vadd.f32 %v972_v1, %v967_v0  ;;  %v984_v4 = vld [vmem:[%s1572_s0 + $0x8] sm:$0xff]  ;;  %v994_v6 = vld [vmem:[%s1572_s0 + $0x38] sm:$0xff] }
   0x3   :  { %v30_v7 = vadd.f32 %v984_v4, %v977_v2  ;;  %v1001_v8 = vld [vmem:[%s1572_s0 + $0x10] sm:$0xff]  ;;  %v1006_v9 = vld [vmem:[%s1572_s0 + $0x18] sm:$0xff]  ;;  %v39_v10 = vadd.f32 %v994_v6, %v989_v5  ;;  %v1025_v14 = vld [vmem:[%s1572_s0 + $0x40] sm:$0xff] }
   0x4   :  { %37 = vadd.xlane.f32.xlu1 %v36_v3  ;;  %v33_v11 = vadd.f32 %v1006_v9, %v1001_v8  ;;  %v1015_v12 = vld [vmem:[%s1572_s0 + $0x50] sm:$0xff]  ;;  %v1020_v13 = vld [vmem:[%s1572_s0 + $0x58] sm:$0xff]  ;;  %v1030_v15 = vld [vmem:[%s1572_s0 + $0x48] sm:$0xff] }
   0x5   :  { %31 = vadd.xlane.f32.xlu0 %v30_v7  ;;  %v45_v16 = vadd.f32 %v1020_v13, %v1015_v12  ;;  %v42_v17 = vadd.f32 %v1030_v15, %v1025_v14  ;;  %v1039_v18 = vld [vmem:[%s1572_s0 + $0x70] sm:$0xff]  ;;  %v1044_v19 = vld [vmem:[%s1572_s0 + $0x78] sm:$0xff]  ;;  %v1049_v20 = vld [vmem:[%s1572_s0 + $0x60] sm:$0xff] }
   0x6   :  { %v1054_v21 = vld [vmem:[%s1572_s0 + $0x68] sm:$0xff]  ;;  %v51_v22 = vadd.f32 %v1044_v19, %v1039_v18  ;;  %v1063_v24 = vld [vmem:[%s1572_s0 + $0x90] sm:$0xff]  ;;  %v1068_v25 = vld [vmem:[%s1572_s0 + $0x98] sm:$0xff] }
   0x7   :  { %1579 = vst [vmem:[#allocation2_spill] sm:$0xff] %v1054_v21  ;;  %v48_v23 = vadd.f32 %v1054_v21, %v1049_v20  ;;  %v1073_v26 = vld [vmem:[%s1572_s0 + $0x80] sm:$0xff]  ;;  %v1078_v27 = vld [vmem:[%s1572_s0 + $0x88] sm:$0xff]  ;;  %v74_v28 = vadd.f32 %v1068_v25, %v1063_v24  ;;  %v1087_v30 = vld [vmem:[%s1572_s0 + $0xb0] sm:$0xff] }
   0x8   :  { %40 = vadd.xlane.f32.xlu1 %v39_v10  ;;  %v71_v29 = vadd.f32 %v1078_v27, %v1073_v26  ;;  %v1092_v31 = vld [vmem:[%s1572_s0 + $0xb8] sm:$0xff]  ;;  %v1097_v32 = vld [vmem:[%s1572_s0 + $0xa0] sm:$0xff]  ;;  %v1102_v33 = vld [vmem:[%s1572_s0 + $0xa8] sm:$0xff] }
   0x9   :  { %34 = vadd.xlane.f32.xlu0 %v33_v11  ;;  %v80_v34 = vadd.f32 %v1092_v31, %v1087_v30  ;;  %v77_v35 = vadd.f32 %v1102_v33, %v1097_v32  ;;  %v1111_v36 = vld [vmem:[%s1572_s0 + $0xd0] sm:$0xff]  ;;  %v1116_v37 = vld [vmem:[%s1572_s0 + $0xd8] sm:$0xff]  ;;  %v1121_v38 = vld [vmem:[%s1572_s0 + $0xc0] sm:$0xff] }
   0xa   :  { %v1126_v39 = vld [vmem:[%s1572_s0 + $0xc8] sm:$0xff]  ;;  %v86_v40 = vadd.f32 %v1116_v37, %v1111_v36  ;;  %v1135_v42 = vld [vmem:[%s1572_s0 + $0xf0] sm:$0xff]  ;;  %v1140_v43 = vld [vmem:[%s1572_s0 + $0xf8] sm:$0xff] }
   0xb   :  { %v83_v41 = vadd.f32 %v1126_v39, %v1121_v38  ;;  %v1145_v44 = vld [vmem:[%s1572_s0 + $0xe0] sm:$0xff]  ;;  %v1150_v45 = vld [vmem:[%s1572_s0 + $0xe8] sm:$0xff]  ;;  %v92_v46 = vadd.f32 %v1140_v43, %v1135_v42 }
   0xc   :  { %46 = vadd.xlane.f32.xlu1 %v45_v16  ;;  %1580 = vst [vmem:[#allocation3_spill] sm:$0xff] %v1145_v44  ;;  %1581 = vst [vmem:[#allocation4_spill] sm:$0xff] %v1150_v45  ;;  %v89_v47 = vadd.f32 %v1150_v45, %v1145_v44 }
   0xd   :  { %43 = vadd.xlane.f32.xlu0 %v42_v17 }
  0x10   :  { %52 = vadd.xlane.f32.xlu1 %v51_v22 }
  0x11   :  { %49 = vadd.xlane.f32.xlu0 %v48_v23 }
  0x14   :  { %75 = vadd.xlane.f32.xlu1 %v74_v28 }
  0x15   :  { %72 = vadd.xlane.f32.xlu0 %v71_v29 }
  0x18   :  { %81 = vadd.xlane.f32.xlu1 %v80_v34 }
  0x19   :  { %78 = vadd.xlane.f32.xlu0 %v77_v35 }
  0x1c   :  { %87 = vadd.xlane.f32.xlu1 %v86_v40 }
  0x1d   :  { %84 = vadd.xlane.f32.xlu0 %v83_v41 }
  0x20   :  { %93 = vadd.xlane.f32.xlu1 %v92_v46 }
  0x21   :  { %90 = vadd.xlane.f32.xlu0 %v89_v47 }
  0x8d   :  { %v38_v48 = vpop.xlane.xlu1 %37 }
  0x8e   :  { %v32_v49 = vpop.xlane.xlu0 %31 }
  0x91   :  { %v41_v50 = vpop.xlane.xlu1 %40 }
  0x92   :  { %v35_v51 = vpop.xlane.xlu0 %34 }
  0x95   :  { %v47_v52 = vpop.xlane.xlu1 %46 }
  0x96   :  { %v44_v53 = vpop.xlane.xlu0 %43 }
  0x99   :  { %v53_v54 = vpop.xlane.xlu1 %52 }
  0x9a   :  { %v50_v55 = vpop.xlane.xlu0 %49 }
  0x9d   :  { %v76_v56 = vpop.xlane.xlu1 %75 }
  0x9e   :  { %v96_v57 = vadd.f32 %v76_v56, %v35_v51  ;;  %v73_v58 = vpop.xlane.xlu0 %72 }
  0x9f   :  { %v95_v59 = vadd.f32 %v73_v58, %v32_v49 }
  0xa0   :  { %v1156_v60 = vmul.f32 0.001953125, %v96_v57 }
  0xa1   :  { %v1158_v61 = vmul.f32 0.001953125, %v95_v59  ;;  %v82_v62 = vpop.xlane.xlu1 %81 }
  0xa2   :  { %v98_v63 = vadd.f32 %v82_v62, %v41_v50  ;;  %v79_v3 = vpop.xlane.xlu0 %78  ;;  %v113_v7 = vsub.f32 %v1001_v8, %v1156_v60  ;;  %v114_v10 = vsub.f32 %v1006_v9, %v1156_v60 }
  0xa3   :  { %v97_v11 = vadd.f32 %v79_v3, %v38_v48  ;;  %v111_v16 = vsub.f32 %v977_v2, %v1158_v61  ;;  %v112_v17 = vsub.f32 %v984_v4, %v1158_v61 }
  0xa4   :  { %v1168_v22 = vmul.f32 0.001953125, %v98_v63  ;;  %v129_v23 = vmul.f32 %v113_v7, %v113_v7  ;;  %v130_v28 = vmul.f32 %v114_v10, %v114_v10 }
  0xa5   :  { %v1170_v29 = vmul.f32 0.001953125, %v97_v11  ;;  %v88_v34 = vpop.xlane.xlu1 %87  ;;  %v127_v35 = vmul.f32 %v111_v16, %v111_v16  ;;  %v128_v40 = vmul.f32 %v112_v17, %v112_v17 }
  0xa6   :  { %v100_v41 = vadd.f32 %v88_v34, %v47_v52  ;;  %v85_v46 = vpop.xlane.xlu0 %84  ;;  %v146_v47 = vadd.f32 %v130_v28, %v129_v23  ;;  %v117_v48 = vsub.f32 %v989_v5, %v1168_v22  ;;  %v118_v49 = vsub.f32 %v994_v6, %v1168_v22 }
  0xa7   :  { %v99_v50 = vadd.f32 %v85_v46, %v44_v53  ;;  %v143_v51 = vadd.f32 %v128_v40, %v127_v35  ;;  %v115_v56 = vsub.f32 %v967_v0, %v1170_v29  ;;  %v116_v57 = vsub.f32 %v972_v1, %v1170_v29 }
  0xa8   :  { %v1180_v58 = vmul.f32 0.001953125, %v100_v41  ;;  %147 = vadd.xlane.f32.xlu1 %v146_v47  ;;  %v133_v52 = vmul.f32 %v117_v48, %v117_v48  ;;  %v134_v59 = vmul.f32 %v118_v49, %v118_v49  ;;  %v169_v46 = vsub.f32 %v1063_v24, %v1156_v60 }
  0xa9   :  { %v1182_v62 = vmul.f32 0.001953125, %v99_v50  ;;  %144 = vadd.xlane.f32.xlu0 %v143_v51  ;;  %v94_v63 = vpop.xlane.xlu1 %93  ;;  %v131_v3 = vmul.f32 %v115_v56, %v115_v56  ;;  %v132_v7 = vmul.f32 %v116_v57, %v116_v57  ;;  %v170_v49 = vsub.f32 %v1068_v25, %v1156_v60 }
  0xaa   :  { %v102_v10 = vadd.f32 %v94_v63, %v53_v54  ;;  %v91_v53 = vpop.xlane.xlu0 %90  ;;  %v152_v11 = vadd.f32 %v134_v59, %v133_v52  ;;  %v121_v16 = vsub.f32 %v1015_v12, %v1180_v58  ;;  %v122_v17 = vsub.f32 %v1020_v13, %v1180_v58 }
  0xab   :  { %v101_v23 = vadd.f32 %v91_v53, %v50_v55  ;;  %v149_v28 = vadd.f32 %v132_v7, %v131_v3  ;;  %v119_v34 = vsub.f32 %v1025_v14, %v1182_v62  ;;  %v120_v35 = vsub.f32 %v1030_v15, %v1182_v62 }
  0xac   :  { %v1192_v40 = vmul.f32 0.001953125, %v102_v10  ;;  %153 = vadd.xlane.f32.xlu1 %v152_v11  ;;  %v137_v54 = vmul.f32 %v121_v16, %v121_v16  ;;  %v138_v41 = vmul.f32 %v122_v17, %v122_v17  ;;  %v167_v57 = vsub.f32 %v1073_v26, %v1158_v61 }
  0xad   :  { %v1196_v47 = vmul.f32 0.001953125, %v101_v23  ;;  %150 = vadd.xlane.f32.xlu0 %v149_v28  ;;  %v135_v48 = vmul.f32 %v119_v34, %v119_v34  ;;  %v136_v55 = vmul.f32 %v120_v35, %v120_v35  ;;  %v168_v3 = vsub.f32 %v1078_v27, %v1158_v61 }
  0xae   :  { %v158_v50 = vadd.f32 %v138_v41, %v137_v54  ;;  %v125_v51 = vsub.f32 %v1039_v18, %v1192_v40  ;;  %v126_v56 = vsub.f32 %v1044_v19, %v1192_v40  ;;  %v173_v16 = vsub.f32 %v1087_v30, %v1168_v22 }
  0xaf   :  { %v155_v52 = vadd.f32 %v136_v55, %v135_v48  ;;  %v123_v59 = vsub.f32 %v1049_v20, %v1196_v47  ;;  %v124_v63 = vsub.f32 %v1054_v21, %v1196_v47  ;;  %v174_v17 = vsub.f32 %v1092_v31, %v1168_v22 }
  0xb0   :  { %159 = vadd.xlane.f32.xlu1 %v158_v50  ;;  %v141_v7 = vmul.f32 %v125_v51, %v125_v51  ;;  %v142_v10 = vmul.f32 %v126_v56, %v126_v56  ;;  %v185_v28 = vmul.f32 %v169_v46, %v169_v46  ;;  %v186_v34 = vmul.f32 %v170_v49, %v170_v49 }
  0xb1   :  { %156 = vadd.xlane.f32.xlu0 %v155_v52  ;;  %v139_v53 = vmul.f32 %v123_v59, %v123_v59  ;;  %v140_v11 = vmul.f32 %v124_v63, %v124_v63  ;;  %v183_v35 = vmul.f32 %v167_v57, %v167_v57  ;;  %v184_v41 = vmul.f32 %v168_v3, %v168_v3 }
  0xb2   :  { %v164_v23 = vadd.f32 %v142_v10, %v141_v7  ;;  %v171_v48 = vsub.f32 %v1097_v32, %v1170_v29  ;;  %v172_v55 = vsub.f32 %v1102_v33, %v1170_v29  ;;  %v189_v50 = vmul.f32 %v173_v16, %v173_v16 }
  0xb3   :  { %v161_v54 = vadd.f32 %v140_v11, %v139_v53  ;;  %v190_v51 = vmul.f32 %v174_v17, %v174_v17  ;;  %v177_v56 = vsub.f32 %v1111_v36, %v1180_v58  ;;  %v202_v52 = vadd.f32 %v186_v34, %v185_v28 }
  0xb4   :  { %165 = vadd.xlane.f32.xlu1 %v164_v23  ;;  %v178_v46 = vsub.f32 %v1116_v37, %v1180_v58  ;;  %v175_v49 = vsub.f32 %v1121_v38, %v1182_v62  ;;  %v199_v57 = vadd.f32 %v184_v41, %v183_v35  ;;  %v187_v59 = vmul.f32 %v171_v48, %v171_v48 }
  0xb5   :  { %162 = vadd.xlane.f32.xlu0 %v161_v54  ;;  %v188_v63 = vmul.f32 %v172_v55, %v172_v55  ;;  %v176_v3 = vsub.f32 %v1126_v39, %v1182_v62  ;;  %v208_v7 = vadd.f32 %v190_v51, %v189_v50  ;;  %v193_v10 = vmul.f32 %v177_v56, %v177_v56 }
  0xb6   :  { %v194_v53 = vmul.f32 %v178_v46, %v178_v46  ;;  %v191_v11 = vmul.f32 %v175_v49, %v175_v49  ;;  %v181_v16 = vsub.f32 %v1135_v42, %v1192_v40  ;;  %v182_v17 = vsub.f32 %v1140_v43, %v1192_v40 }
  0xb7   :  { %v205_v23 = vadd.f32 %v188_v63, %v187_v59  ;;  %v192_v28 = vmul.f32 %v176_v3, %v176_v3  ;;  %v179_v34 = vsub.f32 %v1145_v44, %v1196_v47  ;;  %v180_v35 = vsub.f32 %v1150_v45, %v1196_v47 }
  0xb8   :  { %203 = vadd.xlane.f32.xlu1 %v202_v52  ;;  %v214_v54 = vadd.f32 %v194_v53, %v193_v10  ;;  %v197_v41 = vmul.f32 %v181_v16, %v181_v16  ;;  %v198_v48 = vmul.f32 %v182_v17, %v182_v17  ;;  %v943_v46 = vmov 0  }
  0xb9   :  { %200 = vadd.xlane.f32.xlu0 %v199_v57  ;;  %v211_v55 = vadd.f32 %v192_v28, %v191_v11  ;;  %v195_v50 = vmul.f32 %v179_v34, %v179_v34  ;;  %v196_v51 = vmul.f32 %v180_v35, %v180_v35  ;;  %798 = vset.pattern.permute.xlu1 %v943_v46 }
  0xba   :  { %v220_v56 = vadd.f32 %v198_v48, %v197_v41  ;;  %797 = vset.pattern.permute.xlu0 %v943_v46 }
  0xbb   :  { %v217_v52 = vadd.f32 %v196_v51, %v195_v50 }
  0xbc   :  { %209 = vadd.xlane.f32.xlu1 %v208_v7 }
  0xbd   :  { %206 = vadd.xlane.f32.xlu0 %v205_v23 }
  0xc0   :  { %215 = vadd.xlane.f32.xlu1 %v214_v54 }
  0xc1   :  { %212 = vadd.xlane.f32.xlu0 %v211_v55 }
  0xc4   :  { %221 = vadd.xlane.f32.xlu1 %v220_v56 }
  0xc5   :  { %218 = vadd.xlane.f32.xlu0 %v217_v52 }
 0x131   :  { %v148_v49 = vpop.xlane.xlu1 %147 }
 0x132   :  { %v145_v57 = vpop.xlane.xlu0 %144 }
 0x135   :  { %v154_v59 = vpop.xlane.xlu1 %153 }
 0x136   :  { %v151_v63 = vpop.xlane.xlu0 %150 }
 0x139   :  { %v160_v3 = vpop.xlane.xlu1 %159 }
 0x13a   :  { %v157_v7 = vpop.xlane.xlu0 %156 }
 0x13d   :  { %v166_v10 = vpop.xlane.xlu1 %165 }
 0x13e   :  { %v163_v53 = vpop.xlane.xlu0 %162 }
 0x141   :  { %v204_v11 = vpop.xlane.xlu1 %203 }
 0x142   :  { %v224_v16 = vadd.f32 %v204_v11, %v148_v49  ;;  %v201_v17 = vpop.xlane.xlu0 %200 }
 0x143   :  { %v223_v23 = vadd.f32 %v201_v17, %v145_v57 }
 0x144   :  { %v232_v28 = vmul.f32 0.001953125, %v224_v16 }
 0x145   :  { %v231_v34 = vmul.f32 0.001953125, %v223_v23  ;;  %v210_v35 = vpop.xlane.xlu1 %209 }
 0x146   :  { %v248_v54 = vadd.f32 1e-05, %v232_v28  ;;  %v226_v41 = vadd.f32 %v210_v35, %v154_v59  ;;  %v207_v48 = vpop.xlane.xlu0 %206 }
 0x147   :  { %v247_v55 = vadd.f32 1e-05, %v231_v34  ;;  %v225_v50 = vadd.f32 %v207_v48, %v151_v63  ;;  %v242_v48 = vld [vmem:[%s1573_s1 + $0x18] sm:$0xff] }
 0x148   :  { %799 = vrsqrt.f32 %v248_v54  ;;  %v234_v51 = vmul.f32 0.001953125, %v226_v41 }
 0x149   :  { %801 = vrsqrt.f32 %v247_v55  ;;  %v233_v56 = vmul.f32 0.001953125, %v225_v50  ;;  %v216_v52 = vpop.xlane.xlu1 %215  ;;  %v241_v50 = vld [vmem:[%s1573_s1 + $0x10] sm:$0xff] }
 0x14a   :  { %v250_v46 = vadd.f32 1e-05, %v234_v51  ;;  %v228_v45 = vadd.f32 %v216_v52, %v160_v3  ;;  %v213_v44 = vpop.xlane.xlu0 %212  ;;  %v240_v3 = vld [vmem:[%s1573_s1 + $0x8] sm:$0xff] }
 0x14b   :  { %v249_v21 = vadd.f32 1e-05, %v233_v56  ;;  %v227_v49 = vadd.f32 %v213_v44, %v157_v7 }
 0x14c   :  { %803 = vrsqrt.f32 %v250_v46  ;;  %v236_v57 = vmul.f32 0.001953125, %v228_v45 }
 0x14d   :  { %805 = vrsqrt.f32 %v249_v21  ;;  %v235_v11 = vmul.f32 0.001953125, %v227_v49  ;;  %v222_v16 = vpop.xlane.xlu1 %221  ;;  %v239_v21 = vld [vmem:[%s1573_s1] sm:$0xff] }
 0x14e   :  { %v252_v17 = vadd.f32 1e-05, %v236_v57  ;;  %v230_v59 = vadd.f32 %v222_v16, %v166_v10  ;;  %v219_v23 = vpop.xlane.xlu0 %218  ;;  %v274_v57 = vld [vmem:[%s1574_s2 + $0x18] sm:$0xff] }
 0x14f   :  { %v251_v28 = vadd.f32 1e-05, %v235_v11  ;;  %v229_v63 = vadd.f32 %v219_v23, %v163_v53  ;;  %v272_v53 = vld [vmem:[%s1574_s2 + $0x8] sm:$0xff] }
 0x150   :  { %807 = vrsqrt.f32 %v252_v17  ;;  %v238_v34 = vmul.f32 0.001953125, %v230_v59  ;;  %v244_v11 = vld [vmem:[%s1573_s1 + $0x28] sm:$0xff] }
 0x151   :  { %809 = vrsqrt.f32 %v251_v28  ;;  %v237_v54 = vmul.f32 0.001953125, %v229_v63  ;;  %v276_v23 = vld [vmem:[%s1574_s2 + $0x28] sm:$0xff]  ;;  %v246_v28 = vld [vmem:[%s1573_s1 + $0x38] sm:$0xff] }
 0x152   :  { %v254_v35 = vadd.f32 1e-05, %v238_v34 }
 0x153   :  { %v253_v10 = vadd.f32 1e-05, %v237_v54 }
 0x154   :  { %811 = vrsqrt.f32 %v254_v35 }
 0x155   :  { %v800_v44 = vpop.eup %799  ;;  %813 = vrsqrt.f32 %v253_v10  ;;  %v245_v10 = vld [vmem:[%s1573_s1 + $0x30] sm:$0xff] }
 0x156   :  { %v802_v45 = vpop.eup %801  ;;  %v264_v7 = vmul.f32 %v800_v44, %v240_v3  ;;  %v278_v44 = vld [vmem:[%s1574_s2 + $0x38] sm:$0xff] }
 0x157   :  { %v263_v41 = vmul.f32 %v802_v45, %v239_v21 }
 0x158   :  { %302 = vperm.xlu1 %798, %v264_v7   ;;  %v280_v55 = vmul.f32 %v264_v7, %v1156_v60 }
 0x159   :  { %v804_v51 = vpop.eup %803  ;;  %297 = vperm.xlu0 %797, %v263_v41  }
 0x15a   :  { %v806_v56 = vpop.eup %805  ;;  %v288_v52 = vsub.f32 %v272_v53, %v280_v55  ;;  %v266_v46 = vmul.f32 %v804_v51, %v242_v48  ;;  %v279_v48 = vmul.f32 %v263_v41, %v1158_v61  ;;  %v271_v55 = vld [vmem:[%s1574_s2] sm:$0xff]  ;;  %v273_v51 = vld [vmem:[%s1574_s2 + $0x10] sm:$0xff] }
 0x15b   :  { %v265_v49 = vmul.f32 %v806_v56, %v241_v50  ;;  %v275_v61 = vld [vmem:[%s1574_s2 + $0x20] sm:$0xff] }
 0x15c   :  { %v282_v60 = vmul.f32 %v266_v46, %v1168_v22  ;;  %v243_v22 = vld [vmem:[%s1573_s1 + $0x20] sm:$0xff] }
 0x15d   :  { %v808_v16 = vpop.eup %807  ;;  %358 = vperm.xlu0 %797, %v288_v52   ;;  %307 = vperm.xlu1 %798, %v265_v49   ;;  %v281_v50 = vmul.f32 %v265_v49, %v1170_v29  ;;  %v277_v29 = vld [vmem:[%s1574_s2 + $0x30] sm:$0xff] }
 0x15e   :  { %v290_v17 = vsub.f32 %v274_v57, %v282_v60  ;;  %v268_v59 = vmul.f32 %v808_v16, %v244_v11  ;;  %v810_v63 = vpop.eup %809 }
 0x15f   :  { %v267_v21 = vmul.f32 %v810_v63, %v243_v22  ;;  %v289_v56 = vsub.f32 %v273_v51, %v281_v50 }
 0x160   :  { %v284_v34 = vmul.f32 %v268_v59, %v1180_v58 }
 0x161   :  { %v812_v35 = vpop.eup %811  ;;  %368 = vperm.xlu0 %797, %v290_v17   ;;  %312 = vperm.xlu1 %798, %v266_v46   ;;  %v283_v52 = vmul.f32 %v267_v21, %v1182_v62 }
 0x162   :  { %v292_v54 = vsub.f32 %v276_v23, %v284_v34  ;;  %v270_v3 = vmul.f32 %v812_v35, %v246_v28  ;;  %v814_v58 = vpop.eup %813 }
 0x163   :  { %v269_v53 = vmul.f32 %v814_v58, %v245_v10  ;;  %v291_v41 = vsub.f32 %v275_v61, %v283_v52 }
 0x164   :  { %v286_v45 = vmul.f32 %v270_v3, %v1192_v40  ;;  %v287_v40 = vsub.f32 %v271_v55, %v279_v48 }
 0x165   :  { %378 = vperm.xlu0 %797, %v292_v54   ;;  %317 = vperm.xlu1 %798, %v267_v21   ;;  %v285_v46 = vmul.f32 %v269_v53, %v1196_v47 }
 0x166   :  { %v294_v7 = vsub.f32 %v278_v44, %v286_v45 }
 0x167   :  { %v293_v49 = vsub.f32 %v277_v29, %v285_v46 }
 0x169   :  { %388 = vperm.xlu0 %797, %v294_v7   ;;  %322 = vperm.xlu1 %798, %v268_v59  }
 0x16d   :  { %327 = vperm.xlu1 %798, %v269_v53  }
 0x171   :  { %332 = vperm.xlu1 %798, %v270_v3  }
 0x175   :  { %353 = vperm.xlu1 %798, %v287_v40  }
 0x179   :  { %363 = vperm.xlu1 %798, %v289_v56  }
 0x17d   :  { %373 = vperm.xlu1 %798, %v291_v41  }
 0x181   :  { %383 = vperm.xlu1 %798, %v293_v49  }
 0x1d3   :  { %v303_v57 = vpop.permute.xlu1 %302 }
 0x1d4   :  { %v1292_v11 = vpop.permute.xlu0 %297  ;;  %v337_v62 = vmul.f32 %v303_v57, %v1001_v8  ;;  %v338_v60 = vmul.f32 %v303_v57, %v1006_v9  ;;  %v553_v16 = vmul.f32 %v1063_v24, %v303_v57  ;;  %v554_v17 = vmul.f32 %v1068_v25, %v303_v57 }
 0x1d8   :  { %v1298_v59 = vpop.permute.xlu1 %307  ;;  %v359_v47 = vpop.permute.xlu0 %358 }
 0x1d9   :  { %v1300_v23 = vadd.f32 %v359_v47, %v337_v62  ;;  %v1302_v28 = vadd.f32 %v359_v47, %v338_v60  ;;  %v1304_v63 = vadd.f32 %v553_v16, %v359_v47  ;;  %v1306_v34 = vadd.f32 %v554_v17, %v359_v47 }
 0x1db   :  { %v734_v22 = vmul.f32 -1.442695, %v1300_v23  ;;  %v735_v8 = vmul.f32 -1.442695, %v1302_v28  ;;  %v766_v9 = vmul.f32 -1.442695, %v1304_v63 }
 0x1dc   :  { %v313_v24 = vpop.permute.xlu1 %312  ;;  %v767_v25 = vmul.f32 -1.442695, %v1306_v34  ;;  %v369_v44 = vpop.permute.xlu0 %368 }
 0x1dd   :  { %v341_v35 = vmul.f32 %v313_v24, %v989_v5  ;;  %v342_v54 = vmul.f32 %v313_v24, %v994_v6  ;;  %v557_v3 = vmul.f32 %v1087_v30, %v313_v24  ;;  %815 = vpow2.f32 %v734_v22 }
 0x1de   :  { %v558_v21 = vmul.f32 %v1092_v31, %v313_v24  ;;  %817 = vpow2.f32 %v735_v8 }
 0x1df   :  { %v1316_v45 = vadd.f32 %v369_v44, %v341_v35  ;;  %v1318_v7 = vadd.f32 %v369_v44, %v342_v54  ;;  %v1320_v58 = vadd.f32 %v557_v3, %v369_v44  ;;  %819 = vpow2.f32 %v766_v9 }
 0x1e0   :  { %v1322_v10 = vadd.f32 %v558_v21, %v369_v44  ;;  %v1324_v53 = vpop.permute.xlu1 %317  ;;  %821 = vpow2.f32 %v767_v25  ;;  %v379_v51 = vpop.permute.xlu0 %378 }
 0x1e1   :  { %v738_v5 = vmul.f32 -1.442695, %v1316_v45  ;;  %v739_v6 = vmul.f32 -1.442695, %v1318_v7  ;;  %v770_v30 = vmul.f32 -1.442695, %v1320_v58 }
 0x1e2   :  { %v771_v31 = vmul.f32 -1.442695, %v1322_v10 }
 0x1e3   :  { %823 = vpow2.f32 %v738_v5 }
 0x1e4   :  { %825 = vpow2.f32 %v739_v6  ;;  %v323_v48 = vpop.permute.xlu1 %322  ;;  %v389_v24 = vpop.permute.xlu0 %388 }
 0x1e5   :  { %827 = vpow2.f32 %v770_v30  ;;  %v345_v55 = vmul.f32 %v323_v48, %v1015_v12  ;;  %v346_v40 = vmul.f32 %v323_v48, %v1020_v13  ;;  %v561_v50 = vmul.f32 %v1111_v36, %v323_v48 }
 0x1e6   :  { %829 = vpow2.f32 %v771_v31  ;;  %v562_v56 = vmul.f32 %v1116_v37, %v323_v48 }
 0x1e7   :  { %v1334_v52 = vadd.f32 %v379_v51, %v345_v55  ;;  %v1336_v61 = vadd.f32 %v379_v51, %v346_v40  ;;  %v1338_v41 = vadd.f32 %v561_v50, %v379_v51  ;;  %v335_v40 = vmul.f32 %v1292_v11, %v977_v2 }
 0x1e8   :  { %v1340_v46 = vadd.f32 %v562_v56, %v379_v51  ;;  %v1342_v29 = vpop.permute.xlu1 %327  ;;  %v336_v56 = vmul.f32 %v1292_v11, %v984_v4  ;;  %v552_v2 = vmul.f32 %v1078_v27, %v1292_v11  ;;  %v339_v4 = vmul.f32 %v1298_v59, %v967_v0 }
 0x1e9   :  { %v742_v12 = vmul.f32 -1.442695, %v1334_v52  ;;  %v743_v13 = vmul.f32 -1.442695, %v1336_v61  ;;  %v774_v36 = vmul.f32 -1.442695, %v1338_v41 }
 0x1ea   :  { %v816_v49 = vpop.eup %815  ;;  %v775_v62 = vmul.f32 -1.442695, %v1340_v46 }
 0x1eb   :  { %831 = vpow2.f32 %v742_v12  ;;  %v818_v57 = vpop.eup %817  ;;  %v457_v37 = vadd.f32 1.0, %v816_v49 }
 0x1ec   :  { %833 = vpow2.f32 %v743_v13  ;;  %v333_v60 = vpop.permute.xlu1 %332  ;;  %v820_v16 = vpop.eup %819  ;;  %v458_v17 = vadd.f32 1.0, %v818_v57  ;;  %v551_v13 = vmul.f32 %v1073_v26, %v1292_v11 }
 0x1ed   :  { %835 = vpow2.f32 %v774_v36  ;;  %v349_v47 = vmul.f32 %v333_v60, %v1039_v18  ;;  %v350_v22 = vmul.f32 %v333_v60, %v1044_v19  ;;  %v822_v8 = vpop.eup %821  ;;  %v633_v9 = vadd.f32 1.0, %v820_v16 }
 0x1ee   :  { %837 = vrcp.f32 %v457_v37  ;;  %v565_v25 = vmul.f32 %v1135_v42, %v333_v60  ;;  %v566_v35 = vmul.f32 %v1140_v43, %v333_v60  ;;  %v634_v54 = vadd.f32 1.0, %v822_v8 }
 0x1ef   :  { %839 = vrcp.f32 %v458_v17  ;;  %v1352_v3 = vadd.f32 %v389_v24, %v349_v47  ;;  %v1354_v44 = vadd.f32 %v389_v24, %v350_v22  ;;  %v555_v17 = vmul.f32 %v1097_v32, %v1298_v59 }
 0x1f0   :  { %v824_v21 = vpop.eup %823  ;;  %841 = vrcp.f32 %v633_v9  ;;  %v1356_v19 = vadd.f32 %v565_v25, %v389_v24  ;;  %v1358_v31 = vadd.f32 %v566_v35, %v389_v24  ;;  %v354_v42 = vpop.permute.xlu1 %353  ;;  %v556_v22 = vmul.f32 %v1102_v33, %v1298_v59 }
 0x1f1   :  { %v826_v5 = vpop.eup %825  ;;  %843 = vrcp.f32 %v634_v54  ;;  %v461_v18 = vadd.f32 1.0, %v824_v21  ;;  %v746_v55 = vmul.f32 -1.442695, %v1352_v3  ;;  %v747_v51 = vmul.f32 -1.442695, %v1354_v44 }
 0x1f2   :  { %v828_v6 = vpop.eup %827  ;;  %v462_v30 = vadd.f32 1.0, %v826_v5  ;;  %845 = vpow2.f32 %v775_v62  ;;  %v778_v12 = vmul.f32 -1.442695, %v1356_v19  ;;  %v779_v36 = vmul.f32 -1.442695, %v1358_v31 }
 0x1f3   :  { %v830_v43 = vpop.eup %829  ;;  %847 = vrcp.f32 %v461_v18  ;;  %v637_v48 = vadd.f32 1.0, %v828_v6  ;;  %v1370_v49 = vadd.f32 %v354_v42, %v335_v40  ;;  %v1374_v57 = vadd.f32 %v354_v42, %v336_v56 }
 0x1f4   :  { %849 = vrcp.f32 %v462_v30  ;;  %v638_v50 = vadd.f32 1.0, %v830_v43  ;;  %v340_v62 = vmul.f32 %v1298_v59, %v972_v1  ;;  %v1380_v26 = vadd.f32 %v551_v13, %v354_v42  ;;  %v364_v60 = vpop.permute.xlu1 %363 }
 0x1f5   :  { %851 = vrcp.f32 %v637_v48  ;;  %v1384_v27 = vadd.f32 %v552_v2, %v354_v42  ;;  %v732_v1 = vmul.f32 -1.442695, %v1370_v49  ;;  %v733_v24 = vmul.f32 -1.442695, %v1374_v57 }
 0x1f6   :  { %853 = vrcp.f32 %v638_v50  ;;  %v1390_v25 = vadd.f32 %v364_v60, %v339_v4  ;;  %v764_v54 = vmul.f32 -1.442695, %v1380_v26  ;;  %v1394_v21 = vadd.f32 %v364_v60, %v340_v62 }
 0x1f7   :  { %855 = vpow2.f32 %v746_v55  ;;  %v765_v5 = vmul.f32 -1.442695, %v1384_v27  ;;  %v1398_v18 = vadd.f32 %v555_v17, %v364_v60  ;;  %v1404_v30 = vadd.f32 %v556_v22, %v364_v60 }
 0x1f8   :  { %v832_v37 = vpop.eup %831  ;;  %857 = vpow2.f32 %v747_v51  ;;  %v736_v43 = vmul.f32 -1.442695, %v1390_v25  ;;  %v374_v40 = vpop.permute.xlu1 %373  ;;  %v343_v51 = vmul.f32 %v1324_v53, %v1025_v14  ;;  %v559_v14 = vmul.f32 %v1121_v38, %v1324_v53 }
 0x1f9   :  { %v834_v16 = vpop.eup %833  ;;  %v465_v47 = vadd.f32 1.0, %v832_v37  ;;  %859 = vpow2.f32 %v778_v12  ;;  %v768_v56 = vmul.f32 -1.442695, %v1398_v18  ;;  %v769_v2 = vmul.f32 -1.442695, %v1404_v30 }
 0x1fa   :  { %v836_v11 = vpop.eup %835  ;;  %v466_v0 = vadd.f32 1.0, %v834_v16  ;;  %861 = vpow2.f32 %v779_v36  ;;  %v344_v36 = vmul.f32 %v1324_v53, %v1030_v15  ;;  %v1432_v4 = vadd.f32 %v374_v40, %v343_v51 }
 0x1fb   :  { %v838_v8 = vpop.eup %837  ;;  %863 = vrcp.f32 %v465_v47  ;;  %v641_v9 = vadd.f32 1.0, %v836_v11  ;;  %v1443_v38 = vadd.f32 %v559_v14, %v374_v40 }
 0x1fc   :  { %v840_v32 = vpop.eup %839  ;;  %v505_v35 = vmul.f32 %v838_v8, %v1300_v23  ;;  %865 = vrcp.f32 %v466_v0  ;;  %v1438_v62 = vadd.f32 %v374_v40, %v344_v36  ;;  %v740_v11 = vmul.f32 -1.442695, %v1432_v4 }
 0x1fd   :  { %v842_v33 = vpop.eup %841  ;;  %v506_v59 = vmul.f32 %v840_v32, %v1302_v28  ;;  %867 = vrcp.f32 %v641_v9  ;;  %v560_v0 = vmul.f32 %v1126_v39, %v1324_v53  ;;  %v772_v32 = vmul.f32 -1.442695, %v1443_v38 }
 0x1fe   :  { %v844_v6 = vpop.eup %843  ;;  %521 = vst [vmem:[%s1575_s3 + $0x10] sm:$0xff] %v505_v35  ;;  %v681_v23 = vmul.f32 %v842_v33, %v1304_v63  ;;  %869 = vpow2.f32 %v732_v1  ;;  %v737_v63 = vmul.f32 -1.442695, %v1394_v21  ;;  %v741_v8 = vmul.f32 -1.442695, %v1438_v62 }
 0x1ff   :  { %v846_v42 = vpop.eup %845  ;;  %522 = vst [vmem:[%s1575_s3 + $0x18] sm:$0xff] %v506_v59  ;;  %v682_v28 = vmul.f32 %v844_v6, %v1306_v34  ;;  %871 = vpow2.f32 %v733_v24  ;;  %v1455_v33 = vadd.f32 %v560_v0, %v374_v40  ;;  %v1583_v40 = vld [vmem:[#allocation3_spill] sm:$0xff] }
 0x200   :  { %v848_v48 = vpop.eup %847  ;;  %782 = vst [vmem:[%s1575_s3 + $0x90] sm:$0xff] %v681_v23  ;;  %v642_v55 = vadd.f32 1.0, %v846_v42  ;;  %873 = vpow2.f32 %v764_v54  ;;  %v347_v23 = vmul.f32 %v1342_v29, %v1049_v20  ;;  %v1584_v20 = vld [vmem:[#allocation4_spill] sm:$0xff] }
 0x201   :  { %v850_v50 = vpop.eup %849  ;;  %783 = vst [vmem:[%s1575_s3 + $0x98] sm:$0xff] %v682_v28  ;;  %v509_v34 = vmul.f32 %v848_v48, %v1316_v45  ;;  %875 = vpow2.f32 %v765_v5  ;;  %v384_v5 = vpop.permute.xlu1 %383  ;;  %v773_v28 = vmul.f32 -1.442695, %v1455_v33 }
 0x202   :  { %v852_v12 = vpop.eup %851  ;;  %v510_v13 = vmul.f32 %v850_v50, %v1318_v7  ;;  %877 = vrcp.f32 %v642_v55  ;;  %v563_v50 = vmul.f32 %v1583_v40, %v1342_v29 }
 0x203   :  { %v854_v37 = vpop.eup %853  ;;  %525 = vst [vmem:[%s1575_s3 + $0x30] sm:$0xff] %v509_v34  ;;  %v685_v45 = vmul.f32 %v852_v12, %v1320_v58  ;;  %879 = vpow2.f32 %v736_v43  ;;  %v1582_v43 = vld [vmem:[#allocation2_spill] sm:$0xff]  ;;  %v1474_v34 = vadd.f32 %v384_v5, %v347_v23  ;;  %v564_v12 = vmul.f32 %v1584_v20, %v1342_v29 }
 0x204   :  { %v856_v7 = vpop.eup %855  ;;  %526 = vst [vmem:[%s1575_s3 + $0x38] sm:$0xff] %v510_v13  ;;  %v686_v15 = vmul.f32 %v854_v37, %v1322_v10  ;;  %881 = vpow2.f32 %v737_v63  ;;  %v348_v48 = vmul.f32 %v1342_v29, %v1582_v43  ;;  %v1481_v37 = vadd.f32 %v563_v50, %v384_v5 }
 0x205   :  { %v858_v60 = vpop.eup %857  ;;  %786 = vst [vmem:[%s1575_s3 + $0xb0] sm:$0xff] %v685_v45  ;;  %v469_v58 = vadd.f32 1.0, %v856_v7  ;;  %883 = vpow2.f32 %v768_v56  ;;  %v1486_v7 = vadd.f32 %v564_v12, %v384_v5  ;;  %v744_v29 = vmul.f32 -1.442695, %v1474_v34 }
 0x206   :  { %v860_v16 = vpop.eup %859  ;;  %787 = vst [vmem:[%s1575_s3 + $0xb8] sm:$0xff] %v686_v15  ;;  %v470_v17 = vadd.f32 1.0, %v858_v60  ;;  %885 = vpow2.f32 %v769_v2  ;;  %v1479_v13 = vadd.f32 %v384_v5, %v348_v48 }
 0x207   :  { %v862_v10 = vpop.eup %861  ;;  %887 = vrcp.f32 %v469_v58  ;;  %v645_v47 = vadd.f32 1.0, %v860_v16  ;;  %v777_v0 = vmul.f32 -1.442695, %v1486_v7 }
 0x208   :  { %v864_v22 = vpop.eup %863  ;;  %889 = vrcp.f32 %v470_v17  ;;  %v646_v1 = vadd.f32 1.0, %v862_v10  ;;  %v745_v16 = vmul.f32 -1.442695, %v1479_v13 }
 0x209   :  { %v866_v9 = vpop.eup %865  ;;  %v513_v24 = vmul.f32 %v864_v22, %v1334_v52  ;;  %891 = vrcp.f32 %v645_v47  ;;  %v776_v47 = vmul.f32 -1.442695, %v1481_v37 }
 0x20a   :  { %v868_v35 = vpop.eup %867  ;;  %v514_v54 = vmul.f32 %v866_v9, %v1336_v61  ;;  %893 = vrcp.f32 %v646_v1 }
 0x20b   :  { %v870_v59 = vpop.eup %869  ;;  %529 = vst [vmem:[%s1575_s3 + $0x50] sm:$0xff] %v513_v24  ;;  %v689_v39 = vmul.f32 %v868_v35, %v1338_v41  ;;  %895 = vpow2.f32 %v740_v11 }
 0x20c   :  { %v872_v53 = vpop.eup %871  ;;  %530 = vst [vmem:[%s1575_s3 + $0x58] sm:$0xff] %v514_v54  ;;  %v455_v52 = vadd.f32 1.0, %v870_v59  ;;  %897 = vpow2.f32 %v741_v8 }
 0x20d   :  { %v874_v61 = vpop.eup %873  ;;  %790 = vst [vmem:[%s1575_s3 + $0xd0] sm:$0xff] %v689_v39  ;;  %v456_v6 = vadd.f32 1.0, %v872_v53  ;;  %899 = vpow2.f32 %v772_v32 }
 0x20e   :  { %v876_v41 = vpop.eup %875  ;;  %901 = vrcp.f32 %v455_v52  ;;  %v631_v42 = vadd.f32 1.0, %v874_v61 }
 0x20f   :  { %v878_v55 = vpop.eup %877  ;;  %903 = vrcp.f32 %v456_v6  ;;  %v632_v63 = vadd.f32 1.0, %v876_v41 }
 0x210   :  { %v880_v51 = vpop.eup %879  ;;  %v690_v56 = vmul.f32 %v878_v55, %v1340_v46  ;;  %905 = vrcp.f32 %v631_v42 }
 0x211   :  { %v882_v36 = vpop.eup %881  ;;  %907 = vrcp.f32 %v632_v63  ;;  %v459_v2 = vadd.f32 1.0, %v880_v51 }
 0x212   :  { %v884_v45 = vpop.eup %883  ;;  %791 = vst [vmem:[%s1575_s3 + $0xd8] sm:$0xff] %v690_v56  ;;  %v460_v14 = vadd.f32 1.0, %v882_v36  ;;  %909 = vpow2.f32 %v773_v28 }
 0x213   :  { %v886_v46 = vpop.eup %885  ;;  %911 = vrcp.f32 %v459_v2  ;;  %v635_v15 = vadd.f32 1.0, %v884_v45 }
 0x214   :  { %v888_v60 = vpop.eup %887  ;;  %913 = vrcp.f32 %v460_v14  ;;  %v636_v58 = vadd.f32 1.0, %v886_v46 }
 0x215   :  { %v890_v17 = vpop.eup %889  ;;  %v517_v10 = vmul.f32 %v888_v60, %v1352_v3  ;;  %915 = vrcp.f32 %v635_v15 }
 0x216   :  { %v892_v11 = vpop.eup %891  ;;  %v518_v22 = vmul.f32 %v890_v17, %v1354_v44  ;;  %917 = vrcp.f32 %v636_v58 }
 0x217   :  { %v894_v1 = vpop.eup %893  ;;  %533 = vst [vmem:[%s1575_s3 + $0x70] sm:$0xff] %v517_v10  ;;  %v693_v8 = vmul.f32 %v892_v11, %v1356_v19  ;;  %919 = vpow2.f32 %v744_v29 }
 0x218   :  { %v896_v9 = vpop.eup %895  ;;  %534 = vst [vmem:[%s1575_s3 + $0x78] sm:$0xff] %v518_v22  ;;  %v694_v3 = vmul.f32 %v894_v1, %v1358_v31  ;;  %921 = vpow2.f32 %v745_v16 }
 0x219   :  { %v898_v44 = vpop.eup %897  ;;  %794 = vst [vmem:[%s1575_s3 + $0xf0] sm:$0xff] %v693_v8  ;;  %v463_v24 = vadd.f32 1.0, %v896_v9  ;;  %923 = vpow2.f32 %v776_v47 }
 0x21a   :  { %v900_v32 = vpop.eup %899  ;;  %795 = vst [vmem:[%s1575_s3 + $0xf8] sm:$0xff] %v694_v3  ;;  %v464_v19 = vadd.f32 1.0, %v898_v44  ;;  %925 = vpow2.f32 %v777_v0 }
 0x21b   :  { %v902_v35 = vpop.eup %901  ;;  %927 = vrcp.f32 %v463_v24  ;;  %v639_v54 = vadd.f32 1.0, %v900_v32 }
 0x21c   :  { %v904_v59 = vpop.eup %903  ;;  %v503_v31 = vmul.f32 %v902_v35, %v1370_v49  ;;  %929 = vrcp.f32 %v464_v19 }
 0x21d   :  { %v906_v39 = vpop.eup %905  ;;  %v504_v53 = vmul.f32 %v904_v59, %v1374_v57  ;;  %931 = vrcp.f32 %v639_v54 }
 0x21e   :  { %v908_v52 = vpop.eup %907  ;;  %519 = vst [vmem:[%s1575_s3] sm:$0xff] %v503_v31  ;;  %v679_v5 = vmul.f32 %v906_v39, %v1380_v26 }
 0x21f   :  { %v910_v61 = vpop.eup %909  ;;  %520 = vst [vmem:[%s1575_s3 + $0x8] sm:$0xff] %v504_v53  ;;  %v680_v6 = vmul.f32 %v908_v52, %v1384_v27 }
 0x220   :  { %v912_v49 = vpop.eup %911  ;;  %780 = vst [vmem:[%s1575_s3 + $0x80] sm:$0xff] %v679_v5  ;;  %v640_v57 = vadd.f32 1.0, %v910_v61 }
 0x221   :  { %v914_v23 = vpop.eup %913  ;;  %781 = vst [vmem:[%s1575_s3 + $0x88] sm:$0xff] %v680_v6  ;;  %v507_v26 = vmul.f32 %v912_v49, %v1390_v25 }
 0x222   :  { %v916_v41 = vpop.eup %915  ;;  %v508_v42 = vmul.f32 %v914_v23, %v1394_v21  ;;  %933 = vrcp.f32 %v640_v57 }
 0x223   :  { %v918_v28 = vpop.eup %917  ;;  %523 = vst [vmem:[%s1575_s3 + $0x20] sm:$0xff] %v507_v26  ;;  %v683_v27 = vmul.f32 %v916_v41, %v1398_v18 }
 0x224   :  { %v920_v43 = vpop.eup %919  ;;  %524 = vst [vmem:[%s1575_s3 + $0x28] sm:$0xff] %v508_v42  ;;  %v684_v48 = vmul.f32 %v918_v28, %v1404_v30 }
 0x225   :  { %v922_v55 = vpop.eup %921  ;;  %784 = vst [vmem:[%s1575_s3 + $0xa0] sm:$0xff] %v683_v27  ;;  %v467_v25 = vadd.f32 1.0, %v920_v43 }
 0x226   :  { %v924_v21 = vpop.eup %923  ;;  %785 = vst [vmem:[%s1575_s3 + $0xa8] sm:$0xff] %v684_v48  ;;  %v468_v63 = vadd.f32 1.0, %v922_v55 }
 0x227   :  { %v926_v18 = vpop.eup %925  ;;  %935 = vrcp.f32 %v467_v25  ;;  %v643_v40 = vadd.f32 1.0, %v924_v21 }
 0x228   :  { %v928_v50 = vpop.eup %927  ;;  %937 = vrcp.f32 %v468_v63  ;;  %v644_v51 = vadd.f32 1.0, %v926_v18 }
 0x229   :  { %v930_v56 = vpop.eup %929  ;;  %v511_v30 = vmul.f32 %v928_v50, %v1432_v4  ;;  %939 = vrcp.f32 %v643_v40 }
 0x22a   :  { %v932_v20 = vpop.eup %931  ;;  %v512_v12 = vmul.f32 %v930_v56, %v1438_v62  ;;  %941 = vrcp.f32 %v644_v51 }
 0x22b   :  { %527 = vst [vmem:[%s1575_s3 + $0x40] sm:$0xff] %v511_v30  ;;  %v687_v36 = vmul.f32 %v932_v20, %v1443_v38 }
 0x22c   :  { %528 = vst [vmem:[%s1575_s3 + $0x48] sm:$0xff] %v512_v12 }
 0x22d   :  { %788 = vst [vmem:[%s1575_s3 + $0xc0] sm:$0xff] %v687_v36 }
 0x22f   :  { %v934_v4 = vpop.eup %933 }
 0x230   :  { %v688_v2 = vmul.f32 %v934_v4, %v1455_v33 }
 0x232   :  { %789 = vst [vmem:[%s1575_s3 + $0xc8] sm:$0xff] %v688_v2 }
 0x234   :  { %v936_v62 = vpop.eup %935 }
 0x235   :  { %v938_v45 = vpop.eup %937  ;;  %v515_v14 = vmul.f32 %v936_v62, %v1474_v34 }
 0x236   :  { %v940_v38 = vpop.eup %939  ;;  %v516_v46 = vmul.f32 %v938_v45, %v1479_v13 }
 0x237   :  { %v942_v15 = vpop.eup %941  ;;  %531 = vst [vmem:[%s1575_s3 + $0x60] sm:$0xff] %v515_v14  ;;  %v691_v29 = vmul.f32 %v940_v38, %v1481_v37 }
 0x238   :  { %532 = vst [vmem:[%s1575_s3 + $0x68] sm:$0xff] %v516_v46  ;;  %v692_v33 = vmul.f32 %v942_v15, %v1486_v7 }
 0x239   :  { %792 = vst [vmem:[%s1575_s3 + $0xe0] sm:$0xff] %v691_v29 }
 0x23a   :  { %793 = vst [vmem:[%s1575_s3 + $0xe8] sm:$0xff] %v692_v33 }

// kernel: image_decoder_conv_forward.8
= control target key start
LH: loop header
LB: loop body
LE: loop exit
PB: predicated region body
PF: predicated region fallthrough
CT: control target
= control target key end

     0   :  { %s2867_s0 = inlined_call_operand.vmem [shape: f32[2,32,1024], index: 0, kind: input, shape index: {}]   ;;  %s2868_s1 = inlined_call_operand.vmem [shape: f32[32,1], index: 1, kind: input, shape index: {}]   ;;  %s2869_s2 = inlined_call_operand.vmem [shape: f32[32,1], index: 2, kind: input, shape index: {}]   ;;  %s2870_s3 = inlined_call_operand.vmem [shape: f32[2,32,1024], index: 3, kind: output, shape index: {}]  }
   0x1   :  { %v1587_v0 = vld [vmem:[%s2867_s0 + $0x80] sm:$0xff]  ;;  %v1592_v1 = vld [vmem:[%s2867_s0 + $0x88] sm:$0xff]  ;;  %v1597_v2 = vld [vmem:[%s2867_s0 + $0x90] sm:$0xff] }
   0x2   :  { %v64_v3 = vadd.f32 %v1592_v1, %v1587_v0  ;;  %v1604_v4 = vld [vmem:[%s2867_s0 + $0x98] sm:$0xff]  ;;  %v1609_v5 = vld [vmem:[%s2867_s0] sm:$0xff]  ;;  %v1615_v7 = vld [vmem:[%s2867_s0 + $0x8] sm:$0xff] }
   0x3   :  { %2902 = vst [vmem:[#allocation2_spill] sm:$0xff] %v1609_v5  ;;  %2903 = vst [vmem:[#allocation3_spill] sm:$0xff] %v1615_v7  ;;  %v1620_v8 = vld [vmem:[%s2867_s0 + $0x10] sm:$0xff]  ;;  %v1625_v9 = vld [vmem:[%s2867_s0 + $0xa0] sm:$0xff]  ;;  %v46_v10 = vadd.f32 %v1615_v7, %v1609_v5 }
   0x4   :  { %v65_v6 = vadd.f32 %v64_v3, %v1597_v2  ;;  %v1633_v12 = vld [vmem:[%s2867_s0 + $0x18] sm:$0xff]  ;;  %v1638_v13 = vld [vmem:[%s2867_s0 + $0xc0] sm:$0xff]  ;;  %v1643_v14 = vld [vmem:[%s2867_s0 + $0xc8] sm:$0xff] }
   0x5   :  { %v1648_v15 = vld [vmem:[%s2867_s0 + $0xa8] sm:$0xff]  ;;  %v47_v16 = vadd.f32 %v46_v10, %v1620_v8  ;;  %v1654_v17 = vld [vmem:[%s2867_s0 + $0xd0] sm:$0xff]  ;;  %v73_v18 = vadd.f32 %v1643_v14, %v1638_v13  ;;  %v1667_v21 = vld [vmem:[%s2867_s0 + $0x20] sm:$0xff] }
   0x6   :  { %v66_v11 = vadd.f32 %v65_v6, %v1604_v4  ;;  %v1661_v19 = vld [vmem:[%s2867_s0 + $0xb0] sm:$0xff]  ;;  %v1672_v22 = vld [vmem:[%s2867_s0 + $0xd8] sm:$0xff]  ;;  %v1679_v25 = vld [vmem:[%s2867_s0 + $0x40] sm:$0xff] }
   0x7   :  { %v48_v23 = vadd.f32 %v47_v16, %v1633_v12  ;;  %v74_v24 = vadd.f32 %v73_v18, %v1654_v17  ;;  %2904 = vst [vmem:[#allocation4_spill] sm:$0xff] %v1679_v25  ;;  %v1684_v26 = vld [vmem:[%s2867_s0 + $0x48] sm:$0xff]  ;;  %v1689_v27 = vld [vmem:[%s2867_s0 + $0x50] sm:$0xff]  ;;  %v1694_v28 = vld [vmem:[%s2867_s0 + $0xb8] sm:$0xff] }
   0x8   :  { %v67_v20 = vadd.f32 %v66_v11, %v1625_v9  ;;  %2905 = vst [vmem:[#allocation5_spill] sm:$0xff] %v1684_v26  ;;  %2906 = vst [vmem:[#allocation6_spill] sm:$0xff] %v1689_v27  ;;  %v1700_v30 = vld [vmem:[%s2867_s0 + $0x28] sm:$0xff]  ;;  %v1705_v31 = vld [vmem:[%s2867_s0 + $0xe0] sm:$0xff]  ;;  %v55_v32 = vadd.f32 %v1684_v26, %v1679_v25 }
   0x9   :  { %2907 = vst [vmem:[#allocation7_spill] sm:$0xff] %v1700_v30  ;;  %v1712_v33 = vld [vmem:[%s2867_s0 + $0x30] sm:$0xff]  ;;  %v49_v34 = vadd.f32 %v48_v23, %v1667_v21  ;;  %v75_v35 = vadd.f32 %v74_v24, %v1672_v22  ;;  %v1719_v36 = vld [vmem:[%s2867_s0 + $0x58] sm:$0xff]  ;;  %v1724_v37 = vld [vmem:[%s2867_s0 + $0x140] sm:$0xff] }
   0xa   :  { %v68_v29 = vadd.f32 %v67_v20, %v1648_v15  ;;  %2908 = vst [vmem:[#allocation8_spill] sm:$0xff] %v1712_v33  ;;  %2909 = vst [vmem:[#allocation9_spill] sm:$0xff] %v1719_v36  ;;  %v1730_v39 = vld [vmem:[%s2867_s0 + $0xe8] sm:$0xff]  ;;  %v56_v40 = vadd.f32 %v55_v32, %v1689_v27  ;;  %v1741_v42 = vld [vmem:[%s2867_s0 + $0x150] sm:$0xff] }
   0xb   :  { %v1736_v41 = vld [vmem:[%s2867_s0 + $0x148] sm:$0xff]  ;;  %v1746_v43 = vld [vmem:[%s2867_s0 + $0x38] sm:$0xff]  ;;  %v50_v44 = vadd.f32 %v49_v34, %v1700_v30  ;;  %v1752_v45 = vld [vmem:[%s2867_s0 + $0xf0] sm:$0xff]  ;;  %v76_v46 = vadd.f32 %v75_v35, %v1705_v31 }
   0xc   :  { %v69_v38 = vadd.f32 %v68_v29, %v1661_v19  ;;  %v1758_v47 = vld [vmem:[%s2867_s0 + $0x60] sm:$0xff]  ;;  %v124_v48 = vadd.f32 %v1736_v41, %v1724_v37  ;;  %v57_v50 = vadd.f32 %v56_v40, %v1719_v36  ;;  %v1767_v51 = vld [vmem:[%s2867_s0 + $0x158] sm:$0xff]  ;;  %v1777_v53 = vld [vmem:[%s2867_s0 + $0x108] sm:$0xff] }
   0xd   :  { %2910 = vst [vmem:[#allocation10_spill] sm:$0xff] %v1758_v47  ;;  %v1772_v52 = vld [vmem:[%s2867_s0 + $0x100] sm:$0xff]  ;;  %v51_v54 = vadd.f32 %v50_v44, %v1712_v33  ;;  %v1783_v55 = vld [vmem:[%s2867_s0 + $0xf8] sm:$0xff]  ;;  %v77_v56 = vadd.f32 %v76_v46, %v1730_v39  ;;  %v1789_v57 = vld [vmem:[%s2867_s0 + $0x68] sm:$0xff] }
   0xe   :  { %v70_v49 = vadd.f32 %v69_v38, %v1694_v28  ;;  %2911 = vst [vmem:[#allocation11_spill] sm:$0xff] %v1789_v57  ;;  %v125_v58 = vadd.f32 %v1741_v42, %v124_v48  ;;  %v1795_v59 = vld [vmem:[%s2867_s0 + $0x110] sm:$0xff]  ;;  %v115_v60 = vadd.f32 %v1777_v53, %v1772_v52  ;;  %v58_v62 = vadd.f32 %v57_v50, %v1758_v47  ;;  %v1808_v63 = vld [vmem:[%s2867_s0 + $0x160] sm:$0xff]  ;;  %v1813_v3 = vld [vmem:[%s2867_s0 + $0x118] sm:$0xff] }
   0xf   :  { %v1802_v61 = vld [vmem:[%s2867_s0 + $0x70] sm:$0xff]  ;;  %v52_v6 = vadd.f32 %v51_v54, %v1746_v43  ;;  %v78_v10 = vadd.f32 %v77_v56, %v1752_v45  ;;  %v1822_v18 = vld [vmem:[%s2867_s0 + $0x1c0] sm:$0xff]  ;;  %v1827_v20 = vld [vmem:[%s2867_s0 + $0x1c8] sm:$0xff] }
  0x10   :  { %71 = vadd.xlane.f32.xlu1 %v70_v49  ;;  %2912 = vst [vmem:[#allocation12_spill] sm:$0xff] %v1802_v61  ;;  %v126_v11 = vadd.f32 %v1767_v51, %v125_v58  ;;  %v116_v16 = vadd.f32 %v1795_v59, %v115_v60  ;;  %2913 = vst [vmem:[#allocation13_spill] sm:$0xff] %v1827_v20  ;;  %v1832_v23 = vld [vmem:[%s2867_s0 + $0x1d0] sm:$0xff]  ;;  %v1837_v24 = vld [vmem:[%s2867_s0 + $0x78] sm:$0xff]  ;;  %v59_v29 = vadd.f32 %v58_v62, %v1789_v57 }
  0x11   :  { %2914 = vst [vmem:[#allocation14_spill] sm:$0xff] %v1832_v23  ;;  %2915 = vst [vmem:[#allocation15_spill] sm:$0xff] %v1837_v24  ;;  %v1843_v32 = vld [vmem:[%s2867_s0 + $0x168] sm:$0xff]  ;;  %v1848_v34 = vld [vmem:[%s2867_s0 + $0x120] sm:$0xff]  ;;  %v142_v35 = vadd.f32 %v1827_v20, %v1822_v18  ;;  %53 = vadd.xlane.f32.xlu0 %v52_v6  ;;  %v79_v38 = vadd.f32 %v78_v10, %v1783_v55 }
  0x12   :  { %v1856_v40 = vld [vmem:[%s2867_s0 + $0x170] sm:$0xff]  ;;  %v127_v44 = vadd.f32 %v1808_v63, %v126_v11  ;;  %v117_v46 = vadd.f32 %v1813_v3, %v116_v16  ;;  %v1863_v48 = vld [vmem:[%s2867_s0 + $0x1d8] sm:$0xff]  ;;  %v1868_v49 = vld [vmem:[%s2867_s0 + $0x180] sm:$0xff]  ;;  %v60_v50 = vadd.f32 %v59_v29, %v1802_v61 }
  0x13   :  { %2916 = vst [vmem:[#allocation16_spill] sm:$0xff] %v1863_v48  ;;  %2917 = vst [vmem:[#allocation17_spill] sm:$0xff] %v1868_v49  ;;  %v1874_v54 = vld [vmem:[%s2867_s0 + $0x128] sm:$0xff]  ;;  %v143_v56 = vadd.f32 %v1832_v23, %v142_v35  ;;  %v1885_v60 = vld [vmem:[%s2867_s0 + $0x190] sm:$0xff] }
  0x14   :  { %v1880_v58 = vld [vmem:[%s2867_s0 + $0x188] sm:$0xff]  ;;  %2919 = vst [vmem:[#allocation19_spill] sm:$0xff] %v1885_v60  ;;  %80 = vadd.xlane.f32.xlu1 %v79_v38  ;;  %v128_v62 = vadd.f32 %v1843_v32, %v127_v44  ;;  %v118_v6 = vadd.f32 %v1848_v34, %v117_v46  ;;  %v1892_v10 = vld [vmem:[%s2867_s0 + $0x1e0] sm:$0xff]  ;;  %v61_v16 = vadd.f32 %v60_v50, %v1837_v24  ;;  %v1900_v29 = vld [vmem:[%s2867_s0 + $0x178] sm:$0xff] }
  0x15   :  { %2918 = vst [vmem:[#allocation18_spill] sm:$0xff] %v1880_v58  ;;  %2920 = vst [vmem:[#allocation20_spill] sm:$0xff] %v1892_v10  ;;  %v133_v11 = vadd.f32 %v1880_v58, %v1868_v49  ;;  %v1905_v35 = vld [vmem:[%s2867_s0 + $0x130] sm:$0xff]  ;;  %v144_v38 = vadd.f32 %v1863_v48, %v143_v56  ;;  %v1911_v44 = vld [vmem:[%s2867_s0 + $0x198] sm:$0xff] }
  0x16   :  { %2921 = vst [vmem:[#allocation21_spill] sm:$0xff] %v1905_v35  ;;  %2922 = vst [vmem:[#allocation22_spill] sm:$0xff] %v1911_v44  ;;  %v129_v46 = vadd.f32 %v1856_v40, %v128_v62  ;;  %v119_v50 = vadd.f32 %v1874_v54, %v118_v6  ;;  %v1918_v58 = vld [vmem:[%s2867_s0 + $0x1e8] sm:$0xff]  ;;  %62 = vadd.xlane.f32.xlu0 %v61_v16  ;;  %v1924_v56 = vld [vmem:[%s2867_s0 + $0x138] sm:$0xff] }
  0x17   :  { %2923 = vst [vmem:[#allocation23_spill] sm:$0xff] %v1918_v58  ;;  %v134_v49 = vadd.f32 %v1885_v60, %v133_v11  ;;  %2924 = vst [vmem:[#allocation24_spill] sm:$0xff] %v1924_v56  ;;  %v145_v48 = vadd.f32 %v1892_v10, %v144_v38  ;;  %v1930_v62 = vld [vmem:[%s2867_s0 + $0x1a0] sm:$0xff]  ;;  %v1937_v11 = vld [vmem:[%s2867_s0 + $0x1f0] sm:$0xff] }
  0x18   :  { %2925 = vst [vmem:[#allocation25_spill] sm:$0xff] %v1930_v62  ;;  %v130_v6 = vadd.f32 %v1900_v29, %v129_v46  ;;  %v120_v23 = vadd.f32 %v1905_v35, %v119_v50  ;;  %2926 = vst [vmem:[#allocation26_spill] sm:$0xff] %v1937_v11  ;;  %v1944_v38 = vld [vmem:[%s2867_s0 + $0x1a8] sm:$0xff]  ;;  %v1950_v46 = vld [vmem:[%s2867_s0 + $0x1f8] sm:$0xff] }
  0x19   :  { %v135_v16 = vadd.f32 %v1911_v44, %v134_v49  ;;  %v146_v60 = vadd.f32 %v1918_v58, %v145_v48  ;;  %2927 = vst [vmem:[#allocation27_spill] sm:$0xff] %v1944_v38  ;;  %2928 = vst [vmem:[#allocation28_spill] sm:$0xff] %v1950_v46  ;;  %v1957_v48 = vld [vmem:[%s2867_s0 + $0x1b0] sm:$0xff] }
  0x1a   :  { %131 = vadd.xlane.f32.xlu1 %v130_v6  ;;  %v121_v10 = vadd.f32 %v1924_v56, %v120_v23  ;;  %2929 = vst [vmem:[#allocation29_spill] sm:$0xff] %v1957_v48  ;;  %v1964_v23 = vld [vmem:[%s2867_s0 + $0x1b8] sm:$0xff] }
  0x1b   :  { %v136_v50 = vadd.f32 %v1930_v62, %v135_v16  ;;  %v147_v35 = vadd.f32 %v1937_v11, %v146_v60  ;;  %2930 = vst [vmem:[#allocation30_spill] sm:$0xff] %v1964_v23 }
  0x1c   :  { %122 = vadd.xlane.f32.xlu0 %v121_v10 }
  0x1d   :  { %v137_v49 = vadd.f32 %v1944_v38, %v136_v50  ;;  %v148_v6 = vadd.f32 %v1950_v46, %v147_v35 }
  0x1f   :  { %v138_v44 = vadd.f32 %v1957_v48, %v137_v49  ;;  %149 = vadd.xlane.f32.xlu1 %v148_v6 }
  0x21   :  { %v139_v60 = vadd.f32 %v1964_v23, %v138_v44 }
  0x23   :  { %140 = vadd.xlane.f32.xlu0 %v139_v60 }
  0x99   :  { %v72_v16 = vpop.xlane.xlu1 %71 }
  0x9a   :  { %v54_v62 = vpop.xlane.xlu0 %53 }
  0x9d   :  { %v81_v11 = vpop.xlane.xlu1 %80 }
  0x9f   :  { %v63_v58 = vpop.xlane.xlu0 %62 }
  0xa3   :  { %v132_v10 = vpop.xlane.xlu1 %131 }
  0xa4   :  { %v152_v56 = vadd.f32 %v132_v10, %v63_v58 }
  0xa5   :  { %v123_v50 = vpop.xlane.xlu0 %122 }
  0xa6   :  { %v1968_v38 = vmul.f32 0.00048828125, %v152_v56  ;;  %v151_v35 = vadd.f32 %v123_v50, %v54_v62 }
  0xa8   :  { %v150_v46 = vpop.xlane.xlu1 %149  ;;  %v167_v20 = vsub.f32 %v1679_v25, %v1968_v38  ;;  %v168_v49 = vsub.f32 %v1684_v26, %v1968_v38  ;;  %v1974_v6 = vmul.f32 0.00048828125, %v151_v35  ;;  %v169_v44 = vsub.f32 %v1689_v27, %v1968_v38 }
  0xa9   :  { %v154_v60 = vadd.f32 %v150_v46, %v81_v11  ;;  %v170_v58 = vsub.f32 %v1719_v36, %v1968_v38  ;;  %v171_v62 = vsub.f32 %v1758_v47, %v1968_v38  ;;  %v172_v25 = vsub.f32 %v1789_v57, %v1968_v38 }
  0xaa   :  { %v199_v10 = vmul.f32 %v167_v20, %v167_v20  ;;  %v200_v56 = vmul.f32 %v168_v49, %v168_v49  ;;  %v173_v35 = vsub.f32 %v1802_v61, %v1968_v38  ;;  %v201_v26 = vmul.f32 %v169_v44, %v169_v44 }
  0xab   :  { %v159_v11 = vsub.f32 %v1609_v5, %v1974_v6  ;;  %v160_v46 = vsub.f32 %v1615_v7, %v1974_v6  ;;  %v1990_v20 = vmul.f32 0.00048828125, %v154_v60  ;;  %v174_v49 = vsub.f32 %v1837_v24, %v1968_v38 }
  0xac   :  { %v141_v50 = vpop.xlane.xlu0 %140  ;;  %v232_v23 = vadd.f32 %v200_v56, %v199_v10  ;;  %v202_v47 = vmul.f32 %v170_v58, %v170_v58  ;;  %v161_v57 = vsub.f32 %v1620_v8, %v1974_v6  ;;  %v203_v27 = vmul.f32 %v171_v62, %v171_v62 }
  0xad   :  { %v153_v36 = vadd.f32 %v141_v50, %v72_v16  ;;  %v191_v44 = vmul.f32 %v159_v11, %v159_v11  ;;  %v204_v10 = vmul.f32 %v172_v25, %v172_v25  ;;  %v205_v56 = vmul.f32 %v173_v35, %v173_v35 }
  0xae   :  { %v233_v61 = vadd.f32 %v232_v23, %v201_v26  ;;  %v162_v5 = vsub.f32 %v1633_v12, %v1974_v6  ;;  %v192_v48 = vmul.f32 %v160_v46, %v160_v46  ;;  %v163_v60 = vsub.f32 %v1667_v21, %v1974_v6 }
  0xaf   :  { %v164_v58 = vsub.f32 %v1700_v30, %v1974_v6  ;;  %v165_v24 = vsub.f32 %v1712_v33, %v1974_v6  ;;  %v193_v16 = vmul.f32 %v161_v57, %v161_v57  ;;  %v183_v25 = vsub.f32 %v1638_v13, %v1990_v20 }
  0xb0   :  { %v234_v7 = vadd.f32 %v233_v61, %v202_v47  ;;  %v223_v62 = vadd.f32 %v192_v48, %v191_v44  ;;  %v184_v26 = vsub.f32 %v1643_v14, %v1990_v20  ;;  %v2008_v23 = vmul.f32 0.00048828125, %v153_v36 }
  0xb1   :  { %v206_v47 = vmul.f32 %v174_v49, %v174_v49  ;;  %v185_v50 = vsub.f32 %v1654_v17, %v1990_v20  ;;  %v166_v35 = vsub.f32 %v1746_v43, %v1974_v6  ;;  %v194_v11 = vmul.f32 %v162_v5, %v162_v5 }
  0xb2   :  { %v235_v61 = vadd.f32 %v234_v7, %v203_v27  ;;  %v224_v46 = vadd.f32 %v223_v62, %v193_v16  ;;  %v215_v57 = vmul.f32 %v183_v25, %v183_v25  ;;  %v195_v44 = vmul.f32 %v163_v60, %v163_v60 }
  0xb3   :  { %v186_v13 = vsub.f32 %v1672_v22, %v1990_v20  ;;  %v216_v33 = vmul.f32 %v184_v26, %v184_v26  ;;  %v196_v14 = vmul.f32 %v164_v58, %v164_v58  ;;  %v197_v36 = vmul.f32 %v165_v24, %v165_v24 }
  0xb4   :  { %v236_v48 = vadd.f32 %v235_v61, %v204_v10  ;;  %v225_v30 = vadd.f32 %v224_v46, %v194_v11  ;;  %v187_v7 = vsub.f32 %v1705_v31, %v1990_v20  ;;  %v217_v17 = vmul.f32 %v185_v50, %v185_v50 }
  0xb5   :  { %v250_v49 = vadd.f32 %v216_v33, %v215_v57  ;;  %v175_v5 = vsub.f32 %v1587_v0, %v2008_v23  ;;  %v198_v16 = vmul.f32 %v166_v35, %v166_v35  ;;  %v188_v10 = vsub.f32 %v1730_v39, %v1990_v20 }
  0xb6   :  { %v237_v27 = vadd.f32 %v236_v48, %v205_v56  ;;  %v226_v62 = vadd.f32 %v225_v30, %v195_v44  ;;  %v176_v22 = vsub.f32 %v1592_v1, %v2008_v23  ;;  %v218_v24 = vmul.f32 %v186_v13, %v186_v13 }
  0xb7   :  { %v251_v58 = vadd.f32 %v250_v49, %v217_v17  ;;  %v177_v31 = vsub.f32 %v1597_v2, %v2008_v23  ;;  %v189_v33 = vsub.f32 %v1752_v45, %v1990_v20  ;;  %v190_v0 = vsub.f32 %v1783_v55, %v1990_v20 }
  0xb8   :  { %v238_v60 = vadd.f32 %v237_v27, %v206_v47  ;;  %v227_v56 = vadd.f32 %v226_v62, %v196_v14  ;;  %v207_v30 = vmul.f32 %v175_v5, %v175_v5  ;;  %v219_v25 = vmul.f32 %v187_v7, %v187_v7 }
  0xb9   :  { %v252_v39 = vadd.f32 %v251_v58, %v218_v24  ;;  %v178_v1 = vsub.f32 %v1604_v4, %v2008_v23  ;;  %v208_v26 = vmul.f32 %v176_v22, %v176_v22  ;;  %v220_v61 = vmul.f32 %v188_v10, %v188_v10 }
  0xba   :  { %239 = vadd.xlane.f32.xlu1 %v238_v60  ;;  %v228_v47 = vadd.f32 %v227_v56, %v197_v36  ;;  %v179_v2 = vsub.f32 %v1625_v9, %v2008_v23  ;;  %v180_v50 = vsub.f32 %v1648_v15, %v2008_v23  ;;  %v209_v35 = vmul.f32 %v177_v31, %v177_v31 }
  0xbb   :  { %v253_v45 = vadd.f32 %v252_v39, %v219_v25  ;;  %v241_v11 = vadd.f32 %v208_v26, %v207_v30  ;;  %v267_v55 = vsub.f32 %v1724_v37, %v1968_v38  ;;  %v181_v57 = vsub.f32 %v1661_v19, %v2008_v23 }
  0xbc   :  { %v229_v46 = vadd.f32 %v228_v47, %v198_v16  ;;  %v268_v4 = vsub.f32 %v1736_v41, %v1968_v38  ;;  %v269_v48 = vsub.f32 %v1741_v42, %v1968_v38  ;;  %v221_v9 = vmul.f32 %v189_v33, %v189_v33 }
  0xbd   :  { %v254_v44 = vadd.f32 %v253_v45, %v220_v61  ;;  %v210_v13 = vmul.f32 %v178_v1, %v178_v1  ;;  %v242_v15 = vadd.f32 %v241_v11, %v209_v35  ;;  %v222_v14 = vmul.f32 %v190_v0, %v190_v0 }
  0xbe   :  { %230 = vadd.xlane.f32.xlu0 %v229_v46  ;;  %v182_v36 = vsub.f32 %v1694_v28, %v2008_v23  ;;  %v299_v7 = vmul.f32 %v267_v55, %v267_v55  ;;  %v300_v27 = vmul.f32 %v268_v4, %v268_v4  ;;  %v211_v49 = vmul.f32 %v179_v2, %v179_v2 }
  0xbf   :  { %v255_v17 = vadd.f32 %v254_v44, %v221_v9  ;;  %v243_v19 = vadd.f32 %v242_v15, %v210_v13  ;;  %v270_v5 = vsub.f32 %v1767_v51, %v1968_v38  ;;  %v212_v16 = vmul.f32 %v180_v50, %v180_v50  ;;  %v2931_v13 = vld [vmem:[#allocation13_spill] sm:$0xff] }
  0xc0   :  { %v213_v62 = vmul.f32 %v181_v57, %v181_v57  ;;  %v271_v10 = vsub.f32 %v1808_v63, %v1968_v38  ;;  %v301_v22 = vmul.f32 %v269_v48, %v269_v48  ;;  %v332_v58 = vadd.f32 %v300_v27, %v299_v7 }
  0xc1   :  { %v256_v60 = vadd.f32 %v255_v17, %v222_v14  ;;  %v244_v24 = vadd.f32 %v243_v19, %v211_v49  ;;  %v259_v28 = vsub.f32 %v1772_v52, %v1974_v6  ;;  %v214_v31 = vmul.f32 %v182_v36, %v182_v36  ;;  %v2932_v14 = vld [vmem:[#allocation21_spill] sm:$0xff]  ;;  %v2933_v17 = vld [vmem:[#allocation14_spill] sm:$0xff] }
  0xc2   :  { %v272_v56 = vsub.f32 %v1843_v32, %v1968_v38  ;;  %v260_v33 = vsub.f32 %v1777_v53, %v1974_v6  ;;  %v261_v0 = vsub.f32 %v1795_v59, %v1974_v6  ;;  %v273_v25 = vsub.f32 %v1856_v40, %v1968_v38 }
  0xc3   :  { %257 = vadd.xlane.f32.xlu1 %v256_v60  ;;  %v245_v30 = vadd.f32 %v244_v24, %v212_v16  ;;  %v302_v39 = vmul.f32 %v270_v5, %v270_v5  ;;  %v333_v1 = vadd.f32 %v332_v58, %v301_v22  ;;  %v274_v26 = vsub.f32 %v1900_v29, %v1968_v38  ;;  %v2934_v22 = vld [vmem:[#allocation16_spill] sm:$0xff] }
  0xc4   :  { %v262_v47 = vsub.f32 %v1813_v3, %v1974_v6  ;;  %v291_v61 = vmul.f32 %v259_v28, %v259_v28  ;;  %v292_v2 = vmul.f32 %v260_v33, %v260_v33  ;;  %v303_v45 = vmul.f32 %v271_v10, %v271_v10  ;;  %v2935_v28 = vld [vmem:[#allocation24_spill] sm:$0xff] }
  0xc5   :  { %v246_v50 = vadd.f32 %v245_v30, %v213_v62  ;;  %v334_v35 = vadd.f32 %v333_v1, %v302_v39  ;;  %v263_v11 = vsub.f32 %v1848_v34, %v1974_v6  ;;  %v304_v55 = vmul.f32 %v272_v56, %v272_v56  ;;  %v2936_v33 = vld [vmem:[#allocation20_spill] sm:$0xff] }
  0xc6   :  { %v264_v46 = vsub.f32 %v1874_v54, %v1974_v6  ;;  %v293_v57 = vmul.f32 %v261_v0, %v261_v0  ;;  %v323_v4 = vadd.f32 %v292_v2, %v291_v61  ;;  %v283_v44 = vsub.f32 %v1822_v18, %v1990_v20  ;;  %v2938_v2 = vld [vmem:[#allocation17_spill] sm:$0xff] }
  0xc7   :  { %v247_v48 = vadd.f32 %v246_v50, %v214_v31  ;;  %v335_v9 = vadd.f32 %v334_v35, %v303_v45  ;;  %v284_v15 = vsub.f32 %v2931_v13, %v1990_v20  ;;  %v265_v36 = vsub.f32 %v2932_v14, %v1974_v6  ;;  %v2939_v45 = vld [vmem:[#allocation18_spill] sm:$0xff] }
  0xc8   :  { %v294_v7 = vmul.f32 %v262_v47, %v262_v47  ;;  %v324_v27 = vadd.f32 %v323_v4, %v293_v57  ;;  %v285_v49 = vsub.f32 %v2933_v17, %v1990_v20  ;;  %v305_v19 = vmul.f32 %v273_v25, %v273_v25  ;;  %v2937_v47 = vld [vmem:[#allocation23_spill] sm:$0xff] }
  0xc9   :  { %248 = vadd.xlane.f32.xlu0 %v247_v48  ;;  %v306_v5 = vmul.f32 %v274_v26, %v274_v26  ;;  %v336_v16 = vadd.f32 %v335_v9, %v304_v55  ;;  %v295_v62 = vmul.f32 %v263_v11, %v263_v11  ;;  %v286_v18 = vsub.f32 %v2934_v22, %v1990_v20  ;;  %v2940_v57 = vld [vmem:[#allocation19_spill] sm:$0xff]  ;;  %v2941_v9 = vld [vmem:[#allocation26_spill] sm:$0xff] }
  0xca   :  { %v325_v10 = vadd.f32 %v324_v27, %v294_v7  ;;  %v315_v60 = vmul.f32 %v283_v44, %v283_v44  ;;  %v316_v24 = vmul.f32 %v284_v15, %v284_v15  ;;  %v266_v31 = vsub.f32 %v2935_v28, %v1974_v6  ;;  %v2942_v27 = vld [vmem:[#allocation22_spill] sm:$0xff] }
  0xcb   :  { %v337_v58 = vadd.f32 %v336_v16, %v305_v19  ;;  %v296_v56 = vmul.f32 %v264_v46, %v264_v46  ;;  %v287_v0 = vsub.f32 %v2936_v33, %v1990_v20  ;;  %v297_v30 = vmul.f32 %v265_v36, %v265_v36  ;;  %v2943_v19 = vld [vmem:[#allocation28_spill] sm:$0xff] }
  0xcc   :  { %v326_v39 = vadd.f32 %v325_v10, %v295_v62  ;;  %v317_v25 = vmul.f32 %v285_v49, %v285_v49  ;;  %v350_v1 = vadd.f32 %v316_v24, %v315_v60  ;;  %v288_v61 = vsub.f32 %v2937_v47, %v1990_v20  ;;  %v2944_v62 = vld [vmem:[#allocation25_spill] sm:$0xff] }
  0xcd   :  { %v338_v26 = vadd.f32 %v337_v58, %v306_v5  ;;  %v275_v50 = vsub.f32 %v2938_v2, %v2008_v23  ;;  %v276_v35 = vsub.f32 %v2939_v45, %v2008_v23  ;;  %v318_v55 = vmul.f32 %v286_v18, %v286_v18 }
  0xce   :  { %v327_v11 = vadd.f32 %v326_v39, %v296_v56  ;;  %v351_v46 = vadd.f32 %v350_v1, %v317_v25  ;;  %v277_v4 = vsub.f32 %v2940_v57, %v2008_v23  ;;  %v298_v48 = vmul.f32 %v266_v31, %v266_v31  ;;  %v2945_v56 = vld [vmem:[#allocation27_spill] sm:$0xff]  ;;  %v2946_v1 = vld [vmem:[#allocation29_spill] sm:$0xff] }
  0xcf   :  { %339 = vadd.xlane.f32.xlu1 %v338_v26  ;;  %v289_v44 = vsub.f32 %v2941_v9, %v1990_v20  ;;  %v319_v13 = vmul.f32 %v287_v0, %v287_v0  ;;  %v307_v15 = vmul.f32 %v275_v50, %v275_v50  ;;  %v278_v17 = vsub.f32 %v2942_v27, %v2008_v23  ;;  %v2947_v50 = vld [vmem:[#allocation30_spill] sm:$0xff] }
  0xd0   :  { %v328_v36 = vadd.f32 %v327_v11, %v297_v30  ;;  %v352_v7 = vadd.f32 %v351_v46, %v318_v55  ;;  %v308_v49 = vmul.f32 %v276_v35, %v276_v35  ;;  %v290_v5 = vsub.f32 %v2943_v19, %v1990_v20 }
  0xd1   :  { %v320_v16 = vmul.f32 %v288_v61, %v288_v61  ;;  %v279_v10 = vsub.f32 %v2944_v62, %v2008_v23  ;;  %v309_v60 = vmul.f32 %v277_v4, %v277_v4  ;;  %v321_v58 = vmul.f32 %v289_v44, %v289_v44 }
  0xd2   :  { %v329_v22 = vadd.f32 %v328_v36, %v298_v48  ;;  %v353_v18 = vadd.f32 %v352_v7, %v319_v13  ;;  %v341_v24 = vadd.f32 %v308_v49, %v307_v15  ;;  %v280_v33 = vsub.f32 %v2945_v56, %v2008_v23 }
  0xd3   :  { %v310_v0 = vmul.f32 %v278_v17, %v278_v17  ;;  %v322_v39 = vmul.f32 %v290_v5, %v290_v5  ;;  %v281_v26 = vsub.f32 %v2946_v1, %v2008_v23  ;;  %v311_v47 = vmul.f32 %v279_v10, %v279_v10 }
  0xd4   :  { %330 = vadd.xlane.f32.xlu0 %v329_v22  ;;  %v354_v31 = vadd.f32 %v353_v18, %v320_v16  ;;  %v342_v30 = vadd.f32 %v341_v24, %v309_v60  ;;  %v282_v45 = vsub.f32 %v2947_v50, %v2008_v23  ;;  %v312_v35 = vmul.f32 %v280_v33, %v280_v33  ;;  %v370_v50 = vld [vmem:[%s2868_s1 + $0x18] sm:$0xff] }
  0xd5   :  { %v313_v55 = vmul.f32 %v281_v26, %v281_v26  ;;  %v1563_v9 = vmov 0   ;;  %v369_v26 = vld [vmem:[%s2868_s1 + $0x10] sm:$0xff] }
  0xd6   :  { %v355_v25 = vadd.f32 %v354_v31, %v321_v58  ;;  %v343_v61 = vadd.f32 %v342_v30, %v310_v0  ;;  %v314_v57 = vmul.f32 %v282_v45, %v282_v45  ;;  %1274 = vset.pattern.permute.xlu1 %v1563_v9  ;;  %1273 = vset.pattern.permute.xlu0 %v1563_v9  ;;  %v368_v58 = vld [vmem:[%s2868_s1 + $0x8] sm:$0xff] }
  0xd8   :  { %v356_v2 = vadd.f32 %v355_v25, %v322_v39  ;;  %v344_v11 = vadd.f32 %v343_v61, %v311_v47  ;;  %v367_v39 = vld [vmem:[%s2868_s1] sm:$0xff] }
  0xda   :  { %357 = vadd.xlane.f32.xlu1 %v356_v2  ;;  %v345_v46 = vadd.f32 %v344_v11, %v312_v35  ;;  %v383_v11 = vld [vmem:[%s2869_s2] sm:$0xff] }
  0xdc   :  { %v346_v4 = vadd.f32 %v345_v46, %v313_v55 }
  0xde   :  { %v347_v48 = vadd.f32 %v346_v4, %v314_v57  ;;  %v384_v57 = vld [vmem:[%s2869_s2 + $0x8] sm:$0xff] }
  0xe0   :  { %348 = vadd.xlane.f32.xlu0 %v347_v48 }
 0x143   :  { %v240_v44 = vpop.xlane.xlu1 %239 }
 0x147   :  { %v231_v13 = vpop.xlane.xlu0 %230 }
 0x14c   :  { %v258_v15 = vpop.xlane.xlu1 %257 }
 0x152   :  { %v249_v36 = vpop.xlane.xlu0 %248 }
 0x158   :  { %v340_v7 = vpop.xlane.xlu1 %339 }
 0x159   :  { %v360_v27 = vadd.f32 %v340_v7, %v240_v44 }
 0x15b   :  { %v364_v17 = vmul.f32 0.00048828125, %v360_v27  ;;  %v2948_v27 = vld [vmem:[#allocation2_spill] sm:$0xff] }
 0x15d   :  { %v372_v49 = vadd.f32 1e-05, %v364_v17  ;;  %v331_v19 = vpop.xlane.xlu0 %330 }
 0x15e   :  { %v359_v5 = vadd.f32 %v331_v19, %v231_v13 }
 0x15f   :  { %1275 = vrsqrt.f32 %v372_v49  ;;  %v2949_v49 = vld [vmem:[#allocation3_spill] sm:$0xff] }
 0x160   :  { %v363_v16 = vmul.f32 0.00048828125, %v359_v5 }
 0x162   :  { %v371_v62 = vadd.f32 1e-05, %v363_v16 }
 0x163   :  { %v358_v10 = vpop.xlane.xlu1 %357 }
 0x164   :  { %1277 = vrsqrt.f32 %v371_v62  ;;  %v362_v22 = vadd.f32 %v358_v10, %v258_v15  ;;  %v2950_v62 = vld [vmem:[#allocation7_spill] sm:$0xff] }
 0x166   :  { %v366_v60 = vmul.f32 0.00048828125, %v362_v22  ;;  %v2951_v22 = vld [vmem:[#allocation8_spill] sm:$0xff] }
 0x168   :  { %v374_v0 = vadd.f32 1e-05, %v366_v60 }
 0x169   :  { %v349_v18 = vpop.xlane.xlu0 %348 }
 0x16a   :  { %v361_v24 = vadd.f32 %v349_v18, %v249_v36 }
 0x16c   :  { %v1276_v31 = vpop.eup %1275  ;;  %v365_v56 = vmul.f32 0.00048828125, %v361_v24 }
 0x16d   :  { %v380_v33 = vmul.f32 %v1276_v31, %v368_v58 }
 0x16e   :  { %v373_v30 = vadd.f32 1e-05, %v365_v56 }
 0x16f   :  { %402 = vperm.xlu1 %1274, %v380_v33   ;;  %v388_v46 = vmul.f32 %v380_v33, %v1968_v38  ;;  %v386_v38 = vld [vmem:[%s2869_s2 + $0x18] sm:$0xff] }
 0x170   :  { %1279 = vrsqrt.f32 %v373_v30 }
 0x171   :  { %v1278_v25 = vpop.eup %1277  ;;  %1281 = vrsqrt.f32 %v374_v0  ;;  %v392_v4 = vsub.f32 %v384_v57, %v388_v46 }
 0x172   :  { %v379_v1 = vmul.f32 %v1278_v25, %v367_v39 }
 0x174   :  { %397 = vperm.xlu0 %1273, %v379_v1   ;;  %v387_v35 = vmul.f32 %v379_v1, %v1974_v6  ;;  %v385_v6 = vld [vmem:[%s2869_s2 + $0x10] sm:$0xff] }
 0x176   :  { %v391_v55 = vsub.f32 %v383_v11, %v387_v35 }
 0x17d   :  { %v1280_v47 = vpop.eup %1279 }
 0x17e   :  { %v381_v61 = vmul.f32 %v1280_v47, %v369_v26  ;;  %v1282_v2 = vpop.eup %1281 }
 0x17f   :  { %v382_v45 = vmul.f32 %v1282_v2, %v370_v50 }
 0x180   :  { %407 = vperm.xlu1 %1274, %v381_v61   ;;  %v389_v48 = vmul.f32 %v381_v61, %v2008_v23 }
 0x181   :  { %v390_v44 = vmul.f32 %v382_v45, %v1990_v20 }
 0x182   :  { %v393_v9 = vsub.f32 %v385_v6, %v389_v48 }
 0x183   :  { %v394_v13 = vsub.f32 %v386_v38, %v390_v44 }
 0x184   :  { %412 = vperm.xlu1 %1274, %v382_v45  }
 0x188   :  { %449 = vperm.xlu1 %1274, %v391_v55  }
 0x18c   :  { %454 = vperm.xlu1 %1274, %v392_v4  }
 0x190   :  { %459 = vperm.xlu1 %1274, %v393_v9  }
 0x194   :  { %464 = vperm.xlu1 %1274, %v394_v13  }
 0x1ea   :  { %v2132_v15 = vpop.permute.xlu1 %402 }
 0x1ef   :  { %v398_v23 = vpop.permute.xlu0 %397 }
 0x1f0   :  { %v415_v17 = vmul.f32 %v398_v23, %v2948_v27  ;;  %v416_v19 = vmul.f32 %v398_v23, %v2949_v49  ;;  %v417_v20 = vmul.f32 %v398_v23, %v1620_v8  ;;  %v418_v5 = vmul.f32 %v398_v23, %v1633_v12 }
 0x1f1   :  { %v419_v16 = vmul.f32 %v398_v23, %v1667_v21  ;;  %v420_v10 = vmul.f32 %v398_v23, %v2950_v62  ;;  %v421_v18 = vmul.f32 %v398_v23, %v2951_v22  ;;  %v422_v33 = vmul.f32 %v398_v23, %v1746_v43 }
 0x1f2   :  { %v787_v8 = vmul.f32 %v1772_v52, %v398_v23  ;;  %v788_v1 = vmul.f32 %v1777_v53, %v398_v23  ;;  %v789_v52 = vmul.f32 %v1795_v59, %v398_v23  ;;  %v790_v2 = vmul.f32 %v1813_v3, %v398_v23 }
 0x1f3   :  { %v791_v53 = vmul.f32 %v1848_v34, %v398_v23  ;;  %v792_v59 = vmul.f32 %v1874_v54, %v398_v23  ;;  %v793_v3 = vmul.f32 %v2932_v14, %v398_v23  ;;  %v794_v34 = vmul.f32 %v2935_v28, %v398_v23 }
 0x1fb   :  { %v2134_v36 = vpop.permute.xlu1 %407 }
 0x1ff   :  { %v2136_v7 = vpop.permute.xlu1 %412 }
 0x203   :  { %v450_v60 = vpop.permute.xlu1 %449 }
 0x204   :  { %v2145_v24 = vadd.f32 %v450_v60, %v415_v17  ;;  %v2147_v58 = vadd.f32 %v450_v60, %v416_v19  ;;  %v2149_v31 = vadd.f32 %v450_v60, %v417_v20  ;;  %v2151_v56 = vadd.f32 %v450_v60, %v418_v5 }
 0x205   :  { %v2155_v12 = vadd.f32 %v450_v60, %v419_v16  ;;  %v2157_v21 = vadd.f32 %v450_v60, %v420_v10  ;;  %v2159_v0 = vadd.f32 %v450_v60, %v421_v18  ;;  %v2165_v26 = vadd.f32 %v450_v60, %v422_v33  ;;  %v2952_v18 = vld [vmem:[#allocation4_spill] sm:$0xff]  ;;  %v2953_v33 = vld [vmem:[#allocation5_spill] sm:$0xff] }
 0x206   :  { %v1144_v30 = vmul.f32 -1.442695, %v2145_v24  ;;  %v1145_v39 = vmul.f32 -1.442695, %v2147_v58  ;;  %v1146_v25 = vmul.f32 -1.442695, %v2149_v31  ;;  %v2170_v61 = vadd.f32 %v787_v8, %v450_v60 }
 0x207   :  { %v1147_v43 = vmul.f32 -1.442695, %v2151_v56  ;;  %v1148_v47 = vmul.f32 -1.442695, %v2155_v12  ;;  %v1149_v50 = vmul.f32 -1.442695, %v2157_v21  ;;  %v2174_v45 = vadd.f32 %v788_v1, %v450_v60 }
 0x208   :  { %1283 = vpow2.f32 %v1144_v30  ;;  %v1150_v35 = vmul.f32 -1.442695, %v2159_v0  ;;  %v2178_v11 = vadd.f32 %v789_v52, %v450_v60  ;;  %v1151_v55 = vmul.f32 -1.442695, %v2165_v26 }
 0x209   :  { %1285 = vpow2.f32 %v1145_v39  ;;  %v2182_v46 = vadd.f32 %v790_v2, %v450_v60  ;;  %v2185_v57 = vadd.f32 %v791_v53, %v450_v60  ;;  %v1208_v4 = vmul.f32 -1.442695, %v2170_v61 }
 0x20a   :  { %1287 = vpow2.f32 %v1146_v25  ;;  %v2189_v48 = vadd.f32 %v792_v59, %v450_v60  ;;  %v1209_v6 = vmul.f32 -1.442695, %v2174_v45  ;;  %v2192_v54 = vadd.f32 %v793_v3, %v450_v60  ;;  %v2954_v25 = vld [vmem:[#allocation6_spill] sm:$0xff] }
 0x20b   :  { %1289 = vpow2.f32 %v1147_v43  ;;  %v1210_v9 = vmul.f32 -1.442695, %v2178_v11  ;;  %v2195_v44 = vadd.f32 %v794_v34, %v450_v60  ;;  %v1211_v14 = vmul.f32 -1.442695, %v2182_v46  ;;  %v2955_v43 = vld [vmem:[#allocation9_spill] sm:$0xff] }
 0x20c   :  { %1291 = vpow2.f32 %v1148_v47  ;;  %v1212_v38 = vmul.f32 -1.442695, %v2185_v57  ;;  %v1213_v28 = vmul.f32 -1.442695, %v2189_v48  ;;  %v1214_v13 = vmul.f32 -1.442695, %v2192_v54 }
 0x20d   :  { %1293 = vpow2.f32 %v1149_v50  ;;  %v1215_v23 = vmul.f32 -1.442695, %v2195_v44  ;;  %v423_v60 = vmul.f32 %v2132_v15, %v2952_v18  ;;  %v424_v8 = vmul.f32 %v2132_v15, %v2953_v33  ;;  %v2956_v50 = vld [vmem:[#allocation10_spill] sm:$0xff] }
 0x20e   :  { %1295 = vpow2.f32 %v1150_v35  ;;  %v425_v1 = vmul.f32 %v2132_v15, %v2954_v25  ;;  %v426_v52 = vmul.f32 %v2132_v15, %v2955_v43  ;;  %v427_v53 = vmul.f32 %v2132_v15, %v2956_v50  ;;  %v2957_v35 = vld [vmem:[#allocation11_spill] sm:$0xff] }
 0x20f   :  { %1297 = vpow2.f32 %v1151_v55  ;;  %v428_v59 = vmul.f32 %v2132_v15, %v2957_v35 }
 0x210   :  { %1299 = vpow2.f32 %v1208_v4  ;;  %v2958_v4 = vld [vmem:[#allocation12_spill] sm:$0xff] }
 0x211   :  { %1301 = vpow2.f32 %v1209_v6  ;;  %v429_v34 = vmul.f32 %v2132_v15, %v2958_v4  ;;  %v2959_v6 = vld [vmem:[#allocation15_spill] sm:$0xff] }
 0x212   :  { %1303 = vpow2.f32 %v1210_v9  ;;  %v430_v9 = vmul.f32 %v2132_v15, %v2959_v6 }
 0x213   :  { %1305 = vpow2.f32 %v1211_v14 }
 0x214   :  { %1307 = vpow2.f32 %v1212_v38  ;;  %v2218_v38 = vpop.permute.xlu1 %454 }
 0x215   :  { %v1284_v27 = vpop.eup %1283  ;;  %1309 = vpow2.f32 %v1213_v28  ;;  %v2268_v50 = vadd.f32 %v2218_v38, %v429_v34 }
 0x216   :  { %v1286_v17 = vpop.eup %1285  ;;  %v595_v49 = vadd.f32 1.0, %v1284_v27  ;;  %1311 = vpow2.f32 %v1214_v13  ;;  %v795_v13 = vmul.f32 %v1724_v37, %v2132_v15 }
 0x217   :  { %v1288_v19 = vpop.eup %1287  ;;  %v596_v20 = vadd.f32 1.0, %v1286_v17  ;;  %1313 = vpow2.f32 %v1215_v23  ;;  %v796_v23 = vmul.f32 %v1736_v41, %v2132_v15  ;;  %v2235_v41 = vadd.f32 %v2218_v38, %v423_v60 }
 0x218   :  { %v1290_v5 = vpop.eup %1289  ;;  %v597_v16 = vadd.f32 1.0, %v1288_v19  ;;  %1315 = vrcp.f32 %v595_v49  ;;  %v797_v49 = vmul.f32 %v1741_v42, %v2132_v15  ;;  %v2228_v19 = vmul.f32 %v1767_v51, %v2132_v15 }
 0x219   :  { %v1292_v62 = vpop.eup %1291  ;;  %v598_v10 = vadd.f32 1.0, %v1290_v5  ;;  %1317 = vrcp.f32 %v596_v20  ;;  %v2239_v42 = vmul.f32 %v1843_v32, %v2132_v15  ;;  %v2242_v51 = vadd.f32 %v2218_v38, %v424_v8 }
 0x21a   :  { %v1294_v22 = vpop.eup %1293  ;;  %v599_v30 = vadd.f32 1.0, %v1292_v62  ;;  %1319 = vrcp.f32 %v597_v16  ;;  %v2232_v16 = vmul.f32 %v1808_v63, %v2132_v15  ;;  %v2246_v63 = vmul.f32 %v1856_v40, %v2132_v15 }
 0x21b   :  { %v1296_v39 = vpop.eup %1295  ;;  %v600_v47 = vadd.f32 1.0, %v1294_v22  ;;  %1321 = vrcp.f32 %v598_v10  ;;  %v2249_v60 = vadd.f32 %v2218_v38, %v425_v1  ;;  %v2253_v32 = vmul.f32 %v1900_v29, %v2132_v15 }
 0x21c   :  { %v1298_v2 = vpop.eup %1297  ;;  %v601_v55 = vadd.f32 1.0, %v1296_v39  ;;  %1323 = vrcp.f32 %v599_v30  ;;  %v2256_v8 = vadd.f32 %v2218_v38, %v426_v52  ;;  %v2259_v40 = vadd.f32 %v2218_v38, %v427_v53 }
 0x21d   :  { %v1300_v3 = vpop.eup %1299  ;;  %v602_v14 = vadd.f32 1.0, %v1298_v2  ;;  %1325 = vrcp.f32 %v600_v47  ;;  %v1152_v43 = vmul.f32 -1.442695, %v2235_v41  ;;  %v2263_v2 = vadd.f32 %v2218_v38, %v428_v59 }
 0x21e   :  { %v1302_v28 = vpop.eup %1301  ;;  %1327 = vrcp.f32 %v601_v55  ;;  %v947_v27 = vadd.f32 1.0, %v1300_v3  ;;  %v1153_v29 = vmul.f32 -1.442695, %v2242_v51  ;;  %v1154_v53 = vmul.f32 -1.442695, %v2249_v60 }
 0x21f   :  { %v1304_v17 = vpop.eup %1303  ;;  %1329 = vrcp.f32 %v602_v14  ;;  %v948_v20 = vadd.f32 1.0, %v1302_v28  ;;  %v2273_v3 = vadd.f32 %v2218_v38, %v430_v9  ;;  %v1155_v59 = vmul.f32 -1.442695, %v2256_v8 }
 0x220   :  { %v1306_v5 = vpop.eup %1305  ;;  %v949_v37 = vadd.f32 1.0, %v1304_v17  ;;  %1331 = vrcp.f32 %v947_v27  ;;  %v2282_v34 = vadd.f32 %v795_v13, %v2218_v38  ;;  %v2290_v9 = vadd.f32 %v796_v23, %v2218_v38 }
 0x221   :  { %v1308_v62 = vpop.eup %1307  ;;  %v950_v10 = vadd.f32 1.0, %v1306_v5  ;;  %1333 = vrcp.f32 %v948_v20  ;;  %v2298_v13 = vadd.f32 %v797_v49, %v2218_v38  ;;  %v2307_v23 = vadd.f32 %v2228_v19, %v2218_v38 }
 0x222   :  { %v1310_v22 = vpop.eup %1309  ;;  %v951_v18 = vadd.f32 1.0, %v1308_v62  ;;  %1335 = vrcp.f32 %v949_v37  ;;  %v1216_v49 = vmul.f32 -1.442695, %v2282_v34  ;;  %v1217_v19 = vmul.f32 -1.442695, %v2290_v9 }
 0x223   :  { %v1312_v33 = vpop.eup %1311  ;;  %v952_v30 = vadd.f32 1.0, %v1310_v22  ;;  %1337 = vrcp.f32 %v950_v10 }
 0x224   :  { %v1314_v39 = vpop.eup %1313  ;;  %v953_v25 = vadd.f32 1.0, %v1312_v33  ;;  %1339 = vrcp.f32 %v951_v18  ;;  %v1218_v18 = vmul.f32 -1.442695, %v2298_v13 }
 0x225   :  { %v1316_v1 = vpop.eup %1315  ;;  %v954_v47 = vadd.f32 1.0, %v1314_v39  ;;  %1341 = vrcp.f32 %v952_v30  ;;  %v2342_v30 = vadd.f32 %v2253_v32, %v2218_v38 }
 0x226   :  { %v1318_v15 = vpop.eup %1317  ;;  %v691_v52 = vmul.f32 %v1316_v1, %v2145_v24  ;;  %1343 = vrcp.f32 %v953_v25  ;;  %v1156_v24 = vmul.f32 -1.442695, %v2259_v40 }
 0x227   :  { %v1320_v35 = vpop.eup %1319  ;;  %v692_v55 = vmul.f32 %v1318_v15, %v2147_v58  ;;  %1345 = vrcp.f32 %v954_v47 }
 0x228   :  { %v1322_v4 = vpop.eup %1321  ;;  %v693_v6 = vmul.f32 %v1320_v35, %v2149_v31  ;;  %723 = vst [vmem:[%s2870_s3] sm:$0xff] %v691_v52  ;;  %1347 = vpow2.f32 %v1152_v43  ;;  %v1157_v31 = vmul.f32 -1.442695, %v2263_v2 }
 0x229   :  { %v1324_v58 = vpop.eup %1323  ;;  %v694_v14 = vmul.f32 %v1322_v4, %v2151_v56  ;;  %724 = vst [vmem:[%s2870_s3 + $0x8] sm:$0xff] %v692_v55  ;;  %1349 = vpow2.f32 %v1153_v29  ;;  %v1158_v56 = vmul.f32 -1.442695, %v2268_v50  ;;  %v1223_v29 = vmul.f32 -1.442695, %v2342_v30 }
 0x22a   :  { %v1326_v28 = vpop.eup %1325  ;;  %v695_v27 = vmul.f32 %v1324_v58, %v2155_v12  ;;  %725 = vst [vmem:[%s2870_s3 + $0x10] sm:$0xff] %v693_v6  ;;  %1351 = vpow2.f32 %v1154_v53  ;;  %v1159_v12 = vmul.f32 -1.442695, %v2273_v3  ;;  %v1539_v58 = vld [vmem:[%s2867_s0 + $0x80] sm:$0xff] }
 0x22b   :  { %v1328_v17 = vpop.eup %1327  ;;  %v696_v20 = vmul.f32 %v1326_v28, %v2157_v21  ;;  %726 = vst [vmem:[%s2870_s3 + $0x18] sm:$0xff] %v694_v14  ;;  %1353 = vpow2.f32 %v1155_v59  ;;  %v2315_v21 = vadd.f32 %v2232_v16, %v2218_v38  ;;  %v431_v14 = vmul.f32 %v1539_v58, %v2134_v36 }
 0x22c   :  { %v1330_v5 = vpop.eup %1329  ;;  %v697_v37 = vmul.f32 %v1328_v17, %v2159_v0  ;;  %727 = vst [vmem:[%s2870_s3 + $0x20] sm:$0xff] %v695_v27  ;;  %1355 = vpow2.f32 %v1156_v24  ;;  %v2324_v0 = vadd.f32 %v2239_v42, %v2218_v38  ;;  %v1541_v17 = vld [vmem:[%s2867_s0 + $0x90] sm:$0xff] }
 0x22d   :  { %v1332_v62 = vpop.eup %1331  ;;  %v698_v10 = vmul.f32 %v1330_v5, %v2165_v26  ;;  %728 = vst [vmem:[%s2870_s3 + $0x28] sm:$0xff] %v696_v20  ;;  %1357 = vpow2.f32 %v1157_v31  ;;  %v2333_v26 = vadd.f32 %v2246_v63, %v2218_v38  ;;  %v1220_v25 = vmul.f32 -1.442695, %v2315_v21  ;;  %v1540_v31 = vld [vmem:[%s2867_s0 + $0x88] sm:$0xff] }
 0x22e   :  { %v1334_v22 = vpop.eup %1333  ;;  %729 = vst [vmem:[%s2870_s3 + $0x30] sm:$0xff] %v697_v37  ;;  %v1043_v16 = vmul.f32 %v1332_v62, %v2170_v61  ;;  %1359 = vpow2.f32 %v1158_v56  ;;  %v1219_v61 = vmul.f32 -1.442695, %v2307_v23  ;;  %v1221_v38 = vmul.f32 -1.442695, %v2324_v0  ;;  %v1543_v62 = vld [vmem:[%s2867_s0 + $0xa0] sm:$0xff] }
 0x22f   :  { %v1336_v33 = vpop.eup %1335  ;;  %730 = vst [vmem:[%s2870_s3 + $0x38] sm:$0xff] %v698_v10  ;;  %v1044_v42 = vmul.f32 %v1334_v22, %v2174_v45  ;;  %1361 = vpow2.f32 %v1159_v12  ;;  %v1222_v1 = vmul.f32 -1.442695, %v2333_v26  ;;  %v432_v28 = vmul.f32 %v1540_v31, %v2134_v36  ;;  %v1542_v12 = vld [vmem:[%s2867_s0 + $0x98] sm:$0xff]  ;;  %v1553_v31 = vld [vmem:[%s2867_s0 + $0x1b0] sm:$0xff] }
 0x230   :  { %v1338_v39 = vpop.eup %1337  ;;  %v1045_v63 = vmul.f32 %v1336_v33, %v2178_v11  ;;  %1240 = vst [vmem:[%s2870_s3 + $0x100] sm:$0xff] %v1043_v16  ;;  %1363 = vpow2.f32 %v1216_v49  ;;  %v433_v20 = vmul.f32 %v1541_v17, %v2134_v36  ;;  %v434_v5 = vmul.f32 %v1542_v12, %v2134_v36  ;;  %v1545_v33 = vld [vmem:[%s2867_s0 + $0xb0] sm:$0xff]  ;;  %v1554_v12 = vld [vmem:[%s2867_s0 + $0x1b8] sm:$0xff] }
 0x231   :  { %v1340_v43 = vpop.eup %1339  ;;  %v1046_v45 = vmul.f32 %v1338_v39, %v2182_v46  ;;  %1241 = vst [vmem:[%s2870_s3 + $0x108] sm:$0xff] %v1044_v42  ;;  %1365 = vpow2.f32 %v1217_v19  ;;  %v435_v10 = vmul.f32 %v1543_v62, %v2134_v36  ;;  %v1544_v19 = vld [vmem:[%s2867_s0 + $0xa8] sm:$0xff]  ;;  %v437_v42 = vmul.f32 %v1545_v33, %v2134_v36 }
 0x232   :  { %v1342_v32 = vpop.eup %1341  ;;  %v1047_v11 = vmul.f32 %v1340_v43, %v2185_v57  ;;  %1242 = vst [vmem:[%s2870_s3 + $0x110] sm:$0xff] %v1045_v63  ;;  %1367 = vpow2.f32 %v1218_v18  ;;  %v436_v22 = vmul.f32 %v1544_v19, %v2134_v36 }
 0x233   :  { %v1344_v47 = vpop.eup %1343  ;;  %v1048_v46 = vmul.f32 %v1342_v32, %v2189_v48  ;;  %1243 = vst [vmem:[%s2870_s3 + $0x118] sm:$0xff] %v1046_v45  ;;  %1369 = vpow2.f32 %v1219_v61  ;;  %v1546_v61 = vld [vmem:[%s2867_s0 + $0xb8] sm:$0xff]  ;;  %v1547_v45 = vld [vmem:[%s2867_s0 + $0x180] sm:$0xff]  ;;  %v1548_v32 = vld [vmem:[%s2867_s0 + $0x188] sm:$0xff] }
 0x234   :  { %v1346_v15 = vpop.eup %1345  ;;  %v1049_v57 = vmul.f32 %v1344_v47, %v2192_v54  ;;  %1244 = vst [vmem:[%s2870_s3 + $0x120] sm:$0xff] %v1047_v11  ;;  %1371 = vpow2.f32 %v1220_v25  ;;  %v438_v39 = vmul.f32 %v1546_v61, %v2134_v36  ;;  %v2411_v25 = vpop.permute.xlu1 %459  ;;  %v2421_v11 = vmul.f32 %v1548_v32, %v2134_v36 }
 0x235   :  { %v1348_v52 = vpop.eup %1347  ;;  %v1050_v53 = vmul.f32 %v1346_v15, %v2195_v44  ;;  %1245 = vst [vmem:[%s2870_s3 + $0x128] sm:$0xff] %v1048_v46  ;;  %1373 = vpow2.f32 %v1221_v38  ;;  %v803_v38 = vmul.f32 %v1547_v45, %v2134_v36  ;;  %v1549_v46 = vld [vmem:[%s2867_s0 + $0x190] sm:$0xff]  ;;  %v1550_v15 = vld [vmem:[%s2867_s0 + $0x198] sm:$0xff]  ;;  %v2476_v61 = vadd.f32 %v2411_v25, %v436_v22 }
 0x236   :  { %v1350_v48 = vpop.eup %1349  ;;  %1246 = vst [vmem:[%s2870_s3 + $0x130] sm:$0xff] %v1049_v57  ;;  %v603_v35 = vadd.f32 1.0, %v1348_v52  ;;  %1375 = vpow2.f32 %v1222_v1  ;;  %v2433_v57 = vmul.f32 %v1550_v15, %v2134_v36 }
 0x237   :  { %v1352_v54 = vpop.eup %1351  ;;  %1247 = vst [vmem:[%s2870_s3 + $0x138] sm:$0xff] %v1050_v53  ;;  %v604_v55 = vadd.f32 1.0, %v1350_v48  ;;  %1377 = vpow2.f32 %v1223_v29  ;;  %v2427_v29 = vmul.f32 %v1549_v46, %v2134_v36  ;;  %v1551_v48 = vld [vmem:[%s2867_s0 + $0x1a0] sm:$0xff] }
 0x238   :  { %v1354_v44 = vpop.eup %1353  ;;  %v605_v59 = vadd.f32 1.0, %v1352_v54  ;;  %1379 = vrcp.f32 %v603_v35  ;;  %v2439_v35 = vmul.f32 %v1551_v48, %v2134_v36 }
 0x239   :  { %v1356_v4 = vpop.eup %1355  ;;  %v606_v6 = vadd.f32 1.0, %v1354_v44  ;;  %1381 = vrcp.f32 %v604_v55  ;;  %v2442_v55 = vadd.f32 %v2411_v25, %v431_v14  ;;  %v2457_v14 = vmul.f32 %v1553_v31, %v2134_v36 }
 0x23a   :  { %v1358_v24 = vpop.eup %1357  ;;  %v607_v27 = vadd.f32 1.0, %v1356_v4  ;;  %1383 = vrcp.f32 %v605_v59  ;;  %v1552_v59 = vld [vmem:[%s2867_s0 + $0x1a8] sm:$0xff] }
 0x23b   :  { %v1360_v56 = vpop.eup %1359  ;;  %v608_v37 = vadd.f32 1.0, %v1358_v24  ;;  %1385 = vrcp.f32 %v606_v6  ;;  %v2448_v4 = vmul.f32 %v1552_v59, %v2134_v36  ;;  %v2451_v24 = vadd.f32 %v2411_v25, %v432_v28 }
 0x23c   :  { %v1362_v49 = vpop.eup %1361  ;;  %v609_v16 = vadd.f32 1.0, %v1360_v56  ;;  %1387 = vrcp.f32 %v607_v27  ;;  %v2460_v56 = vadd.f32 %v2411_v25, %v433_v20  ;;  %v2466_v28 = vmul.f32 %v1554_v12, %v2134_v36 }
 0x23d   :  { %v1364_v18 = vpop.eup %1363  ;;  %v610_v63 = vadd.f32 1.0, %v1362_v49  ;;  %1389 = vrcp.f32 %v608_v37  ;;  %v2469_v49 = vadd.f32 %v2411_v25, %v434_v5  ;;  %v1160_v20 = vmul.f32 -1.442695, %v2442_v55 }
 0x23e   :  { %v1366_v43 = vpop.eup %1365  ;;  %1391 = vrcp.f32 %v609_v16  ;;  %v955_v1 = vadd.f32 1.0, %v1364_v18  ;;  %v2472_v16 = vadd.f32 %v2411_v25, %v435_v10  ;;  %v1161_v36 = vmul.f32 -1.442695, %v2451_v24 }
 0x23f   :  { %v1368_v47 = vpop.eup %1367  ;;  %1393 = vrcp.f32 %v610_v63  ;;  %v956_v52 = vadd.f32 1.0, %v1366_v43  ;;  %v2481_v43 = vadd.f32 %v2411_v25, %v437_v42  ;;  %v1162_v10 = vmul.f32 -1.442695, %v2460_v56 }
 0x240   :  { %v1370_v53 = vpop.eup %1369  ;;  %v957_v54 = vadd.f32 1.0, %v1368_v47  ;;  %1395 = vrcp.f32 %v955_v1  ;;  %v2486_v1 = vadd.f32 %v2411_v25, %v438_v39  ;;  %v1163_v22 = vmul.f32 -1.442695, %v2469_v49 }
 0x241   :  { %v1372_v44 = vpop.eup %1371  ;;  %v958_v6 = vadd.f32 1.0, %v1370_v53  ;;  %1397 = vrcp.f32 %v956_v52  ;;  %v2495_v42 = vadd.f32 %v803_v38, %v2411_v25  ;;  %v2504_v39 = vadd.f32 %v2421_v11, %v2411_v25 }
 0x242   :  { %v1374_v58 = vpop.eup %1373  ;;  %v959_v27 = vadd.f32 1.0, %v1372_v44  ;;  %1399 = vrcp.f32 %v957_v54  ;;  %v2513_v38 = vadd.f32 %v2427_v29, %v2411_v25  ;;  %v2522_v11 = vadd.f32 %v2433_v57, %v2411_v25 }
 0x243   :  { %v1376_v17 = vpop.eup %1375  ;;  %v960_v37 = vadd.f32 1.0, %v1374_v58  ;;  %1401 = vrcp.f32 %v958_v6  ;;  %v1224_v29 = vmul.f32 -1.442695, %v2495_v42  ;;  %v1225_v57 = vmul.f32 -1.442695, %v2504_v39 }
 0x244   :  { %v1378_v62 = vpop.eup %1377  ;;  %v961_v19 = vadd.f32 1.0, %v1376_v17  ;;  %1403 = vrcp.f32 %v959_v27  ;;  %v1226_v27 = vmul.f32 -1.442695, %v2513_v38  ;;  %v2557_v12 = vadd.f32 %v2466_v28, %v2411_v25 }
 0x245   :  { %v1380_v18 = vpop.eup %1379  ;;  %v962_v33 = vadd.f32 1.0, %v1378_v62  ;;  %1405 = vrcp.f32 %v960_v37 }
 0x246   :  { %v1382_v63 = vpop.eup %1381  ;;  %v699_v5 = vmul.f32 %v1380_v18, %v2235_v41  ;;  %1407 = vrcp.f32 %v961_v19  ;;  %v1164_v41 = vmul.f32 -1.442695, %v2472_v16 }
 0x247   :  { %v1384_v45 = vpop.eup %1383  ;;  %v700_v32 = vmul.f32 %v1382_v63, %v2242_v51  ;;  %1409 = vrcp.f32 %v962_v33  ;;  %v1231_v33 = vmul.f32 -1.442695, %v2557_v12 }
 0x248   :  { %v1386_v47 = vpop.eup %1385  ;;  %v701_v46 = vmul.f32 %v1384_v45, %v2249_v60  ;;  %731 = vst [vmem:[%s2870_s3 + $0x40] sm:$0xff] %v699_v5  ;;  %1411 = vpow2.f32 %v1160_v20  ;;  %v1165_v60 = vmul.f32 -1.442695, %v2476_v61 }
 0x249   :  { %v1388_v51 = vpop.eup %1387  ;;  %v702_v15 = vmul.f32 %v1386_v47, %v2256_v8  ;;  %732 = vst [vmem:[%s2870_s3 + $0x48] sm:$0xff] %v700_v32  ;;  %1413 = vpow2.f32 %v1161_v36  ;;  %v1166_v8 = vmul.f32 -1.442695, %v2481_v43 }
 0x24a   :  { %v1390_v52 = vpop.eup %1389  ;;  %v703_v53 = vmul.f32 %v1388_v51, %v2259_v40  ;;  %733 = vst [vmem:[%s2870_s3 + $0x50] sm:$0xff] %v701_v46  ;;  %1415 = vpow2.f32 %v1162_v10  ;;  %v1167_v40 = vmul.f32 -1.442695, %v2486_v1  ;;  %v1555_v51 = vld [vmem:[%s2867_s0 + $0xc0] sm:$0xff] }
 0x24b   :  { %v1392_v48 = vpop.eup %1391  ;;  %v704_v54 = vmul.f32 %v1390_v52, %v2263_v2  ;;  %734 = vst [vmem:[%s2870_s3 + $0x58] sm:$0xff] %v702_v15  ;;  %1417 = vpow2.f32 %v1163_v22  ;;  %v2530_v2 = vadd.f32 %v2439_v35, %v2411_v25  ;;  %v439_v15 = vmul.f32 %v1555_v51, %v2136_v7 }
 0x24c   :  { %v1394_v44 = vpop.eup %1393  ;;  %v705_v59 = vmul.f32 %v1392_v48, %v2268_v50  ;;  %735 = vst [vmem:[%s2870_s3 + $0x60] sm:$0xff] %v703_v53  ;;  %1419 = vpow2.f32 %v1164_v41  ;;  %v2539_v50 = vadd.f32 %v2448_v4, %v2411_v25  ;;  %v1557_v48 = vld [vmem:[%s2867_s0 + $0xd0] sm:$0xff] }
 0x24d   :  { %v1396_v6 = vpop.eup %1395  ;;  %v706_v58 = vmul.f32 %v1394_v44, %v2273_v3  ;;  %736 = vst [vmem:[%s2870_s3 + $0x68] sm:$0xff] %v704_v54  ;;  %1421 = vpow2.f32 %v1165_v60  ;;  %v2548_v3 = vadd.f32 %v2457_v14, %v2411_v25  ;;  %v1228_v62 = vmul.f32 -1.442695, %v2530_v2  ;;  %v1556_v60 = vld [vmem:[%s2867_s0 + $0xc8] sm:$0xff] }
 0x24e   :  { %v1398_v31 = vpop.eup %1397  ;;  %737 = vst [vmem:[%s2870_s3 + $0x70] sm:$0xff] %v705_v59  ;;  %v1051_v35 = vmul.f32 %v1396_v6, %v2282_v34  ;;  %1423 = vpow2.f32 %v1166_v8  ;;  %v1227_v34 = vmul.f32 -1.442695, %v2522_v11  ;;  %v1229_v25 = vmul.f32 -1.442695, %v2539_v50  ;;  %v1200_v59 = vld [vmem:[%s2867_s0 + $0x1c0] sm:$0xff] }
 0x24f   :  { %v1400_v17 = vpop.eup %1399  ;;  %738 = vst [vmem:[%s2870_s3 + $0x78] sm:$0xff] %v706_v58  ;;  %v1052_v4 = vmul.f32 %v1398_v31, %v2290_v9  ;;  %1425 = vpow2.f32 %v1167_v40  ;;  %v1230_v20 = vmul.f32 -1.442695, %v2548_v3  ;;  %v440_v52 = vmul.f32 %v1556_v60, %v2136_v7  ;;  %v1558_v40 = vld [vmem:[%s2867_s0 + $0xd8] sm:$0xff] }
 0x250   :  { %v1402_v37 = vpop.eup %1401  ;;  %v1053_v14 = vmul.f32 %v1400_v17, %v2298_v13  ;;  %1248 = vst [vmem:[%s2870_s3 + $0x140] sm:$0xff] %v1051_v35  ;;  %1427 = vpow2.f32 %v1224_v29  ;;  %v441_v54 = vmul.f32 %v1557_v48, %v2136_v7  ;;  %v442_v44 = vmul.f32 %v1558_v40, %v2136_v7  ;;  %v1201_v29 = vld [vmem:[%s2867_s0 + $0x1c8] sm:$0xff]  ;;  %v1202_v17 = vld [vmem:[%s2867_s0 + $0x1d0] sm:$0xff] }
 0x251   :  { %v1404_v19 = vpop.eup %1403  ;;  %v1054_v9 = vmul.f32 %v1402_v37, %v2307_v23  ;;  %1249 = vst [vmem:[%s2870_s3 + $0x148] sm:$0xff] %v1052_v4  ;;  %1429 = vpow2.f32 %v1225_v57  ;;  %v1559_v57 = vld [vmem:[%s2867_s0 + $0xe0] sm:$0xff]  ;;  %v1560_v35 = vld [vmem:[%s2867_s0 + $0xe8] sm:$0xff]  ;;  %v1203_v4 = vld [vmem:[%s2867_s0 + $0x1d8] sm:$0xff] }
 0x252   :  { %v1406_v28 = vpop.eup %1405  ;;  %v1055_v13 = vmul.f32 %v1404_v19, %v2315_v21  ;;  %1250 = vst [vmem:[%s2870_s3 + $0x150] sm:$0xff] %v1053_v14  ;;  %1431 = vpow2.f32 %v1226_v27  ;;  %v443_v31 = vmul.f32 %v1559_v57, %v2136_v7  ;;  %v444_v27 = vmul.f32 %v1560_v35, %v2136_v7  ;;  %v1561_v14 = vld [vmem:[%s2867_s0 + $0xf0] sm:$0xff]  ;;  %v1562_v19 = vld [vmem:[%s2867_s0 + $0xf8] sm:$0xff] }
 0x253   :  { %v1408_v18 = vpop.eup %1407  ;;  %v1056_v23 = vmul.f32 %v1406_v28, %v2324_v0  ;;  %1251 = vst [vmem:[%s2870_s3 + $0x158] sm:$0xff] %v1054_v9  ;;  %1433 = vpow2.f32 %v1227_v34  ;;  %v446_v9 = vmul.f32 %v1562_v19, %v2136_v7  ;;  %v2641_v28 = vpop.permute.xlu1 %464 }
 0x254   :  { %v1410_v36 = vpop.eup %1409  ;;  %v1057_v21 = vmul.f32 %v1408_v18, %v2333_v26  ;;  %1252 = vst [vmem:[%s2870_s3 + $0x160] sm:$0xff] %v1055_v13  ;;  %1435 = vpow2.f32 %v1228_v62  ;;  %v445_v62 = vmul.f32 %v1561_v14, %v2136_v7  ;;  %v1205_v18 = vld [vmem:[%s2867_s0 + $0x1e8] sm:$0xff]  ;;  %v2687_v35 = vadd.f32 %v2641_v28, %v444_v27 }
 0x255   :  { %v1412_v63 = vpop.eup %1411  ;;  %v1058_v5 = vmul.f32 %v1410_v36, %v2342_v30  ;;  %1253 = vst [vmem:[%s2870_s3 + $0x168] sm:$0xff] %v1056_v23  ;;  %1437 = vpow2.f32 %v1229_v25  ;;  %v1204_v25 = vld [vmem:[%s2867_s0 + $0x1e0] sm:$0xff]  ;;  %v811_v23 = vmul.f32 %v1200_v59, %v2136_v7  ;;  %v2680_v59 = vadd.f32 %v2641_v28, %v442_v44 }
 0x256   :  { %v1414_v0 = vpop.eup %1413  ;;  %1254 = vst [vmem:[%s2870_s3 + $0x170] sm:$0xff] %v1057_v21  ;;  %v611_v10 = vadd.f32 1.0, %v1412_v63  ;;  %1439 = vpow2.f32 %v1230_v20  ;;  %v1206_v63 = vld [vmem:[%s2867_s0 + $0x1f0] sm:$0xff]  ;;  %v2697_v14 = vadd.f32 %v2641_v28, %v446_v9 }
 0x257   :  { %v1416_v26 = vpop.eup %1415  ;;  %1255 = vst [vmem:[%s2870_s3 + $0x178] sm:$0xff] %v1058_v5  ;;  %v612_v45 = vadd.f32 1.0, %v1414_v0  ;;  %1441 = vpow2.f32 %v1231_v33  ;;  %v812_v33 = vmul.f32 %v1201_v29, %v2136_v7  ;;  %v813_v5 = vmul.f32 %v1202_v17, %v2136_v7 }
 0x258   :  { %v1418_v30 = vpop.eup %1417  ;;  %v613_v32 = vadd.f32 1.0, %v1416_v26  ;;  %1443 = vrcp.f32 %v611_v10  ;;  %v2653_v0 = vmul.f32 %v1203_v4, %v2136_v7  ;;  %v2692_v4 = vadd.f32 %v2641_v28, %v445_v62 }
 0x259   :  { %v1420_v22 = vpop.eup %1419  ;;  %v614_v47 = vadd.f32 1.0, %v1418_v30  ;;  %1445 = vrcp.f32 %v612_v45  ;;  %v1207_v45 = vld [vmem:[%s2867_s0 + $0x1f8] sm:$0xff]  ;;  %v2659_v30 = vmul.f32 %v1204_v25, %v2136_v7  ;;  %v1171_v27 = vmul.f32 -1.442695, %v2680_v59 }
 0x25a   :  { %v1422_v46 = vpop.eup %1421  ;;  %v615_v41 = vadd.f32 1.0, %v1420_v22  ;;  %1447 = vrcp.f32 %v613_v32  ;;  %v2662_v32 = vadd.f32 %v2641_v28, %v439_v15  ;;  %v2677_v40 = vmul.f32 %v1207_v45, %v2136_v7 }
 0x25b   :  { %v1424_v53 = vpop.eup %1423  ;;  %v616_v8 = vadd.f32 1.0, %v1422_v46  ;;  %1449 = vrcp.f32 %v614_v47  ;;  %v2665_v46 = vmul.f32 %v1205_v18, %v2136_v7  ;;  %v2706_v62 = vadd.f32 %v811_v23, %v2641_v28 }
 0x25c   :  { %v1426_v6 = vpop.eup %1425  ;;  %v617_v58 = vadd.f32 1.0, %v1424_v53  ;;  %1451 = vrcp.f32 %v615_v41  ;;  %v2668_v41 = vadd.f32 %v2641_v28, %v440_v52  ;;  %v2671_v53 = vmul.f32 %v1206_v63, %v2136_v7 }
 0x25d   :  { %v1428_v34 = vpop.eup %1427  ;;  %v618_v37 = vadd.f32 1.0, %v1426_v6  ;;  %1453 = vrcp.f32 %v616_v8  ;;  %v2674_v8 = vadd.f32 %v2641_v28, %v441_v54  ;;  %v2683_v6 = vadd.f32 %v2641_v28, %v443_v31 }
 0x25e   :  { %v1430_v13 = vpop.eup %1429  ;;  %1455 = vrcp.f32 %v617_v58  ;;  %v963_v20 = vadd.f32 1.0, %v1428_v34  ;;  %v1168_v58 = vmul.f32 -1.442695, %v2662_v32  ;;  %v1169_v7 = vmul.f32 -1.442695, %v2668_v41 }
 0x25f   :  { %v1432_v36 = vpop.eup %1431  ;;  %1457 = vrcp.f32 %v618_v37  ;;  %v964_v21 = vadd.f32 1.0, %v1430_v13  ;;  %v1170_v31 = vmul.f32 -1.442695, %v2674_v8  ;;  %v2714_v9 = vadd.f32 %v812_v33, %v2641_v28 }
 0x260   :  { %v1434_v10 = vpop.eup %1433  ;;  %v965_v26 = vadd.f32 1.0, %v1432_v36  ;;  %1459 = vrcp.f32 %v963_v20  ;;  %v2722_v23 = vadd.f32 %v813_v5, %v2641_v28  ;;  %v2731_v33 = vadd.f32 %v2653_v0, %v2641_v28 }
 0x261   :  { %v1436_v22 = vpop.eup %1435  ;;  %v966_v47 = vadd.f32 1.0, %v1434_v10  ;;  %1461 = vrcp.f32 %v964_v21  ;;  %v1232_v5 = vmul.f32 -1.442695, %v2706_v62  ;;  %v1233_v0 = vmul.f32 -1.442695, %v2714_v9 }
 0x262   :  { %v1438_v51 = vpop.eup %1437  ;;  %v967_v60 = vadd.f32 1.0, %v1436_v22  ;;  %1463 = vrcp.f32 %v965_v26 }
 0x263   :  { %v1440_v15 = vpop.eup %1439  ;;  %v968_v48 = vadd.f32 1.0, %v1438_v51  ;;  %1465 = vrcp.f32 %v966_v47  ;;  %v1234_v47 = vmul.f32 -1.442695, %v2722_v23 }
 0x264   :  { %v1442_v52 = vpop.eup %1441  ;;  %v969_v29 = vadd.f32 1.0, %v1440_v15  ;;  %1467 = vrcp.f32 %v967_v60  ;;  %v2766_v60 = vadd.f32 %v2677_v40, %v2641_v28 }
 0x265   :  { %v1444_v57 = vpop.eup %1443  ;;  %v970_v54 = vadd.f32 1.0, %v1442_v52  ;;  %1469 = vrcp.f32 %v968_v48 }
 0x266   :  { %v1446_v17 = vpop.eup %1445  ;;  %v707_v44 = vmul.f32 %v1444_v57, %v2442_v55  ;;  %1471 = vrcp.f32 %v969_v29  ;;  %v1172_v55 = vmul.f32 -1.442695, %v2683_v6  ;;  %v1239_v57 = vmul.f32 -1.442695, %v2766_v60 }
 0x267   :  { %v1448_v34 = vpop.eup %1447  ;;  %v708_v37 = vmul.f32 %v1446_v17, %v2451_v24  ;;  %1473 = vrcp.f32 %v970_v54 }
 0x268   :  { %v1450_v19 = vpop.eup %1449  ;;  %v709_v25 = vmul.f32 %v1448_v34, %v2460_v56  ;;  %739 = vst [vmem:[%s2870_s3 + $0x80] sm:$0xff] %v707_v44  ;;  %1475 = vpow2.f32 %v1168_v58  ;;  %v1173_v56 = vmul.f32 -1.442695, %v2687_v35 }
 0x269   :  { %v1452_v24 = vpop.eup %1451  ;;  %v710_v13 = vmul.f32 %v1450_v19, %v2469_v49  ;;  %740 = vst [vmem:[%s2870_s3 + $0x88] sm:$0xff] %v708_v37  ;;  %1477 = vpow2.f32 %v1169_v7  ;;  %v1174_v49 = vmul.f32 -1.442695, %v2692_v4 }
 0x26a   :  { %v1454_v20 = vpop.eup %1453  ;;  %v711_v18 = vmul.f32 %v1452_v24, %v2472_v16  ;;  %741 = vst [vmem:[%s2870_s3 + $0x90] sm:$0xff] %v709_v25  ;;  %1479 = vpow2.f32 %v1170_v31  ;;  %v1175_v16 = vmul.f32 -1.442695, %v2697_v14 }
 0x26b   :  { %v1456_v36 = vpop.eup %1455  ;;  %v712_v21 = vmul.f32 %v1454_v20, %v2476_v61  ;;  %742 = vst [vmem:[%s2870_s3 + $0x98] sm:$0xff] %v710_v13  ;;  %1481 = vpow2.f32 %v1171_v27  ;;  %v2739_v61 = vadd.f32 %v2659_v30, %v2641_v28 }
 0x26c   :  { %v1458_v63 = vpop.eup %1457  ;;  %v713_v10 = vmul.f32 %v1456_v36, %v2481_v43  ;;  %743 = vst [vmem:[%s2870_s3 + $0xa0] sm:$0xff] %v711_v18  ;;  %1483 = vpow2.f32 %v1172_v55  ;;  %v2748_v43 = vadd.f32 %v2665_v46, %v2641_v28 }
 0x26d   :  { %v1460_v26 = vpop.eup %1459  ;;  %v714_v45 = vmul.f32 %v1458_v63, %v2486_v1  ;;  %744 = vst [vmem:[%s2870_s3 + $0xa8] sm:$0xff] %v712_v21  ;;  %1485 = vpow2.f32 %v1173_v56  ;;  %v2757_v1 = vadd.f32 %v2671_v53, %v2641_v28  ;;  %v1236_v48 = vmul.f32 -1.442695, %v2739_v61 }
 0x26e   :  { %v1462_v22 = vpop.eup %1461  ;;  %745 = vst [vmem:[%s2870_s3 + $0xb0] sm:$0xff] %v713_v10  ;;  %v1059_v30 = vmul.f32 %v1460_v26, %v2495_v42  ;;  %1487 = vpow2.f32 %v1174_v49  ;;  %v1235_v42 = vmul.f32 -1.442695, %v2731_v33  ;;  %v1237_v28 = vmul.f32 -1.442695, %v2748_v43 }
 0x26f   :  { %v1464_v51 = vpop.eup %1463  ;;  %746 = vst [vmem:[%s2870_s3 + $0xb8] sm:$0xff] %v714_v45  ;;  %v1060_v46 = vmul.f32 %v1462_v22, %v2504_v39  ;;  %1489 = vpow2.f32 %v1175_v16  ;;  %v1238_v29 = vmul.f32 -1.442695, %v2757_v1 }
 0x270   :  { %v1466_v15 = vpop.eup %1465  ;;  %v1061_v53 = vmul.f32 %v1464_v51, %v2513_v38  ;;  %1256 = vst [vmem:[%s2870_s3 + $0x180] sm:$0xff] %v1059_v30  ;;  %1491 = vpow2.f32 %v1232_v5 }
 0x271   :  { %v1468_v52 = vpop.eup %1467  ;;  %v1062_v39 = vmul.f32 %v1466_v15, %v2522_v11  ;;  %1257 = vst [vmem:[%s2870_s3 + $0x188] sm:$0xff] %v1060_v46  ;;  %1493 = vpow2.f32 %v1233_v0 }
 0x272   :  { %v1470_v40 = vpop.eup %1469  ;;  %v1063_v38 = vmul.f32 %v1468_v52, %v2530_v2  ;;  %1258 = vst [vmem:[%s2870_s3 + $0x190] sm:$0xff] %v1061_v53  ;;  %1495 = vpow2.f32 %v1234_v47 }
 0x273   :  { %v1472_v58 = vpop.eup %1471  ;;  %v1064_v11 = vmul.f32 %v1470_v40, %v2539_v50  ;;  %1259 = vst [vmem:[%s2870_s3 + $0x198] sm:$0xff] %v1062_v39  ;;  %1497 = vpow2.f32 %v1235_v42 }
 0x274   :  { %v1474_v54 = vpop.eup %1473  ;;  %v1065_v2 = vmul.f32 %v1472_v58, %v2548_v3  ;;  %1260 = vst [vmem:[%s2870_s3 + $0x1a0] sm:$0xff] %v1063_v38  ;;  %1499 = vpow2.f32 %v1236_v48 }
 0x275   :  { %v1476_v7 = vpop.eup %1475  ;;  %v1066_v17 = vmul.f32 %v1474_v54, %v2557_v12  ;;  %1261 = vst [vmem:[%s2870_s3 + $0x1a8] sm:$0xff] %v1064_v11  ;;  %1501 = vpow2.f32 %v1237_v28 }
 0x276   :  { %v1478_v50 = vpop.eup %1477  ;;  %1262 = vst [vmem:[%s2870_s3 + $0x1b0] sm:$0xff] %v1065_v2  ;;  %v619_v44 = vadd.f32 1.0, %v1476_v7  ;;  %1503 = vpow2.f32 %v1238_v29 }
 0x277   :  { %v1480_v3 = vpop.eup %1479  ;;  %1263 = vst [vmem:[%s2870_s3 + $0x1b8] sm:$0xff] %v1066_v17  ;;  %v620_v31 = vadd.f32 1.0, %v1478_v50  ;;  %1505 = vpow2.f32 %v1239_v57 }
 0x278   :  { %v1482_v12 = vpop.eup %1481  ;;  %v621_v34 = vadd.f32 1.0, %v1480_v3  ;;  %1507 = vrcp.f32 %v619_v44 }
 0x279   :  { %v1484_v37 = vpop.eup %1483  ;;  %v622_v27 = vadd.f32 1.0, %v1482_v12  ;;  %1509 = vrcp.f32 %v620_v31 }
 0x27a   :  { %v1486_v19 = vpop.eup %1485  ;;  %v623_v25 = vadd.f32 1.0, %v1484_v37  ;;  %1511 = vrcp.f32 %v621_v34 }
 0x27b   :  { %v1488_v55 = vpop.eup %1487  ;;  %v624_v24 = vadd.f32 1.0, %v1486_v19  ;;  %1513 = vrcp.f32 %v622_v27 }
 0x27c   :  { %v1490_v13 = vpop.eup %1489  ;;  %v625_v56 = vadd.f32 1.0, %v1488_v55  ;;  %1515 = vrcp.f32 %v623_v25 }
 0x27d   :  { %v1492_v20 = vpop.eup %1491  ;;  %v626_v18 = vadd.f32 1.0, %v1490_v13  ;;  %1517 = vrcp.f32 %v624_v24 }
 0x27e   :  { %v1494_v49 = vpop.eup %1493  ;;  %1519 = vrcp.f32 %v625_v56  ;;  %v971_v36 = vadd.f32 1.0, %v1492_v20 }
 0x27f   :  { %v1496_v21 = vpop.eup %1495  ;;  %1521 = vrcp.f32 %v626_v18  ;;  %v972_v16 = vadd.f32 1.0, %v1494_v49 }
 0x280   :  { %v1498_v63 = vpop.eup %1497  ;;  %v973_v10 = vadd.f32 1.0, %v1496_v21  ;;  %1523 = vrcp.f32 %v971_v36 }
 0x281   :  { %v1500_v5 = vpop.eup %1499  ;;  %v974_v26 = vadd.f32 1.0, %v1498_v63  ;;  %1525 = vrcp.f32 %v972_v16 }
 0x282   :  { %v1502_v45 = vpop.eup %1501  ;;  %v975_v0 = vadd.f32 1.0, %v1500_v5  ;;  %1527 = vrcp.f32 %v973_v10 }
 0x283   :  { %v1504_v22 = vpop.eup %1503  ;;  %v976_v30 = vadd.f32 1.0, %v1502_v45  ;;  %1529 = vrcp.f32 %v974_v26 }
 0x284   :  { %v1506_v47 = vpop.eup %1505  ;;  %v977_v51 = vadd.f32 1.0, %v1504_v22  ;;  %1531 = vrcp.f32 %v975_v0 }
 0x285   :  { %v1508_v46 = vpop.eup %1507  ;;  %v978_v42 = vadd.f32 1.0, %v1506_v47  ;;  %1533 = vrcp.f32 %v976_v30 }
 0x286   :  { %v1510_v15 = vpop.eup %1509  ;;  %v715_v53 = vmul.f32 %v1508_v46, %v2662_v32  ;;  %1535 = vrcp.f32 %v977_v51 }
 0x287   :  { %v1512_v48 = vpop.eup %1511  ;;  %v716_v52 = vmul.f32 %v1510_v15, %v2668_v41  ;;  %1537 = vrcp.f32 %v978_v42 }
 0x288   :  { %v1514_v39 = vpop.eup %1513  ;;  %v717_v28 = vmul.f32 %v1512_v48, %v2674_v8  ;;  %747 = vst [vmem:[%s2870_s3 + $0xc0] sm:$0xff] %v715_v53 }
 0x289   :  { %v1516_v40 = vpop.eup %1515  ;;  %v718_v38 = vmul.f32 %v1514_v39, %v2680_v59  ;;  %748 = vst [vmem:[%s2870_s3 + $0xc8] sm:$0xff] %v716_v52 }
 0x28a   :  { %v1518_v32 = vpop.eup %1517  ;;  %v719_v29 = vmul.f32 %v1516_v40, %v2683_v6  ;;  %749 = vst [vmem:[%s2870_s3 + $0xd0] sm:$0xff] %v717_v28 }
 0x28b   :  { %v1520_v41 = vpop.eup %1519  ;;  %v720_v8 = vmul.f32 %v1518_v32, %v2687_v35  ;;  %750 = vst [vmem:[%s2870_s3 + $0xd8] sm:$0xff] %v718_v38 }
 0x28c   :  { %v1522_v58 = vpop.eup %1521  ;;  %v721_v59 = vmul.f32 %v1520_v41, %v2692_v4  ;;  %751 = vst [vmem:[%s2870_s3 + $0xe0] sm:$0xff] %v719_v29 }
 0x28d   :  { %v1524_v11 = vpop.eup %1523  ;;  %v722_v6 = vmul.f32 %v1522_v58, %v2697_v14  ;;  %752 = vst [vmem:[%s2870_s3 + $0xe8] sm:$0xff] %v720_v8 }
 0x28e   :  { %v1526_v57 = vpop.eup %1525  ;;  %753 = vst [vmem:[%s2870_s3 + $0xf0] sm:$0xff] %v721_v59  ;;  %v1067_v35 = vmul.f32 %v1524_v11, %v2706_v62 }
 0x28f   :  { %v1528_v54 = vpop.eup %1527  ;;  %754 = vst [vmem:[%s2870_s3 + $0xf8] sm:$0xff] %v722_v6  ;;  %v1068_v4 = vmul.f32 %v1526_v57, %v2714_v9 }
 0x290   :  { %v1530_v2 = vpop.eup %1529  ;;  %v1069_v14 = vmul.f32 %v1528_v54, %v2722_v23  ;;  %1264 = vst [vmem:[%s2870_s3 + $0x1c0] sm:$0xff] %v1067_v35 }
 0x291   :  { %v1532_v7 = vpop.eup %1531  ;;  %v1070_v17 = vmul.f32 %v1530_v2, %v2731_v33  ;;  %1265 = vst [vmem:[%s2870_s3 + $0x1c8] sm:$0xff] %v1068_v4 }
 0x292   :  { %v1534_v62 = vpop.eup %1533  ;;  %v1071_v50 = vmul.f32 %v1532_v7, %v2739_v61  ;;  %1266 = vst [vmem:[%s2870_s3 + $0x1d0] sm:$0xff] %v1069_v14 }
 0x293   :  { %v1536_v9 = vpop.eup %1535  ;;  %v1072_v23 = vmul.f32 %v1534_v62, %v2748_v43  ;;  %1267 = vst [vmem:[%s2870_s3 + $0x1d8] sm:$0xff] %v1070_v17 }
 0x294   :  { %v1538_v44 = vpop.eup %1537  ;;  %v1073_v33 = vmul.f32 %v1536_v9, %v2757_v1  ;;  %1268 = vst [vmem:[%s2870_s3 + $0x1e0] sm:$0xff] %v1071_v50 }
 0x295   :  { %v1074_v61 = vmul.f32 %v1538_v44, %v2766_v60  ;;  %1269 = vst [vmem:[%s2870_s3 + $0x1e8] sm:$0xff] %v1072_v23 }
 0x296   :  { %1270 = vst [vmem:[%s2870_s3 + $0x1f0] sm:$0xff] %v1073_v33 }
 0x297   :  { %1271 = vst [vmem:[%s2870_s3 + $0x1f8] sm:$0xff] %v1074_v61 }

// kernel: image_decoder_conv_forward.9
= control target key start
LH: loop header
LB: loop body
LE: loop exit
PB: predicated region body
PF: predicated region fallthrough
CT: control target
= control target key end

     0   :  { %s478_s0 = inlined_call_operand.vmem [shape: f32[24,1024], index: 0, kind: input, shape index: {}, may-alias: {0,1}]   ;;  %s479_s1 = inlined_call_operand.vmem [shape: f32[24,1024], index: 1, kind: output, shape index: {}, may-alias: {0,1}]  }
   0x1   :  { %v8_v0 = vld [vmem:[%s478_s0] sm:$0xff]  ;;  %v9_v1 = vld [vmem:[%s478_s0 + $0x8] sm:$0xff]  ;;  %v10_v2 = vld [vmem:[%s478_s0 + $0x10] sm:$0xff] }
   0x2   :  { %v204_v3 = vmul.f32 -1.442695, %v8_v0  ;;  %v205_v4 = vmul.f32 -1.442695, %v9_v1  ;;  %v206_v5 = vmul.f32 -1.442695, %v10_v2 }
   0x3   :  { %v11_v6 = vld [vmem:[%s478_s0 + $0x18] sm:$0xff]  ;;  %v12_v7 = vld [vmem:[%s478_s0 + $0x20] sm:$0xff]  ;;  %v13_v8 = vld [vmem:[%s478_s0 + $0x28] sm:$0xff] }
   0x4   :  { %228 = vpow2.f32 %v204_v3  ;;  %v207_v9 = vmul.f32 -1.442695, %v11_v6  ;;  %v208_v10 = vmul.f32 -1.442695, %v12_v7  ;;  %v209_v11 = vmul.f32 -1.442695, %v13_v8 }
   0x5   :  { %230 = vpow2.f32 %v205_v4  ;;  %v14_v12 = vld [vmem:[%s478_s0 + $0x30] sm:$0xff]  ;;  %v15_v13 = vld [vmem:[%s478_s0 + $0x38] sm:$0xff]  ;;  %v16_v14 = vld [vmem:[%s478_s0 + $0x40] sm:$0xff] }
   0x6   :  { %232 = vpow2.f32 %v206_v5  ;;  %v210_v15 = vmul.f32 -1.442695, %v14_v12  ;;  %v211_v16 = vmul.f32 -1.442695, %v15_v13  ;;  %v17_v17 = vld [vmem:[%s478_s0 + $0x48] sm:$0xff]  ;;  %v18_v18 = vld [vmem:[%s478_s0 + $0x50] sm:$0xff] }
   0x7   :  { %234 = vpow2.f32 %v207_v9  ;;  %v212_v19 = vmul.f32 -1.442695, %v16_v14  ;;  %v19_v20 = vld [vmem:[%s478_s0 + $0x58] sm:$0xff]  ;;  %v213_v21 = vmul.f32 -1.442695, %v17_v17  ;;  %v20_v22 = vld [vmem:[%s478_s0 + $0x60] sm:$0xff] }
   0x8   :  { %236 = vpow2.f32 %v208_v10  ;;  %v214_v23 = vmul.f32 -1.442695, %v18_v18  ;;  %v21_v24 = vld [vmem:[%s478_s0 + $0x68] sm:$0xff]  ;;  %v215_v25 = vmul.f32 -1.442695, %v19_v20  ;;  %v22_v26 = vld [vmem:[%s478_s0 + $0x70] sm:$0xff] }
   0x9   :  { %238 = vpow2.f32 %v209_v11  ;;  %v216_v27 = vmul.f32 -1.442695, %v20_v22  ;;  %v23_v28 = vld [vmem:[%s478_s0 + $0x78] sm:$0xff]  ;;  %v217_v29 = vmul.f32 -1.442695, %v21_v24  ;;  %v24_v57 = vld [vmem:[%s478_s0 + $0x80] sm:$0xff] }
   0xa   :  { %240 = vpow2.f32 %v210_v15  ;;  %v218_v30 = vmul.f32 -1.442695, %v22_v26  ;;  %v219_v31 = vmul.f32 -1.442695, %v23_v28  ;;  %v25_v60 = vld [vmem:[%s478_s0 + $0x88] sm:$0xff]  ;;  %v26_v63 = vld [vmem:[%s478_s0 + $0x90] sm:$0xff] }
   0xb   :  { %242 = vpow2.f32 %v211_v16  ;;  %v220_v2 = vmul.f32 -1.442695, %v24_v57  ;;  %v27_v3 = vld [vmem:[%s478_s0 + $0x98] sm:$0xff]  ;;  %v221_v6 = vmul.f32 -1.442695, %v25_v60  ;;  %v28_v7 = vld [vmem:[%s478_s0 + $0xa0] sm:$0xff] }
   0xc   :  { %244 = vpow2.f32 %v212_v19  ;;  %v222_v9 = vmul.f32 -1.442695, %v26_v63  ;;  %v223_v12 = vmul.f32 -1.442695, %v27_v3  ;;  %v224_v15 = vmul.f32 -1.442695, %v28_v7 }
   0xd   :  { %246 = vpow2.f32 %v213_v21 }
   0xe   :  { %248 = vpow2.f32 %v214_v23 }
   0xf   :  { %250 = vpow2.f32 %v215_v25 }
  0x10   :  { %252 = vpow2.f32 %v216_v27 }
  0x11   :  { %v229_v32 = vpop.eup %228  ;;  %254 = vpow2.f32 %v217_v29 }
  0x12   :  { %v231_v33 = vpop.eup %230  ;;  %v104_v34 = vadd.f32 1.0, %v229_v32  ;;  %256 = vpow2.f32 %v218_v30 }
  0x13   :  { %v233_v35 = vpop.eup %232  ;;  %v105_v36 = vadd.f32 1.0, %v231_v33  ;;  %258 = vpow2.f32 %v219_v31 }
  0x14   :  { %v235_v37 = vpop.eup %234  ;;  %260 = vrcp.f32 %v104_v34  ;;  %v106_v38 = vadd.f32 1.0, %v233_v35 }
  0x15   :  { %v237_v39 = vpop.eup %236  ;;  %262 = vrcp.f32 %v105_v36  ;;  %v107_v40 = vadd.f32 1.0, %v235_v37 }
  0x16   :  { %v239_v41 = vpop.eup %238  ;;  %264 = vrcp.f32 %v106_v38  ;;  %v108_v42 = vadd.f32 1.0, %v237_v39 }
  0x17   :  { %v241_v43 = vpop.eup %240  ;;  %266 = vrcp.f32 %v107_v40  ;;  %v109_v44 = vadd.f32 1.0, %v239_v41 }
  0x18   :  { %v243_v45 = vpop.eup %242  ;;  %268 = vrcp.f32 %v108_v42  ;;  %v110_v46 = vadd.f32 1.0, %v241_v43 }
  0x19   :  { %v245_v47 = vpop.eup %244  ;;  %270 = vrcp.f32 %v109_v44  ;;  %v111_v48 = vadd.f32 1.0, %v243_v45 }
  0x1a   :  { %v247_v49 = vpop.eup %246  ;;  %272 = vrcp.f32 %v110_v46  ;;  %v112_v50 = vadd.f32 1.0, %v245_v47 }
  0x1b   :  { %v249_v51 = vpop.eup %248  ;;  %274 = vrcp.f32 %v111_v48  ;;  %v113_v52 = vadd.f32 1.0, %v247_v49 }
  0x1c   :  { %v251_v53 = vpop.eup %250  ;;  %276 = vrcp.f32 %v112_v50  ;;  %v114_v54 = vadd.f32 1.0, %v249_v51 }
  0x1d   :  { %v253_v55 = vpop.eup %252  ;;  %278 = vrcp.f32 %v113_v52  ;;  %v115_v56 = vadd.f32 1.0, %v251_v53 }
  0x1e   :  { %v255_v58 = vpop.eup %254  ;;  %280 = vrcp.f32 %v114_v54  ;;  %v116_v59 = vadd.f32 1.0, %v253_v55 }
  0x1f   :  { %v257_v61 = vpop.eup %256  ;;  %282 = vrcp.f32 %v115_v56  ;;  %v117_v62 = vadd.f32 1.0, %v255_v58 }
  0x20   :  { %v259_v0 = vpop.eup %258  ;;  %284 = vrcp.f32 %v116_v59  ;;  %v118_v1 = vadd.f32 1.0, %v257_v61 }
  0x21   :  { %v261_v4 = vpop.eup %260  ;;  %286 = vrcp.f32 %v117_v62  ;;  %v119_v5 = vadd.f32 1.0, %v259_v0 }
  0x22   :  { %v263_v8 = vpop.eup %262  ;;  %176 = vst [vmem:[%s479_s1] sm:$0xff] %v261_v4  ;;  %288 = vrcp.f32 %v118_v1 }
  0x23   :  { %v265_v11 = vpop.eup %264  ;;  %290 = vrcp.f32 %v119_v5 }
  0x24   :  { %v267_v14 = vpop.eup %266  ;;  %292 = vpow2.f32 %v220_v2 }
  0x25   :  { %v269_v17 = vpop.eup %268  ;;  %294 = vpow2.f32 %v221_v6 }
  0x26   :  { %v271_v19 = vpop.eup %270  ;;  %296 = vpow2.f32 %v222_v9 }
  0x27   :  { %v273_v21 = vpop.eup %272  ;;  %298 = vpow2.f32 %v223_v12 }
  0x28   :  { %v275_v23 = vpop.eup %274  ;;  %300 = vpow2.f32 %v224_v15 }
  0x29   :  { %v29_v10 = vld [vmem:[%s478_s0 + $0xa8] sm:$0xff]  ;;  %v277_v24 = vpop.eup %276 }
  0x2a   :  { %177 = vst [vmem:[%s479_s1 + $0x8] sm:$0xff] %v263_v8  ;;  %v225_v18 = vmul.f32 -1.442695, %v29_v10  ;;  %v279_v25 = vpop.eup %278 }
  0x2b   :  { %v281_v26 = vpop.eup %280 }
  0x2c   :  { %302 = vpow2.f32 %v225_v18  ;;  %v283_v27 = vpop.eup %282 }
  0x2d   :  { %v285_v28 = vpop.eup %284 }
  0x2e   :  { %v287_v29 = vpop.eup %286 }
  0x2f   :  { %v289_v30 = vpop.eup %288 }
  0x30   :  { %v291_v31 = vpop.eup %290 }
  0x31   :  { %v30_v13 = vld [vmem:[%s478_s0 + $0xb0] sm:$0xff]  ;;  %v293_v32 = vpop.eup %292 }
  0x32   :  { %178 = vst [vmem:[%s479_s1 + $0x10] sm:$0xff] %v265_v11  ;;  %v226_v20 = vmul.f32 -1.442695, %v30_v13  ;;  %v295_v33 = vpop.eup %294  ;;  %v120_v34 = vadd.f32 1.0, %v293_v32 }
  0x33   :  { %v297_v35 = vpop.eup %296  ;;  %v121_v36 = vadd.f32 1.0, %v295_v33 }
  0x34   :  { %304 = vpow2.f32 %v226_v20  ;;  %v299_v37 = vpop.eup %298  ;;  %v122_v38 = vadd.f32 1.0, %v297_v35 }
  0x35   :  { %v301_v39 = vpop.eup %300  ;;  %v123_v40 = vadd.f32 1.0, %v299_v37 }
  0x36   :  { %v124_v42 = vadd.f32 1.0, %v301_v39 }
  0x39   :  { %v31_v16 = vld [vmem:[%s478_s0 + $0xb8] sm:$0xff]  ;;  %v303_v41 = vpop.eup %302 }
  0x3a   :  { %179 = vst [vmem:[%s479_s1 + $0x18] sm:$0xff] %v267_v14  ;;  %180 = vst [vmem:[%s479_s1 + $0x20] sm:$0xff] %v269_v17  ;;  %v227_v22 = vmul.f32 -1.442695, %v31_v16  ;;  %v125_v44 = vadd.f32 1.0, %v303_v41 }
  0x3b   :  { %181 = vst [vmem:[%s479_s1 + $0x28] sm:$0xff] %v271_v19  ;;  %182 = vst [vmem:[%s479_s1 + $0x30] sm:$0xff] %v273_v21 }
  0x3c   :  { %183 = vst [vmem:[%s479_s1 + $0x38] sm:$0xff] %v275_v23  ;;  %184 = vst [vmem:[%s479_s1 + $0x40] sm:$0xff] %v277_v24  ;;  %306 = vpow2.f32 %v227_v22 }
  0x3d   :  { %185 = vst [vmem:[%s479_s1 + $0x48] sm:$0xff] %v279_v25  ;;  %186 = vst [vmem:[%s479_s1 + $0x50] sm:$0xff] %v281_v26  ;;  %308 = vrcp.f32 %v120_v34 }
  0x3e   :  { %187 = vst [vmem:[%s479_s1 + $0x58] sm:$0xff] %v283_v27  ;;  %188 = vst [vmem:[%s479_s1 + $0x60] sm:$0xff] %v285_v28  ;;  %310 = vrcp.f32 %v121_v36 }
  0x3f   :  { %189 = vst [vmem:[%s479_s1 + $0x68] sm:$0xff] %v287_v29  ;;  %190 = vst [vmem:[%s479_s1 + $0x70] sm:$0xff] %v289_v30  ;;  %312 = vrcp.f32 %v122_v38 }
  0x40   :  { %191 = vst [vmem:[%s479_s1 + $0x78] sm:$0xff] %v291_v31  ;;  %314 = vrcp.f32 %v123_v40 }
  0x41   :  { %v305_v43 = vpop.eup %304  ;;  %316 = vrcp.f32 %v124_v42 }
  0x42   :  { %v126_v46 = vadd.f32 1.0, %v305_v43  ;;  %318 = vrcp.f32 %v125_v44 }
  0x44   :  { %320 = vrcp.f32 %v126_v46 }
  0x49   :  { %v307_v45 = vpop.eup %306 }
  0x4a   :  { %v127_v47 = vadd.f32 1.0, %v307_v45  ;;  %v309_v48 = vpop.eup %308 }
  0x4b   :  { %v311_v49 = vpop.eup %310  ;;  %192 = vst [vmem:[%s479_s1 + $0x80] sm:$0xff] %v309_v48 }
  0x4c   :  { %322 = vrcp.f32 %v127_v47  ;;  %v313_v50 = vpop.eup %312  ;;  %193 = vst [vmem:[%s479_s1 + $0x88] sm:$0xff] %v311_v49 }
  0x4d   :  { %v315_v51 = vpop.eup %314  ;;  %194 = vst [vmem:[%s479_s1 + $0x90] sm:$0xff] %v313_v50 }
  0x4e   :  { %v317_v52 = vpop.eup %316  ;;  %195 = vst [vmem:[%s479_s1 + $0x98] sm:$0xff] %v315_v51 }
  0x4f   :  { %v319_v53 = vpop.eup %318  ;;  %196 = vst [vmem:[%s479_s1 + $0xa0] sm:$0xff] %v317_v52 }
  0x50   :  { %197 = vst [vmem:[%s479_s1 + $0xa8] sm:$0xff] %v319_v53 }
  0x51   :  { %v321_v54 = vpop.eup %320 }
  0x52   :  { %198 = vst [vmem:[%s479_s1 + $0xb0] sm:$0xff] %v321_v54 }
  0x59   :  { %v323_v55 = vpop.eup %322 }
  0x5a   :  { %199 = vst [vmem:[%s479_s1 + $0xb8] sm:$0xff] %v323_v55 }

</bundles_post_ra>
